<compile_context>
chip_gen: v6e
topology: v6e:2x2x1
jax: 0.10.0
libtpu: 0.0.40
codegen_flags: <defaults>
</compile_context>

<pallas_src>
import functools

import jax
import jax.numpy as jnp
from jax.experimental import pallas as pl
from jax.experimental.pallas import tpu as pltpu

EPS = 1e-3                      # nn.BatchNorm2d(eps=0.001)
_ACT_DTYPE = jnp.bfloat16       # inter-layer activation dtype
_MAX_TM = 512                   # max rows per grid step
_VMEM_LIMIT = 32 * 1024 * 1024  # safe on v5e/v6e/v7x; per-step footprint is ~MBs


# --------------------------------------------------------------------------
# Tiling helpers
# --------------------------------------------------------------------------
def _round_up(x, m):
    return (x + m - 1) // m * m


def _tile_rows(M):
    """Pick an M tile (multiple of 8, <=512, >=2 grid steps when feasible)."""
    m8 = _round_up(M, 8)
    if m8 <= 16:
        tm = m8
    else:
        tm = min(_MAX_TM, _round_up(m8 // 2, 8))
    Mp = _round_up(m8, tm)
    return tm, Mp


def _pad_rows(a, Mp):
    M = a.shape[0]
    if M == Mp:
        return a
    return jnp.pad(a, ((0, Mp - M), (0, 0)))


def _compiler_params():
    return pltpu.CompilerParams(dimension_semantics=("parallel",),
                                vmem_limit_bytes=_VMEM_LIMIT)


# --------------------------------------------------------------------------
# Pallas kernels
# --------------------------------------------------------------------------
def _mm_kernel(x_ref, w_ref, b_ref, o_ref, *, relu):
    acc = jnp.dot(x_ref[...], w_ref[...], preferred_element_type=jnp.float32)
    acc = acc + b_ref[...]
    if relu:
        acc = jnp.maximum(acc, 0.0)
    o_ref[...] = acc.astype(o_ref.dtype)


def _mm_res_kernel(x_ref, w_ref, b_ref, r_ref, o_ref, *, relu):
    acc = jnp.dot(x_ref[...], w_ref[...], preferred_element_type=jnp.float32)
    acc = acc + b_ref[...] + r_ref[...].astype(jnp.float32)
    if relu:
        acc = jnp.maximum(acc, 0.0)
    o_ref[...] = acc.astype(o_ref.dtype)


def _down_kernel(x_ref, w_ref, a_ref, b2_ref, c_ref, d_ref, sel_ref, bias_ref,
                 o_ref):
    # conv branch: weight already BN-folded, zero columns for pool channels
    acc = jnp.dot(x_ref[...], w_ref[...], preferred_element_type=jnp.float32)
    # pool branch: 2x2 max, then BN-scale + channel placement via sel matmul
    pool = jnp.maximum(jnp.maximum(a_ref[...], b2_ref[...]),
                       jnp.maximum(c_ref[...], d_ref[...]))
    acc = acc + jnp.dot(pool, sel_ref[...], preferred_element_type=jnp.float32)
    acc = acc + bias_ref[...]
    o_ref[...] = jnp.maximum(acc, 0.0).astype(o_ref.dtype)


# --------------------------------------------------------------------------
# Pallas call wrappers
# --------------------------------------------------------------------------
def matmul_fused(x, w, b, residual=None, relu=False, out_dtype=_ACT_DTYPE):
    """out = maybe_relu(x @ w + b [+ residual]).  x:(M,K) bf16, w:(K,N) bf16."""
    M, K = x.shape
    Nc = w.shape[1]
    tm, Mp = _tile_rows(M)
    grid = (Mp // tm,)

    x = _pad_rows(x.astype(jnp.bfloat16), Mp)
    w = w.astype(jnp.bfloat16)
    b = b.reshape(1, Nc).astype(jnp.float32)

    row_spec = pl.BlockSpec((tm, K), lambda i: (i, 0))
    w_spec = pl.BlockSpec((K, Nc), lambda i: (0, 0))
    b_spec = pl.BlockSpec((1, Nc), lambda i: (0, 0))
    out_spec = pl.BlockSpec((tm, Nc), lambda i: (i, 0))

    if residual is None:
        out = pl.pallas_call(
            functools.partial(_mm_kernel, relu=relu),
            out_shape=jax.ShapeDtypeStruct((Mp, Nc), out_dtype),
            grid=grid,
            in_specs=[row_spec, w_spec, b_spec],
            out_specs=out_spec,
            compiler_params=_compiler_params(),
        )(x, w, b)
    else:
        res = _pad_rows(residual.astype(_ACT_DTYPE), Mp)
        r_spec = pl.BlockSpec((tm, Nc), lambda i: (i, 0))
        out = pl.pallas_call(
            functools.partial(_mm_res_kernel, relu=relu),
            out_shape=jax.ShapeDtypeStruct((Mp, Nc), out_dtype),
            grid=grid,
            in_specs=[row_spec, w_spec, b_spec, r_spec],
            out_specs=out_spec,
            compiler_params=_compiler_params(),
        )(x, w, b, res)
    return out[:M] if Mp != M else out


def downsampler_fused(im2col, a, b, c, d, w, sel, bias):
    """Fused DownsamplerBlock: relu(BN(cat[conv3x3s2(x), maxpool2x2(x)]))."""
    M, K = im2col.shape
    Cout = w.shape[1]
    Cin = a.shape[1]
    tm, Mp = _tile_rows(M)
    grid = (Mp // tm,)

    im2col = _pad_rows(im2col, Mp)
    a, b, c, d = [_pad_rows(t, Mp) for t in (a, b, c, d)]

    out = pl.pallas_call(
        _down_kernel,
        out_shape=jax.ShapeDtypeStruct((Mp, Cout), _ACT_DTYPE),
        grid=grid,
        in_specs=[
            pl.BlockSpec((tm, K), lambda i: (i, 0)),
            pl.BlockSpec((K, Cout), lambda i: (0, 0)),
            pl.BlockSpec((tm, Cin), lambda i: (i, 0)),
            pl.BlockSpec((tm, Cin), lambda i: (i, 0)),
            pl.BlockSpec((tm, Cin), lambda i: (i, 0)),
            pl.BlockSpec((tm, Cin), lambda i: (i, 0)),
            pl.BlockSpec((Cin, Cout), lambda i: (0, 0)),
            pl.BlockSpec((1, Cout), lambda i: (0, 0)),
        ],
        out_specs=pl.BlockSpec((tm, Cout), lambda i: (i, 0)),
        compiler_params=_compiler_params(),
    )(im2col, w, a, b, c, d, sel, bias)
    return out[:M] if Mp != M else out


# --------------------------------------------------------------------------
# Conv wrappers (im2col glue -> fused Pallas matmul)
# --------------------------------------------------------------------------
def conv2d(x, w2d, bias, *, kh, kw, stride=(1, 1), padding=(0, 0),
           dilation=(1, 1), residual=None, relu=False, out_dtype=_ACT_DTYPE):
    """x: NHWC (bf16).  w2d: pre-folded (kh*kw*Cin, Cout) bf16."""
    N, H, W, Cin = x.shape
    Cout = w2d.shape[1]
    sh, sw = stride
    ph, pw = padding
    dh, dw = dilation
    Hout = (H + 2 * ph - dh * (kh - 1) - 1) // sh + 1
    Wout = (W + 2 * pw - dw * (kw - 1) - 1) // sw + 1

    xp = jnp.pad(x, ((0, 0), (ph, ph), (pw, pw), (0, 0)))
    patches = []
    for i in range(kh):
        for j in range(kw):
            patches.append(
                xp[:, i * dh: i * dh + sh * (Hout - 1) + 1: sh,
                      j * dw: j * dw + sw * (Wout - 1) + 1: sw, :])
    im2col = jnp.concatenate(patches, axis=-1).reshape(
        N * Hout * Wout, kh * kw * Cin)

    res = None if residual is None else residual.reshape(N * Hout * Wout, Cout)
    out = matmul_fused(im2col, w2d, bias, residual=res, relu=relu,
                       out_dtype=out_dtype)
    return out.reshape(N, Hout, Wout, Cout)


# --------------------------------------------------------------------------
# ERFNet blocks (take pre-folded inference params)
# --------------------------------------------------------------------------
def downsampler_block(x, p):
    N, H, W, Cin = x.shape
    Ho, Wo = H // 2, W // 2
    Cout = p["w"].shape[1]

    xp = jnp.pad(x, ((0, 0), (1, 1), (1, 1), (0, 0)))
    patches = []
    for i in range(3):
        for j in range(3):
            patches.append(xp[:, i: i + 2 * (Ho - 1) + 1: 2,
                                 j: j + 2 * (Wo - 1) + 1: 2, :])
    im2col = jnp.concatenate(patches, axis=-1).reshape(N * Ho * Wo, 9 * Cin)

    a = x[:, 0::2, 0::2, :].reshape(-1, Cin)
    b = x[:, 0::2, 1::2, :].reshape(-1, Cin)
    c = x[:, 1::2, 0::2, :].reshape(-1, Cin)
    d = x[:, 1::2, 1::2, :].reshape(-1, Cin)

    out = downsampler_fused(im2col, a, b, c, d, p["w"], p["sel"], p["bias"])
    return out.reshape(N, Ho, Wo, Cout)


def non_bottleneck_1d(x, p, dilated):
    o = conv2d(x, p["w31_1"], p["b31_1"], kh=3, kw=1, padding=(1, 0), relu=True)
    o = conv2d(o, p["w13_1"], p["b13_1"], kh=1, kw=3, padding=(0, 1), relu=True)
    o = conv2d(o, p["w31_2"], p["b31_2"], kh=3, kw=1,
               padding=(dilated, 0), dilation=(dilated, 1), relu=True)
    o = conv2d(o, p["w13_2"], p["b13_2"], kh=1, kw=3,
               padding=(0, dilated), dilation=(1, dilated),
               residual=x, relu=True)
    return o


def upsampler_block(x, p, relu=True, out_dtype=_ACT_DTYPE):
    """Sub-pixel transposed conv: one matmul at input resolution for 4 phases."""
    N, H, W, Cin = x.shape
    Cout = p["w"].shape[1] // 4
    if p["w"].shape[0] == 4 * Cin:          # 3x3 stride-2 pad-1 opad-1 (4 taps)
        xp = jnp.pad(x, ((0, 0), (0, 1), (0, 1), (0, 0)))
        t0 = xp[:, :H, :W, :]
        t1 = xp[:, :H, 1:W + 1, :]
        t2 = xp[:, 1:H + 1, :W, :]
        t3 = xp[:, 1:H + 1, 1:W + 1, :]
        xin = jnp.concatenate([t0, t1, t2, t3], axis=-1).reshape(
            N * H * W, 4 * Cin)
    else:                                    # 2x2 stride-2 pad-0 (single tap)
        xin = x.reshape(N * H * W, Cin)
    out = matmul_fused(xin, p["w"], p["bias"], relu=relu, out_dtype=out_dtype)
    out = out.reshape(N, H, W, 2, 2, Cout)
    out = jnp.transpose(out, (0, 1, 3, 2, 4, 5)).reshape(N, 2 * H, 2 * W, Cout)
    return out


def erfnet_forward(prep, x_nchw):
    x = jnp.transpose(x_nchw, (0, 2, 3, 1)).astype(_ACT_DTYPE)  # NCHW -> NHWC

    e = prep["enc"]
    o = downsampler_block(x, e["initial"])          # 16 ch, H/2
    o = downsampler_block(o, e["down1"])            # 64 ch, H/4
    for p in e["nb64"]:
        o = non_bottleneck_1d(o, p, 1)
    o = downsampler_block(o, e["down2"])            # 128 ch, H/8
    for p, dd in zip(e["nb128"], [2, 4, 8, 16, 2, 4, 8, 16]):
        o = non_bottleneck_1d(o, p, dd)
    # multitask=False -> output_road is None

    d = prep["dec"]
    o = upsampler_block(o, d["up1"])                # 64 ch, H/4
    for p in d["nb_a"]:
        o = non_bottleneck_1d(o, p, 1)
    o = upsampler_block(o, d["up2"])                # 16 ch, H/2
    for p in d["nb_b"]:
        o = non_bottleneck_1d(o, p, 1)
    o = upsampler_block(o, d["out"], relu=False,
                        out_dtype=jnp.float32)      # num_classes ch, H
    return jnp.transpose(o, (0, 3, 1, 2)), None     # NCHW seg logits, road=None


# --------------------------------------------------------------------------
# One-time parameter folding (hoisted out of the jitted forward)
# --------------------------------------------------------------------------
def _bn_fold(bn):
    scale = bn["gamma"] / jnp.sqrt(bn["var"] + EPS)
    shift = bn["beta"] - bn["mean"] * scale
    return scale, shift


def _fold_conv(cp, kh, kw, scale=None, shift=None):
    w, b = cp["w"], cp["b"]                          # (Cout, Cin, kh, kw)
    cout, cin = w.shape[0], w.shape[1]
    w2d = jnp.transpose(w, (2, 3, 1, 0)).reshape(kh * kw * cin, cout)
    if scale is not None:
        w2d = w2d * scale[None, :]
        b = b * scale + shift
    return w2d.astype(jnp.bfloat16), b.reshape(1, cout).astype(jnp.float32)


def _prep_down(p):
    scale, shift = _bn_fold(p["bn"])
    w, b = p["conv"]["w"], p["conv"]["b"]
    cconv, cin = w.shape[0], w.shape[1]
    cout = cconv + cin
    w2d = jnp.transpose(w, (2, 3, 1, 0)).reshape(9 * cin, cconv)
    w2d = w2d * scale[None, :cconv]
    w2d = jnp.pad(w2d, ((0, 0), (0, cin)))           # zero cols for pool channels
    bias = jnp.concatenate([b * scale[:cconv] + shift[:cconv], shift[cconv:]])
    sel = jnp.zeros((cin, cout), jnp.float32)
    sel = sel.at[jnp.arange(cin), cconv + jnp.arange(cin)].set(scale[cconv:])
    return {"w": w2d.astype(jnp.bfloat16),
            "sel": sel.astype(jnp.bfloat16),
            "bias": bias.reshape(1, cout).astype(jnp.float32)}


def _prep_nb(p):
    s1, t1 = _bn_fold(p["bn1"])
    s2, t2 = _bn_fold(p["bn2"])
    w31_1, b31_1 = _fold_conv(p["c31_1"], 3, 1)
    w13_1, b13_1 = _fold_conv(p["c13_1"], 1, 3, s1, t1)
    w31_2, b31_2 = _fold_conv(p["c31_2"], 3, 1)
    w13_2, b13_2 = _fold_conv(p["c13_2"], 1, 3, s2, t2)
    return {"w31_1": w31_1, "b31_1": b31_1, "w13_1": w13_1, "b13_1": b13_1,
            "w31_2": w31_2, "b31_2": b31_2, "w13_2": w13_2, "b13_2": b13_2}


def _prep_up(p):
    """ConvTranspose2d(3x3, s2, p1, op1) + BN, as sub-pixel weights (4Cin,4Cout)."""
    wt, b = p["conv"]["w"], p["conv"]["b"]           # (Cin, Cout, 3, 3)
    scale, shift = _bn_fold(p["bn"])
    cin, cout = wt.shape[0], wt.shape[1]
    z = jnp.zeros((cin, cout), wt.dtype)
    # tap rows: t0=(m,n) t1=(m,n+1) t2=(m+1,n) t3=(m+1,n+1); phase cols dy-major
    p00 = jnp.concatenate([wt[:, :, 1, 1], z, z, z], axis=0)
    p01 = jnp.concatenate([wt[:, :, 1, 2], wt[:, :, 1, 0], z, z], axis=0)
    p10 = jnp.concatenate([wt[:, :, 2, 1], z, wt[:, :, 0, 1], z], axis=0)
    p11 = jnp.concatenate([wt[:, :, 2, 2], wt[:, :, 2, 0],
                           wt[:, :, 0, 2], wt[:, :, 0, 0]], axis=0)
    w_sub = jnp.concatenate([blk * scale[None, :] for blk in (p00, p01, p10, p11)],
                            axis=1)
    bias = jnp.tile(b * scale + shift, 4)
    return {"w": w_sub.astype(jnp.bfloat16),
            "bias": bias.reshape(1, 4 * cout).astype(jnp.float32)}


def _prep_out(p):
    """ConvTranspose2d(2x2, s2, p0): each output phase uses exactly one tap."""
    wt, b = p["w"], p["b"]                           # (Cin, Cout, 2, 2)
    cin, cout = wt.shape[0], wt.shape[1]
    w_sub = jnp.concatenate([wt[:, :, 0, 0], wt[:, :, 0, 1],
                             wt[:, :, 1, 0], wt[:, :, 1, 1]], axis=1)  # (Cin,4Cout)
    bias = jnp.tile(b, 4)
    return {"w": w_sub.astype(jnp.bfloat16),
            "bias": bias.reshape(1, 4 * cout).astype(jnp.float32)}


def prepare_params(params):
    e, d = params["enc"], params["dec"]
    enc = {"initial": _prep_down(e["initial"]),
           "down1": _prep_down(e["down1"]),
           "nb64": [_prep_nb(p) for p in e["nb64"]],
           "down2": _prep_down(e["down2"]),
           "nb128": [_prep_nb(p) for p in e["nb128"]]}
    dec = {"up1": _prep_up(d["up1"]),
           "nb_a": [_prep_nb(p) for p in d["nb_a"]],
           "up2": _prep_up(d["up2"]),
           "nb_b": [_prep_nb(p) for p in d["nb_b"]],
           "out": _prep_out(d["out"])}
    return {"enc": enc, "dec": dec}


# --------------------------------------------------------------------------
# Deterministic parameter construction (shapes from the module __init__)
# --------------------------------------------------------------------------
def init_params(key):
    keys = iter(jax.random.split(key, 256))

    def conv_p(cout, cin, kh, kw):
        k1, k2 = jax.random.split(next(keys))
        fan_in = cin * kh * kw
        return {"w": jax.random.normal(k1, (cout, cin, kh, kw), jnp.float32)
                     * (2.0 / fan_in) ** 0.5,
                "b": 0.01 * jax.random.normal(k2, (cout,), jnp.float32)}

    def convT_p(cin, cout, kh, kw):
        k1, k2 = jax.random.split(next(keys))
        fan_in = cin * kh * kw
        return {"w": jax.random.normal(k1, (cin, cout, kh, kw), jnp.float32)
                     * (2.0 / fan_in) ** 0.5,
                "b": 0.01 * jax.random.normal(k2, (cout,), jnp.float32)}

    def bn_p(c):
        k1, k2, k3, k4 = jax.random.split(next(keys), 4)
        return {"gamma": 1.0 + 0.05 * jax.random.normal(k1, (c,), jnp.float32),
                "beta": 0.05 * jax.random.normal(k2, (c,), jnp.float32),
                "mean": 0.05 * jax.random.normal(k3, (c,), jnp.float32),
                "var": 1.0 + 0.1 * jax.random.uniform(k4, (c,), jnp.float32)}

    def down_p(cin, cout):
        return {"conv": conv_p(cout - cin, cin, 3, 3), "bn": bn_p(cout)}

    def nb_p(c):
        return {"c31_1": conv_p(c, c, 3, 1), "c13_1": conv_p(c, c, 1, 3),
                "bn1": bn_p(c),
                "c31_2": conv_p(c, c, 3, 1), "c13_2": conv_p(c, c, 1, 3),
                "bn2": bn_p(c)}

    def up_p(cin, cout):
        return {"conv": convT_p(cin, cout, 3, 3), "bn": bn_p(cout)}

    enc = {"initial": down_p(3, 16),
           "down1": down_p(16, 64),
           "nb64": [nb_p(64) for _ in range(5)],
           "down2": down_p(64, 128),
           "nb128": [nb_p(128) for _ in range(8)]}
    dec = {"up1": up_p(128, 64),
           "nb_a": [nb_p(64) for _ in range(2)],
           "up2": up_p(64, 16),
           "nb_b": [nb_p(16) for _ in range(2)],
           "out": convT_p(16, 3, 2, 2)}
    return {"enc": enc, "dec": dec}


if __name__ == "__main__":
    key = jax.random.PRNGKey(0)
    kp, kx = jax.random.split(key)
    params = init_params(kp)
    prep = prepare_params(params)   # BN fold + inference weight layout, run once
    x = jax.random.normal(kx, (2, 3, 32, 32), jnp.float32)  # NCHW, H/W div by 8

    fwd = jax.jit(erfnet_forward)
    seg, road = fwd(prep, x)
    seg = jax.block_until_ready(seg)

    assert seg.shape == (2, 3, 32, 32), seg.shape  # num_classes_pixel=3, full res
    assert road is None                            # multitask=False
    assert bool(jnp.all(jnp.isfinite(seg)))
    print("KERNEL_OK")
</pallas_src>

<mosaic_0001>
module attributes {stable_mosaic.version = 11 : i64} {
  func.func @_down_kernel(%arg0: i32, %arg1: memref<256x27xbf16, #tpu.memory_space<vmem>>, %arg2: memref<27x16xbf16, #tpu.memory_space<vmem>>, %arg3: memref<256x3xbf16, #tpu.memory_space<vmem>>, %arg4: memref<256x3xbf16, #tpu.memory_space<vmem>>, %arg5: memref<256x3xbf16, #tpu.memory_space<vmem>>, %arg6: memref<256x3xbf16, #tpu.memory_space<vmem>>, %arg7: memref<3x16xbf16, #tpu.memory_space<vmem>>, %arg8: memref<1x16xf32, #tpu.memory_space<vmem>>, %arg9: memref<256x16xbf16, #tpu.memory_space<vmem>>) attributes {dimension_semantics = [#tpu.dimension_semantics<parallel>], iteration_bounds = array<i64: 2>, scalar_prefetch = 0 : i64, scratch_operands = 0 : i64, tpu.core_type = #tpu.core_type<tc>, window_params = [{transform_indices = @transform_0, window_bounds = array<i64: 256, 27>}, {pipeline_mode = #tpu.pipeline_mode<synchronous>, transform_indices = @transform_1, window_bounds = array<i64: 27, 16>}, {transform_indices = @transform_2, window_bounds = array<i64: 256, 3>}, {transform_indices = @transform_3, window_bounds = array<i64: 256, 3>}, {transform_indices = @transform_4, window_bounds = array<i64: 256, 3>}, {transform_indices = @transform_5, window_bounds = array<i64: 256, 3>}, {pipeline_mode = #tpu.pipeline_mode<synchronous>, transform_indices = @transform_6, window_bounds = array<i64: 3, 16>}, {pipeline_mode = #tpu.pipeline_mode<synchronous>, transform_indices = @transform_7, window_bounds = array<i64: 1, 16>}, {transform_indices = @transform_8, window_bounds = array<i64: 256, 16>}]} {
    %c0 = arith.constant 0 : index
    %c0_0 = arith.constant 0 : index
    %0 = vector.load %arg1[%c0, %c0_0] : memref<256x27xbf16, #tpu.memory_space<vmem>>, vector<256x27xbf16>
    %c0_1 = arith.constant 0 : index
    %c0_2 = arith.constant 0 : index
    %1 = vector.load %arg2[%c0_1, %c0_2] : memref<27x16xbf16, #tpu.memory_space<vmem>>, vector<27x16xbf16>
    %cst = arith.constant dense<0.000000e+00> : vector<256x16xf32>
    %2 = tpu.matmul %0, %1, %cst {dimension_numbers = #tpu.dot_dimension_numbers<[1], [0], [0], [1], [0, 0, 1, 1], [], []>} : vector<256x27xbf16>, vector<27x16xbf16>, vector<256x16xf32> -> vector<256x16xf32>
    %c0_3 = arith.constant 0 : index
    %c0_4 = arith.constant 0 : index
    %3 = vector.load %arg3[%c0_3, %c0_4] : memref<256x3xbf16, #tpu.memory_space<vmem>>, vector<256x3xbf16>
    %c0_5 = arith.constant 0 : index
    %c0_6 = arith.constant 0 : index
    %4 = vector.load %arg4[%c0_5, %c0_6] : memref<256x3xbf16, #tpu.memory_space<vmem>>, vector<256x3xbf16>
    %5 = arith.maximumf %3, %4 : vector<256x3xbf16>
    %c0_7 = arith.constant 0 : index
    %c0_8 = arith.constant 0 : index
    %6 = vector.load %arg5[%c0_7, %c0_8] : memref<256x3xbf16, #tpu.memory_space<vmem>>, vector<256x3xbf16>
    %c0_9 = arith.constant 0 : index
    %c0_10 = arith.constant 0 : index
    %7 = vector.load %arg6[%c0_9, %c0_10] : memref<256x3xbf16, #tpu.memory_space<vmem>>, vector<256x3xbf16>
    %8 = arith.maximumf %6, %7 : vector<256x3xbf16>
    %9 = arith.maximumf %5, %8 : vector<256x3xbf16>
    %c0_11 = arith.constant 0 : index
    %c0_12 = arith.constant 0 : index
    %10 = vector.load %arg7[%c0_11, %c0_12] : memref<3x16xbf16, #tpu.memory_space<vmem>>, vector<3x16xbf16>
    %cst_13 = arith.constant dense<0.000000e+00> : vector<256x16xf32>
    %11 = tpu.matmul %9, %10, %cst_13 {dimension_numbers = #tpu.dot_dimension_numbers<[1], [0], [0], [1], [0, 0, 1, 1], [], []>} : vector<256x3xbf16>, vector<3x16xbf16>, vector<256x16xf32> -> vector<256x16xf32>
    %12 = arith.addf %2, %11 : vector<256x16xf32>
    %c0_14 = arith.constant 0 : index
    %c0_15 = arith.constant 0 : index
    %13 = vector.load %arg8[%c0_14, %c0_15] : memref<1x16xf32, #tpu.memory_space<vmem>>, vector<1x16xf32>
    %14 = vector.broadcast %13 : vector<1x16xf32> to vector<256x16xf32>
    %15 = arith.addf %12, %14 : vector<256x16xf32>
    %cst_16 = arith.constant 0.000000e+00 : f32
    %16 = vector.broadcast %cst_16 : f32 to vector<256x16xf32>
    %17 = arith.maximumf %15, %16 : vector<256x16xf32>
    %18 = arith.truncf %17 : vector<256x16xf32> to vector<256x16xbf16>
    %c0_17 = arith.constant 0 : index
    %c0_18 = arith.constant 0 : index
    %19 = vector.load %arg9[%c0_17, %c0_18] : memref<256x16xbf16, #tpu.memory_space<vmem>>, vector<256x16xbf16>
    tpu.vector_store %arg9[%c0_17, %c0_18], %18 {strides = array<i32>} : memref<256x16xbf16, #tpu.memory_space<vmem>>, vector<256x16xbf16>,
    return
  }
  func.func @transform_0(%arg0: i32) -> (i32, i32) {
    %c0_i32 = arith.constant 0 : i32
    %c0_i32_0 = arith.constant 0 : i32
    return %arg0, %c0_i32 : i32, i32
  }
  func.func @transform_1(%arg0: i32) -> (i32, i32) {
    %c0_i32 = arith.constant 0 : i32
    %c0_i32_0 = arith.constant 0 : i32
    %c0_i32_1 = arith.constant 0 : i32
    return %c0_i32, %c0_i32_0 : i32, i32
  }
  func.func @transform_2(%arg0: i32) -> (i32, i32) {
    %c0_i32 = arith.constant 0 : i32
    %c0_i32_0 = arith.constant 0 : i32
    return %arg0, %c0_i32 : i32, i32
  }
  func.func @transform_3(%arg0: i32) -> (i32, i32) {
    %c0_i32 = arith.constant 0 : i32
    %c0_i32_0 = arith.constant 0 : i32
    return %arg0, %c0_i32 : i32, i32
  }
  func.func @transform_4(%arg0: i32) -> (i32, i32) {
    %c0_i32 = arith.constant 0 : i32
    %c0_i32_0 = arith.constant 0 : i32
    return %arg0, %c0_i32 : i32, i32
  }
  func.func @transform_5(%arg0: i32) -> (i32, i32) {
    %c0_i32 = arith.constant 0 : i32
    %c0_i32_0 = arith.constant 0 : i32
    return %arg0, %c0_i32 : i32, i32
  }
  func.func @transform_6(%arg0: i32) -> (i32, i32) {
    %c0_i32 = arith.constant 0 : i32
    %c0_i32_0 = arith.constant 0 : i32
    %c0_i32_1 = arith.constant 0 : i32
    return %c0_i32, %c0_i32_0 : i32, i32
  }
  func.func @transform_7(%arg0: i32) -> (i32, i32) {
    %c0_i32 = arith.constant 0 : i32
    %c0_i32_0 = arith.constant 0 : i32
    %c0_i32_1 = arith.constant 0 : i32
    return %c0_i32, %c0_i32_0 : i32, i32
  }
  func.func @transform_8(%arg0: i32) -> (i32, i32) {
    %c0_i32 = arith.constant 0 : i32
    %c0_i32_0 = arith.constant 0 : i32
    return %arg0, %c0_i32 : i32, i32
  }
}

module attributes {stable_mosaic.version = 11 : i64} {
  func.func @_down_kernel(%arg0: i32, %arg1: memref<64x144xbf16, #tpu.memory_space<vmem>>, %arg2: memref<144x64xbf16, #tpu.memory_space<vmem>>, %arg3: memref<64x16xbf16, #tpu.memory_space<vmem>>, %arg4: memref<64x16xbf16, #tpu.memory_space<vmem>>, %arg5: memref<64x16xbf16, #tpu.memory_space<vmem>>, %arg6: memref<64x16xbf16, #tpu.memory_space<vmem>>, %arg7: memref<16x64xbf16, #tpu.memory_space<vmem>>, %arg8: memref<1x64xf32, #tpu.memory_space<vmem>>, %arg9: memref<64x64xbf16, #tpu.memory_space<vmem>>) attributes {dimension_semantics = [#tpu.dimension_semantics<parallel>], iteration_bounds = array<i64: 2>, scalar_prefetch = 0 : i64, scratch_operands = 0 : i64, tpu.core_type = #tpu.core_type<tc>, window_params = [{transform_indices = @transform_0, window_bounds = array<i64: 64, 144>}, {pipeline_mode = #tpu.pipeline_mode<synchronous>, transform_indices = @transform_1, window_bounds = array<i64: 144, 64>}, {transform_indices = @transform_2, window_bounds = array<i64: 64, 16>}, {transform_indices = @transform_3, window_bounds = array<i64: 64, 16>}, {transform_indices = @transform_4, window_bounds = array<i64: 64, 16>}, {transform_indices = @transform_5, window_bounds = array<i64: 64, 16>}, {pipeline_mode = #tpu.pipeline_mode<synchronous>, transform_indices = @transform_6, window_bounds = array<i64: 16, 64>}, {pipeline_mode = #tpu.pipeline_mode<synchronous>, transform_indices = @transform_7, window_bounds = array<i64: 1, 64>}, {transform_indices = @transform_8, window_bounds = array<i64: 64, 64>}]} {
    %c0 = arith.constant 0 : index
    %c0_0 = arith.constant 0 : index
    %0 = vector.load %arg1[%c0, %c0_0] : memref<64x144xbf16, #tpu.memory_space<vmem>>, vector<64x144xbf16>
    %c0_1 = arith.constant 0 : index
    %c0_2 = arith.constant 0 : index
    %1 = vector.load %arg2[%c0_1, %c0_2] : memref<144x64xbf16, #tpu.memory_space<vmem>>, vector<144x64xbf16>
    %cst = arith.constant dense<0.000000e+00> : vector<64x64xf32>
    %2 = tpu.matmul %0, %1, %cst {dimension_numbers = #tpu.dot_dimension_numbers<[1], [0], [0], [1], [0, 0, 1, 1], [], []>} : vector<64x144xbf16>, vector<144x64xbf16>, vector<64x64xf32> -> vector<64x64xf32>
    %c0_3 = arith.constant 0 : index
    %c0_4 = arith.constant 0 : index
    %3 = vector.load %arg3[%c0_3, %c0_4] : memref<64x16xbf16, #tpu.memory_space<vmem>>, vector<64x16xbf16>
    %c0_5 = arith.constant 0 : index
    %c0_6 = arith.constant 0 : index
    %4 = vector.load %arg4[%c0_5, %c0_6] : memref<64x16xbf16, #tpu.memory_space<vmem>>, vector<64x16xbf16>
    %5 = arith.maximumf %3, %4 : vector<64x16xbf16>
    %c0_7 = arith.constant 0 : index
    %c0_8 = arith.constant 0 : index
    %6 = vector.load %arg5[%c0_7, %c0_8] : memref<64x16xbf16, #tpu.memory_space<vmem>>, vector<64x16xbf16>
    %c0_9 = arith.constant 0 : index
    %c0_10 = arith.constant 0 : index
    %7 = vector.load %arg6[%c0_9, %c0_10] : memref<64x16xbf16, #tpu.memory_space<vmem>>, vector<64x16xbf16>
    %8 = arith.maximumf %6, %7 : vector<64x16xbf16>
    %9 = arith.maximumf %5, %8 : vector<64x16xbf16>
    %c0_11 = arith.constant 0 : index
    %c0_12 = arith.constant 0 : index
    %10 = vector.load %arg7[%c0_11, %c0_12] : memref<16x64xbf16, #tpu.memory_space<vmem>>, vector<16x64xbf16>
    %cst_13 = arith.constant dense<0.000000e+00> : vector<64x64xf32>
    %11 = tpu.matmul %9, %10, %cst_13 {dimension_numbers = #tpu.dot_dimension_numbers<[1], [0], [0], [1], [0, 0, 1, 1], [], []>} : vector<64x16xbf16>, vector<16x64xbf16>, vector<64x64xf32> -> vector<64x64xf32>
    %12 = arith.addf %2, %11 : vector<64x64xf32>
    %c0_14 = arith.constant 0 : index
    %c0_15 = arith.constant 0 : index
    %13 = vector.load %arg8[%c0_14, %c0_15] : memref<1x64xf32, #tpu.memory_space<vmem>>, vector<1x64xf32>
    %14 = vector.broadcast %13 : vector<1x64xf32> to vector<64x64xf32>
    %15 = arith.addf %12, %14 : vector<64x64xf32>
    %cst_16 = arith.constant 0.000000e+00 : f32
    %16 = vector.broadcast %cst_16 : f32 to vector<64x64xf32>
    %17 = arith.maximumf %15, %16 : vector<64x64xf32>
    %18 = arith.truncf %17 : vector<64x64xf32> to vector<64x64xbf16>
    %c0_17 = arith.constant 0 : index
    %c0_18 = arith.constant 0 : index
    %19 = vector.load %arg9[%c0_17, %c0_18] : memref<64x64xbf16, #tpu.memory_space<vmem>>, vector<64x64xbf16>
    tpu.vector_store %arg9[%c0_17, %c0_18], %18 {strides = array<i32>} : memref<64x64xbf16, #tpu.memory_space<vmem>>, vector<64x64xbf16>,
    return
  }
  func.func @transform_0(%arg0: i32) -> (i32, i32) {
    %c0_i32 = arith.constant 0 : i32
    %c0_i32_0 = arith.constant 0 : i32
    return %arg0, %c0_i32 : i32, i32
  }
  func.func @transform_1(%arg0: i32) -> (i32, i32) {
    %c0_i32 = arith.constant 0 : i32
    %c0_i32_0 = arith.constant 0 : i32
    %c0_i32_1 = arith.constant 0 : i32
    return %c0_i32, %c0_i32_0 : i32, i32
  }
  func.func @transform_2(%arg0: i32) -> (i32, i32) {
    %c0_i32 = arith.constant 0 : i32
    %c0_i32_0 = arith.constant 0 : i32
    return %arg0, %c0_i32 : i32, i32
  }
  func.func @transform_3(%arg0: i32) -> (i32, i32) {
    %c0_i32 = arith.constant 0 : i32
    %c0_i32_0 = arith.constant 0 : i32
    return %arg0, %c0_i32 : i32, i32
  }
  func.func @transform_4(%arg0: i32) -> (i32, i32) {
    %c0_i32 = arith.constant 0 : i32
    %c0_i32_0 = arith.constant 0 : i32
    return %arg0, %c0_i32 : i32, i32
  }
  func.func @transform_5(%arg0: i32) -> (i32, i32) {
    %c0_i32 = arith.constant 0 : i32
    %c0_i32_0 = arith.constant 0 : i32
    return %arg0, %c0_i32 : i32, i32
  }
  func.func @transform_6(%arg0: i32) -> (i32, i32) {
    %c0_i32 = arith.constant 0 : i32
    %c0_i32_0 = arith.constant 0 : i32
    %c0_i32_1 = arith.constant 0 : i32
    return %c0_i32, %c0_i32_0 : i32, i32
  }
  func.func @transform_7(%arg0: i32) -> (i32, i32) {
    %c0_i32 = arith.constant 0 : i32
    %c0_i32_0 = arith.constant 0 : i32
    %c0_i32_1 = arith.constant 0 : i32
    return %c0_i32, %c0_i32_0 : i32, i32
  }
  func.func @transform_8(%arg0: i32) -> (i32, i32) {
    %c0_i32 = arith.constant 0 : i32
    %c0_i32_0 = arith.constant 0 : i32
    return %arg0, %c0_i32 : i32, i32
  }
}

module attributes {stable_mosaic.version = 11 : i64} {
  func.func @_mm_kernel(%arg0: i32, %arg1: memref<64x192xbf16, #tpu.memory_space<vmem>>, %arg2: memref<192x64xbf16, #tpu.memory_space<vmem>>, %arg3: memref<1x64xf32, #tpu.memory_space<vmem>>, %arg4: memref<64x64xbf16, #tpu.memory_space<vmem>>) attributes {dimension_semantics = [#tpu.dimension_semantics<parallel>], iteration_bounds = array<i64: 2>, scalar_prefetch = 0 : i64, scratch_operands = 0 : i64, tpu.core_type = #tpu.core_type<tc>, window_params = [{transform_indices = @transform_0, window_bounds = array<i64: 64, 192>}, {pipeline_mode = #tpu.pipeline_mode<synchronous>, transform_indices = @transform_1, window_bounds = array<i64: 192, 64>}, {pipeline_mode = #tpu.pipeline_mode<synchronous>, transform_indices = @transform_2, window_bounds = array<i64: 1, 64>}, {transform_indices = @transform_3, window_bounds = array<i64: 64, 64>}]} {
    %c0 = arith.constant 0 : index
    %c0_0 = arith.constant 0 : index
    %0 = vector.load %arg1[%c0, %c0_0] : memref<64x192xbf16, #tpu.memory_space<vmem>>, vector<64x192xbf16>
    %c0_1 = arith.constant 0 : index
    %c0_2 = arith.constant 0 : index
    %1 = vector.load %arg2[%c0_1, %c0_2] : memref<192x64xbf16, #tpu.memory_space<vmem>>, vector<192x64xbf16>
    %cst = arith.constant dense<0.000000e+00> : vector<64x64xf32>
    %2 = tpu.matmul %0, %1, %cst {dimension_numbers = #tpu.dot_dimension_numbers<[1], [0], [0], [1], [0, 0, 1, 1], [], []>} : vector<64x192xbf16>, vector<192x64xbf16>, vector<64x64xf32> -> vector<64x64xf32>
    %c0_3 = arith.constant 0 : index
    %c0_4 = arith.constant 0 : index
    %3 = vector.load %arg3[%c0_3, %c0_4] : memref<1x64xf32, #tpu.memory_space<vmem>>, vector<1x64xf32>
    %4 = vector.broadcast %3 : vector<1x64xf32> to vector<64x64xf32>
    %5 = arith.addf %2, %4 : vector<64x64xf32>
    %cst_5 = arith.constant 0.000000e+00 : f32
    %6 = vector.broadcast %cst_5 : f32 to vector<64x64xf32>
    %7 = arith.maximumf %5, %6 : vector<64x64xf32>
    %8 = arith.truncf %7 : vector<64x64xf32> to vector<64x64xbf16>
    %c0_6 = arith.constant 0 : index
    %c0_7 = arith.constant 0 : index
    %9 = vector.load %arg4[%c0_6, %c0_7] : memref<64x64xbf16, #tpu.memory_space<vmem>>, vector<64x64xbf16>
    tpu.vector_store %arg4[%c0_6, %c0_7], %8 {strides = array<i32>} : memref<64x64xbf16, #tpu.memory_space<vmem>>, vector<64x64xbf16>,
    return
  }
  func.func @transform_0(%arg0: i32) -> (i32, i32) {
    %c0_i32 = arith.constant 0 : i32
    %c0_i32_0 = arith.constant 0 : i32
    return %arg0, %c0_i32 : i32, i32
  }
  func.func @transform_1(%arg0: i32) -> (i32, i32) {
    %c0_i32 = arith.constant 0 : i32
    %c0_i32_0 = arith.constant 0 : i32
    %c0_i32_1 = arith.constant 0 : i32
    return %c0_i32, %c0_i32_0 : i32, i32
  }
  func.func @transform_2(%arg0: i32) -> (i32, i32) {
    %c0_i32 = arith.constant 0 : i32
    %c0_i32_0 = arith.constant 0 : i32
    %c0_i32_1 = arith.constant 0 : i32
    return %c0_i32, %c0_i32_0 : i32, i32
  }
  func.func @transform_3(%arg0: i32) -> (i32, i32) {
    %c0_i32 = arith.constant 0 : i32
    %c0_i32_0 = arith.constant 0 : i32
    return %arg0, %c0_i32 : i32, i32
  }
}

module attributes {stable_mosaic.version = 11 : i64} {
  func.func @_mm_res_kernel(%arg0: i32, %arg1: memref<64x192xbf16, #tpu.memory_space<vmem>>, %arg2: memref<192x64xbf16, #tpu.memory_space<vmem>>, %arg3: memref<1x64xf32, #tpu.memory_space<vmem>>, %arg4: memref<64x64xbf16, #tpu.memory_space<vmem>>, %arg5: memref<64x64xbf16, #tpu.memory_space<vmem>>) attributes {dimension_semantics = [#tpu.dimension_semantics<parallel>], iteration_bounds = array<i64: 2>, scalar_prefetch = 0 : i64, scratch_operands = 0 : i64, tpu.core_type = #tpu.core_type<tc>, window_params = [{transform_indices = @transform_0, window_bounds = array<i64: 64, 192>}, {pipeline_mode = #tpu.pipeline_mode<synchronous>, transform_indices = @transform_1, window_bounds = array<i64: 192, 64>}, {pipeline_mode = #tpu.pipeline_mode<synchronous>, transform_indices = @transform_2, window_bounds = array<i64: 1, 64>}, {transform_indices = @transform_3, window_bounds = array<i64: 64, 64>}, {transform_indices = @transform_4, window_bounds = array<i64: 64, 64>}]} {
    %c0 = arith.constant 0 : index
    %c0_0 = arith.constant 0 : index
    %0 = vector.load %arg1[%c0, %c0_0] : memref<64x192xbf16, #tpu.memory_space<vmem>>, vector<64x192xbf16>
    %c0_1 = arith.constant 0 : index
    %c0_2 = arith.constant 0 : index
    %1 = vector.load %arg2[%c0_1, %c0_2] : memref<192x64xbf16, #tpu.memory_space<vmem>>, vector<192x64xbf16>
    %cst = arith.constant dense<0.000000e+00> : vector<64x64xf32>
    %2 = tpu.matmul %0, %1, %cst {dimension_numbers = #tpu.dot_dimension_numbers<[1], [0], [0], [1], [0, 0, 1, 1], [], []>} : vector<64x192xbf16>, vector<192x64xbf16>, vector<64x64xf32> -> vector<64x64xf32>
    %c0_3 = arith.constant 0 : index
    %c0_4 = arith.constant 0 : index
    %3 = vector.load %arg3[%c0_3, %c0_4] : memref<1x64xf32, #tpu.memory_space<vmem>>, vector<1x64xf32>
    %4 = vector.broadcast %3 : vector<1x64xf32> to vector<64x64xf32>
    %5 = arith.addf %2, %4 : vector<64x64xf32>
    %c0_5 = arith.constant 0 : index
    %c0_6 = arith.constant 0 : index
    %6 = vector.load %arg4[%c0_5, %c0_6] : memref<64x64xbf16, #tpu.memory_space<vmem>>, vector<64x64xbf16>
    %7 = arith.extf %6 : vector<64x64xbf16> to vector<64x64xf32>
    %8 = arith.addf %5, %7 : vector<64x64xf32>
    %cst_7 = arith.constant 0.000000e+00 : f32
    %9 = vector.broadcast %cst_7 : f32 to vector<64x64xf32>
    %10 = arith.maximumf %8, %9 : vector<64x64xf32>
    %11 = arith.truncf %10 : vector<64x64xf32> to vector<64x64xbf16>
    %c0_8 = arith.constant 0 : index
    %c0_9 = arith.constant 0 : index
    %12 = vector.load %arg5[%c0_8, %c0_9] : memref<64x64xbf16, #tpu.memory_space<vmem>>, vector<64x64xbf16>
    tpu.vector_store %arg5[%c0_8, %c0_9], %11 {strides = array<i32>} : memref<64x64xbf16, #tpu.memory_space<vmem>>, vector<64x64xbf16>,
    return
  }
  func.func @transform_0(%arg0: i32) -> (i32, i32) {
    %c0_i32 = arith.constant 0 : i32
    %c0_i32_0 = arith.constant 0 : i32
    return %arg0, %c0_i32 : i32, i32
  }
  func.func @transform_1(%arg0: i32) -> (i32, i32) {
    %c0_i32 = arith.constant 0 : i32
    %c0_i32_0 = arith.constant 0 : i32
    %c0_i32_1 = arith.constant 0 : i32
    return %c0_i32, %c0_i32_0 : i32, i32
  }
  func.func @transform_2(%arg0: i32) -> (i32, i32) {
    %c0_i32 = arith.constant 0 : i32
    %c0_i32_0 = arith.constant 0 : i32
    %c0_i32_1 = arith.constant 0 : i32
    return %c0_i32, %c0_i32_0 : i32, i32
  }
  func.func @transform_3(%arg0: i32) -> (i32, i32) {
    %c0_i32 = arith.constant 0 : i32
    %c0_i32_0 = arith.constant 0 : i32
    return %arg0, %c0_i32 : i32, i32
  }
  func.func @transform_4(%arg0: i32) -> (i32, i32) {
    %c0_i32 = arith.constant 0 : i32
    %c0_i32_0 = arith.constant 0 : i32
    return %arg0, %c0_i32 : i32, i32
  }
}

module attributes {stable_mosaic.version = 11 : i64} {
  func.func @_down_kernel(%arg0: i32, %arg1: memref<16x576xbf16, #tpu.memory_space<vmem>>, %arg2: memref<576x128xbf16, #tpu.memory_space<vmem>>, %arg3: memref<16x64xbf16, #tpu.memory_space<vmem>>, %arg4: memref<16x64xbf16, #tpu.memory_space<vmem>>, %arg5: memref<16x64xbf16, #tpu.memory_space<vmem>>, %arg6: memref<16x64xbf16, #tpu.memory_space<vmem>>, %arg7: memref<64x128xbf16, #tpu.memory_space<vmem>>, %arg8: memref<1x128xf32, #tpu.memory_space<vmem>>, %arg9: memref<16x128xbf16, #tpu.memory_space<vmem>>) attributes {dimension_semantics = [#tpu.dimension_semantics<parallel>], iteration_bounds = array<i64: 2>, scalar_prefetch = 0 : i64, scratch_operands = 0 : i64, tpu.core_type = #tpu.core_type<tc>, window_params = [{transform_indices = @transform_0, window_bounds = array<i64: 16, 576>}, {pipeline_mode = #tpu.pipeline_mode<synchronous>, transform_indices = @transform_1, window_bounds = array<i64: 576, 128>}, {transform_indices = @transform_2, window_bounds = array<i64: 16, 64>}, {transform_indices = @transform_3, window_bounds = array<i64: 16, 64>}, {transform_indices = @transform_4, window_bounds = array<i64: 16, 64>}, {transform_indices = @transform_5, window_bounds = array<i64: 16, 64>}, {pipeline_mode = #tpu.pipeline_mode<synchronous>, transform_indices = @transform_6, window_bounds = array<i64: 64, 128>}, {pipeline_mode = #tpu.pipeline_mode<synchronous>, transform_indices = @transform_7, window_bounds = array<i64: 1, 128>}, {transform_indices = @transform_8, window_bounds = array<i64: 16, 128>}]} {
    %c0 = arith.constant 0 : index
    %c0_0 = arith.constant 0 : index
    %0 = vector.load %arg1[%c0, %c0_0] : memref<16x576xbf16, #tpu.memory_space<vmem>>, vector<16x576xbf16>
    %c0_1 = arith.constant 0 : index
    %c0_2 = arith.constant 0 : index
    %1 = vector.load %arg2[%c0_1, %c0_2] : memref<576x128xbf16, #tpu.memory_space<vmem>>, vector<576x128xbf16>
    %cst = arith.constant dense<0.000000e+00> : vector<16x128xf32>
    %2 = tpu.matmul %0, %1, %cst {dimension_numbers = #tpu.dot_dimension_numbers<[1], [0], [0], [1], [0, 0, 1, 1], [], []>} : vector<16x576xbf16>, vector<576x128xbf16>, vector<16x128xf32> -> vector<16x128xf32>
    %c0_3 = arith.constant 0 : index
    %c0_4 = arith.constant 0 : index
    %3 = vector.load %arg3[%c0_3, %c0_4] : memref<16x64xbf16, #tpu.memory_space<vmem>>, vector<16x64xbf16>
    %c0_5 = arith.constant 0 : index
    %c0_6 = arith.constant 0 : index
    %4 = vector.load %arg4[%c0_5, %c0_6] : memref<16x64xbf16, #tpu.memory_space<vmem>>, vector<16x64xbf16>
    %5 = arith.maximumf %3, %4 : vector<16x64xbf16>
    %c0_7 = arith.constant 0 : index
    %c0_8 = arith.constant 0 : index
    %6 = vector.load %arg5[%c0_7, %c0_8] : memref<16x64xbf16, #tpu.memory_space<vmem>>, vector<16x64xbf16>
    %c0_9 = arith.constant 0 : index
    %c0_10 = arith.constant 0 : index
    %7 = vector.load %arg6[%c0_9, %c0_10] : memref<16x64xbf16, #tpu.memory_space<vmem>>, vector<16x64xbf16>
    %8 = arith.maximumf %6, %7 : vector<16x64xbf16>
    %9 = arith.maximumf %5, %8 : vector<16x64xbf16>
    %c0_11 = arith.constant 0 : index
    %c0_12 = arith.constant 0 : index
    %10 = vector.load %arg7[%c0_11, %c0_12] : memref<64x128xbf16, #tpu.memory_space<vmem>>, vector<64x128xbf16>
    %cst_13 = arith.constant dense<0.000000e+00> : vector<16x128xf32>
    %11 = tpu.matmul %9, %10, %cst_13 {dimension_numbers = #tpu.dot_dimension_numbers<[1], [0], [0], [1], [0, 0, 1, 1], [], []>} : vector<16x64xbf16>, vector<64x128xbf16>, vector<16x128xf32> -> vector<16x128xf32>
    %12 = arith.addf %2, %11 : vector<16x128xf32>
    %c0_14 = arith.constant 0 : index
    %c0_15 = arith.constant 0 : index
    %13 = vector.load %arg8[%c0_14, %c0_15] : memref<1x128xf32, #tpu.memory_space<vmem>>, vector<1x128xf32>
    %14 = vector.broadcast %13 : vector<1x128xf32> to vector<16x128xf32>
    %15 = arith.addf %12, %14 : vector<16x128xf32>
    %cst_16 = arith.constant 0.000000e+00 : f32
    %16 = vector.broadcast %cst_16 : f32 to vector<16x128xf32>
    %17 = arith.maximumf %15, %16 : vector<16x128xf32>
    %18 = arith.truncf %17 : vector<16x128xf32> to vector<16x128xbf16>
    %c0_17 = arith.constant 0 : index
    %c0_18 = arith.constant 0 : index
    %19 = vector.load %arg9[%c0_17, %c0_18] : memref<16x128xbf16, #tpu.memory_space<vmem>>, vector<16x128xbf16>
    tpu.vector_store %arg9[%c0_17, %c0_18], %18 {strides = array<i32>} : memref<16x128xbf16, #tpu.memory_space<vmem>>, vector<16x128xbf16>,
    return
  }
  func.func @transform_0(%arg0: i32) -> (i32, i32) {
    %c0_i32 = arith.constant 0 : i32
    %c0_i32_0 = arith.constant 0 : i32
    return %arg0, %c0_i32 : i32, i32
  }
  func.func @transform_1(%arg0: i32) -> (i32, i32) {
    %c0_i32 = arith.constant 0 : i32
    %c0_i32_0 = arith.constant 0 : i32
    %c0_i32_1 = arith.constant 0 : i32
    return %c0_i32, %c0_i32_0 : i32, i32
  }
  func.func @transform_2(%arg0: i32) -> (i32, i32) {
    %c0_i32 = arith.constant 0 : i32
    %c0_i32_0 = arith.constant 0 : i32
    return %arg0, %c0_i32 : i32, i32
  }
  func.func @transform_3(%arg0: i32) -> (i32, i32) {
    %c0_i32 = arith.constant 0 : i32
    %c0_i32_0 = arith.constant 0 : i32
    return %arg0, %c0_i32 : i32, i32
  }
  func.func @transform_4(%arg0: i32) -> (i32, i32) {
    %c0_i32 = arith.constant 0 : i32
    %c0_i32_0 = arith.constant 0 : i32
    return %arg0, %c0_i32 : i32, i32
  }
  func.func @transform_5(%arg0: i32) -> (i32, i32) {
    %c0_i32 = arith.constant 0 : i32
    %c0_i32_0 = arith.constant 0 : i32
    return %arg0, %c0_i32 : i32, i32
  }
  func.func @transform_6(%arg0: i32) -> (i32, i32) {
    %c0_i32 = arith.constant 0 : i32
    %c0_i32_0 = arith.constant 0 : i32
    %c0_i32_1 = arith.constant 0 : i32
    return %c0_i32, %c0_i32_0 : i32, i32
  }
  func.func @transform_7(%arg0: i32) -> (i32, i32) {
    %c0_i32 = arith.constant 0 : i32
    %c0_i32_0 = arith.constant 0 : i32
    %c0_i32_1 = arith.constant 0 : i32
    return %c0_i32, %c0_i32_0 : i32, i32
  }
  func.func @transform_8(%arg0: i32) -> (i32, i32) {
    %c0_i32 = arith.constant 0 : i32
    %c0_i32_0 = arith.constant 0 : i32
    return %arg0, %c0_i32 : i32, i32
  }
}

module attributes {stable_mosaic.version = 11 : i64} {
  func.func @_mm_kernel(%arg0: i32, %arg1: memref<16x384xbf16, #tpu.memory_space<vmem>>, %arg2: memref<384x128xbf16, #tpu.memory_space<vmem>>, %arg3: memref<1x128xf32, #tpu.memory_space<vmem>>, %arg4: memref<16x128xbf16, #tpu.memory_space<vmem>>) attributes {dimension_semantics = [#tpu.dimension_semantics<parallel>], iteration_bounds = array<i64: 2>, scalar_prefetch = 0 : i64, scratch_operands = 0 : i64, tpu.core_type = #tpu.core_type<tc>, window_params = [{transform_indices = @transform_0, window_bounds = array<i64: 16, 384>}, {pipeline_mode = #tpu.pipeline_mode<synchronous>, transform_indices = @transform_1, window_bounds = array<i64: 384, 128>}, {pipeline_mode = #tpu.pipeline_mode<synchronous>, transform_indices = @transform_2, window_bounds = array<i64: 1, 128>}, {transform_indices = @transform_3, window_bounds = array<i64: 16, 128>}]} {
    %c0 = arith.constant 0 : index
    %c0_0 = arith.constant 0 : index
    %0 = vector.load %arg1[%c0, %c0_0] : memref<16x384xbf16, #tpu.memory_space<vmem>>, vector<16x384xbf16>
    %c0_1 = arith.constant 0 : index
    %c0_2 = arith.constant 0 : index
    %1 = vector.load %arg2[%c0_1, %c0_2] : memref<384x128xbf16, #tpu.memory_space<vmem>>, vector<384x128xbf16>
    %cst = arith.constant dense<0.000000e+00> : vector<16x128xf32>
    %2 = tpu.matmul %0, %1, %cst {dimension_numbers = #tpu.dot_dimension_numbers<[1], [0], [0], [1], [0, 0, 1, 1], [], []>} : vector<16x384xbf16>, vector<384x128xbf16>, vector<16x128xf32> -> vector<16x128xf32>
    %c0_3 = arith.constant 0 : index
    %c0_4 = arith.constant 0 : index
    %3 = vector.load %arg3[%c0_3, %c0_4] : memref<1x128xf32, #tpu.memory_space<vmem>>, vector<1x128xf32>
    %4 = vector.broadcast %3 : vector<1x128xf32> to vector<16x128xf32>
    %5 = arith.addf %2, %4 : vector<16x128xf32>
    %cst_5 = arith.constant 0.000000e+00 : f32
    %6 = vector.broadcast %cst_5 : f32 to vector<16x128xf32>
    %7 = arith.maximumf %5, %6 : vector<16x128xf32>
    %8 = arith.truncf %7 : vector<16x128xf32> to vector<16x128xbf16>
    %c0_6 = arith.constant 0 : index
    %c0_7 = arith.constant 0 : index
    %9 = vector.load %arg4[%c0_6, %c0_7] : memref<16x128xbf16, #tpu.memory_space<vmem>>, vector<16x128xbf16>
    tpu.vector_store %arg4[%c0_6, %c0_7], %8 {strides = array<i32>} : memref<16x128xbf16, #tpu.memory_space<vmem>>, vector<16x128xbf16>,
    return
  }
  func.func @transform_0(%arg0: i32) -> (i32, i32) {
    %c0_i32 = arith.constant 0 : i32
    %c0_i32_0 = arith.constant 0 : i32
    return %arg0, %c0_i32 : i32, i32
  }
  func.func @transform_1(%arg0: i32) -> (i32, i32) {
    %c0_i32 = arith.constant 0 : i32
    %c0_i32_0 = arith.constant 0 : i32
    %c0_i32_1 = arith.constant 0 : i32
    return %c0_i32, %c0_i32_0 : i32, i32
  }
  func.func @transform_2(%arg0: i32) -> (i32, i32) {
    %c0_i32 = arith.constant 0 : i32
    %c0_i32_0 = arith.constant 0 : i32
    %c0_i32_1 = arith.constant 0 : i32
    return %c0_i32, %c0_i32_0 : i32, i32
  }
  func.func @transform_3(%arg0: i32) -> (i32, i32) {
    %c0_i32 = arith.constant 0 : i32
    %c0_i32_0 = arith.constant 0 : i32
    return %arg0, %c0_i32 : i32, i32
  }
}

module attributes {stable_mosaic.version = 11 : i64} {
  func.func @_mm_res_kernel(%arg0: i32, %arg1: memref<16x384xbf16, #tpu.memory_space<vmem>>, %arg2: memref<384x128xbf16, #tpu.memory_space<vmem>>, %arg3: memref<1x128xf32, #tpu.memory_space<vmem>>, %arg4: memref<16x128xbf16, #tpu.memory_space<vmem>>, %arg5: memref<16x128xbf16, #tpu.memory_space<vmem>>) attributes {dimension_semantics = [#tpu.dimension_semantics<parallel>], iteration_bounds = array<i64: 2>, scalar_prefetch = 0 : i64, scratch_operands = 0 : i64, tpu.core_type = #tpu.core_type<tc>, window_params = [{transform_indices = @transform_0, window_bounds = array<i64: 16, 384>}, {pipeline_mode = #tpu.pipeline_mode<synchronous>, transform_indices = @transform_1, window_bounds = array<i64: 384, 128>}, {pipeline_mode = #tpu.pipeline_mode<synchronous>, transform_indices = @transform_2, window_bounds = array<i64: 1, 128>}, {transform_indices = @transform_3, window_bounds = array<i64: 16, 128>}, {transform_indices = @transform_4, window_bounds = array<i64: 16, 128>}]} {
    %c0 = arith.constant 0 : index
    %c0_0 = arith.constant 0 : index
    %0 = vector.load %arg1[%c0, %c0_0] : memref<16x384xbf16, #tpu.memory_space<vmem>>, vector<16x384xbf16>
    %c0_1 = arith.constant 0 : index
    %c0_2 = arith.constant 0 : index
    %1 = vector.load %arg2[%c0_1, %c0_2] : memref<384x128xbf16, #tpu.memory_space<vmem>>, vector<384x128xbf16>
    %cst = arith.constant dense<0.000000e+00> : vector<16x128xf32>
    %2 = tpu.matmul %0, %1, %cst {dimension_numbers = #tpu.dot_dimension_numbers<[1], [0], [0], [1], [0, 0, 1, 1], [], []>} : vector<16x384xbf16>, vector<384x128xbf16>, vector<16x128xf32> -> vector<16x128xf32>
    %c0_3 = arith.constant 0 : index
    %c0_4 = arith.constant 0 : index
    %3 = vector.load %arg3[%c0_3, %c0_4] : memref<1x128xf32, #tpu.memory_space<vmem>>, vector<1x128xf32>
    %4 = vector.broadcast %3 : vector<1x128xf32> to vector<16x128xf32>
    %5 = arith.addf %2, %4 : vector<16x128xf32>
    %c0_5 = arith.constant 0 : index
    %c0_6 = arith.constant 0 : index
    %6 = vector.load %arg4[%c0_5, %c0_6] : memref<16x128xbf16, #tpu.memory_space<vmem>>, vector<16x128xbf16>
    %7 = arith.extf %6 : vector<16x128xbf16> to vector<16x128xf32>
    %8 = arith.addf %5, %7 : vector<16x128xf32>
    %cst_7 = arith.constant 0.000000e+00 : f32
    %9 = vector.broadcast %cst_7 : f32 to vector<16x128xf32>
    %10 = arith.maximumf %8, %9 : vector<16x128xf32>
    %11 = arith.truncf %10 : vector<16x128xf32> to vector<16x128xbf16>
    %c0_8 = arith.constant 0 : index
    %c0_9 = arith.constant 0 : index
    %12 = vector.load %arg5[%c0_8, %c0_9] : memref<16x128xbf16, #tpu.memory_space<vmem>>, vector<16x128xbf16>
    tpu.vector_store %arg5[%c0_8, %c0_9], %11 {strides = array<i32>} : memref<16x128xbf16, #tpu.memory_space<vmem>>, vector<16x128xbf16>,
    return
  }
  func.func @transform_0(%arg0: i32) -> (i32, i32) {
    %c0_i32 = arith.constant 0 : i32
    %c0_i32_0 = arith.constant 0 : i32
    return %arg0, %c0_i32 : i32, i32
  }
  func.func @transform_1(%arg0: i32) -> (i32, i32) {
    %c0_i32 = arith.constant 0 : i32
    %c0_i32_0 = arith.constant 0 : i32
    %c0_i32_1 = arith.constant 0 : i32
    return %c0_i32, %c0_i32_0 : i32, i32
  }
  func.func @transform_2(%arg0: i32) -> (i32, i32) {
    %c0_i32 = arith.constant 0 : i32
    %c0_i32_0 = arith.constant 0 : i32
    %c0_i32_1 = arith.constant 0 : i32
    return %c0_i32, %c0_i32_0 : i32, i32
  }
  func.func @transform_3(%arg0: i32) -> (i32, i32) {
    %c0_i32 = arith.constant 0 : i32
    %c0_i32_0 = arith.constant 0 : i32
    return %arg0, %c0_i32 : i32, i32
  }
  func.func @transform_4(%arg0: i32) -> (i32, i32) {
    %c0_i32 = arith.constant 0 : i32
    %c0_i32_0 = arith.constant 0 : i32
    return %arg0, %c0_i32 : i32, i32
  }
}

module attributes {stable_mosaic.version = 11 : i64} {
  func.func @_mm_kernel(%arg0: i32, %arg1: memref<16x512xbf16, #tpu.memory_space<vmem>>, %arg2: memref<512x256xbf16, #tpu.memory_space<vmem>>, %arg3: memref<1x256xf32, #tpu.memory_space<vmem>>, %arg4: memref<16x256xbf16, #tpu.memory_space<vmem>>) attributes {dimension_semantics = [#tpu.dimension_semantics<parallel>], iteration_bounds = array<i64: 2>, scalar_prefetch = 0 : i64, scratch_operands = 0 : i64, tpu.core_type = #tpu.core_type<tc>, window_params = [{transform_indices = @transform_0, window_bounds = array<i64: 16, 512>}, {pipeline_mode = #tpu.pipeline_mode<synchronous>, transform_indices = @transform_1, window_bounds = array<i64: 512, 256>}, {pipeline_mode = #tpu.pipeline_mode<synchronous>, transform_indices = @transform_2, window_bounds = array<i64: 1, 256>}, {transform_indices = @transform_3, window_bounds = array<i64: 16, 256>}]} {
    %c0 = arith.constant 0 : index
    %c0_0 = arith.constant 0 : index
    %0 = vector.load %arg1[%c0, %c0_0] : memref<16x512xbf16, #tpu.memory_space<vmem>>, vector<16x512xbf16>
    %c0_1 = arith.constant 0 : index
    %c0_2 = arith.constant 0 : index
    %1 = vector.load %arg2[%c0_1, %c0_2] : memref<512x256xbf16, #tpu.memory_space<vmem>>, vector<512x256xbf16>
    %cst = arith.constant dense<0.000000e+00> : vector<16x256xf32>
    %2 = tpu.matmul %0, %1, %cst {dimension_numbers = #tpu.dot_dimension_numbers<[1], [0], [0], [1], [0, 0, 1, 1], [], []>} : vector<16x512xbf16>, vector<512x256xbf16>, vector<16x256xf32> -> vector<16x256xf32>
    %c0_3 = arith.constant 0 : index
    %c0_4 = arith.constant 0 : index
    %3 = vector.load %arg3[%c0_3, %c0_4] : memref<1x256xf32, #tpu.memory_space<vmem>>, vector<1x256xf32>
    %4 = vector.broadcast %3 : vector<1x256xf32> to vector<16x256xf32>
    %5 = arith.addf %2, %4 : vector<16x256xf32>
    %cst_5 = arith.constant 0.000000e+00 : f32
    %6 = vector.broadcast %cst_5 : f32 to vector<16x256xf32>
    %7 = arith.maximumf %5, %6 : vector<16x256xf32>
    %8 = arith.truncf %7 : vector<16x256xf32> to vector<16x256xbf16>
    %c0_6 = arith.constant 0 : index
    %c0_7 = arith.constant 0 : index
    %9 = vector.load %arg4[%c0_6, %c0_7] : memref<16x256xbf16, #tpu.memory_space<vmem>>, vector<16x256xbf16>
    tpu.vector_store %arg4[%c0_6, %c0_7], %8 {strides = array<i32>} : memref<16x256xbf16, #tpu.memory_space<vmem>>, vector<16x256xbf16>,
    return
  }
  func.func @transform_0(%arg0: i32) -> (i32, i32) {
    %c0_i32 = arith.constant 0 : i32
    %c0_i32_0 = arith.constant 0 : i32
    return %arg0, %c0_i32 : i32, i32
  }
  func.func @transform_1(%arg0: i32) -> (i32, i32) {
    %c0_i32 = arith.constant 0 : i32
    %c0_i32_0 = arith.constant 0 : i32
    %c0_i32_1 = arith.constant 0 : i32
    return %c0_i32, %c0_i32_0 : i32, i32
  }
  func.func @transform_2(%arg0: i32) -> (i32, i32) {
    %c0_i32 = arith.constant 0 : i32
    %c0_i32_0 = arith.constant 0 : i32
    %c0_i32_1 = arith.constant 0 : i32
    return %c0_i32, %c0_i32_0 : i32, i32
  }
  func.func @transform_3(%arg0: i32) -> (i32, i32) {
    %c0_i32 = arith.constant 0 : i32
    %c0_i32_0 = arith.constant 0 : i32
    return %arg0, %c0_i32 : i32, i32
  }
}

module attributes {stable_mosaic.version = 11 : i64} {
  func.func @_mm_kernel(%arg0: i32, %arg1: memref<64x256xbf16, #tpu.memory_space<vmem>>, %arg2: memref<256x64xbf16, #tpu.memory_space<vmem>>, %arg3: memref<1x64xf32, #tpu.memory_space<vmem>>, %arg4: memref<64x64xbf16, #tpu.memory_space<vmem>>) attributes {dimension_semantics = [#tpu.dimension_semantics<parallel>], iteration_bounds = array<i64: 2>, scalar_prefetch = 0 : i64, scratch_operands = 0 : i64, tpu.core_type = #tpu.core_type<tc>, window_params = [{transform_indices = @transform_0, window_bounds = array<i64: 64, 256>}, {pipeline_mode = #tpu.pipeline_mode<synchronous>, transform_indices = @transform_1, window_bounds = array<i64: 256, 64>}, {pipeline_mode = #tpu.pipeline_mode<synchronous>, transform_indices = @transform_2, window_bounds = array<i64: 1, 64>}, {transform_indices = @transform_3, window_bounds = array<i64: 64, 64>}]} {
    %c0 = arith.constant 0 : index
    %c0_0 = arith.constant 0 : index
    %0 = vector.load %arg1[%c0, %c0_0] : memref<64x256xbf16, #tpu.memory_space<vmem>>, vector<64x256xbf16>
    %c0_1 = arith.constant 0 : index
    %c0_2 = arith.constant 0 : index
    %1 = vector.load %arg2[%c0_1, %c0_2] : memref<256x64xbf16, #tpu.memory_space<vmem>>, vector<256x64xbf16>
    %cst = arith.constant dense<0.000000e+00> : vector<64x64xf32>
    %2 = tpu.matmul %0, %1, %cst {dimension_numbers = #tpu.dot_dimension_numbers<[1], [0], [0], [1], [0, 0, 1, 1], [], []>} : vector<64x256xbf16>, vector<256x64xbf16>, vector<64x64xf32> -> vector<64x64xf32>
    %c0_3 = arith.constant 0 : index
    %c0_4 = arith.constant 0 : index
    %3 = vector.load %arg3[%c0_3, %c0_4] : memref<1x64xf32, #tpu.memory_space<vmem>>, vector<1x64xf32>
    %4 = vector.broadcast %3 : vector<1x64xf32> to vector<64x64xf32>
    %5 = arith.addf %2, %4 : vector<64x64xf32>
    %cst_5 = arith.constant 0.000000e+00 : f32
    %6 = vector.broadcast %cst_5 : f32 to vector<64x64xf32>
    %7 = arith.maximumf %5, %6 : vector<64x64xf32>
    %8 = arith.truncf %7 : vector<64x64xf32> to vector<64x64xbf16>
    %c0_6 = arith.constant 0 : index
    %c0_7 = arith.constant 0 : index
    %9 = vector.load %arg4[%c0_6, %c0_7] : memref<64x64xbf16, #tpu.memory_space<vmem>>, vector<64x64xbf16>
    tpu.vector_store %arg4[%c0_6, %c0_7], %8 {strides = array<i32>} : memref<64x64xbf16, #tpu.memory_space<vmem>>, vector<64x64xbf16>,
    return
  }
  func.func @transform_0(%arg0: i32) -> (i32, i32) {
    %c0_i32 = arith.constant 0 : i32
    %c0_i32_0 = arith.constant 0 : i32
    return %arg0, %c0_i32 : i32, i32
  }
  func.func @transform_1(%arg0: i32) -> (i32, i32) {
    %c0_i32 = arith.constant 0 : i32
    %c0_i32_0 = arith.constant 0 : i32
    %c0_i32_1 = arith.constant 0 : i32
    return %c0_i32, %c0_i32_0 : i32, i32
  }
  func.func @transform_2(%arg0: i32) -> (i32, i32) {
    %c0_i32 = arith.constant 0 : i32
    %c0_i32_0 = arith.constant 0 : i32
    %c0_i32_1 = arith.constant 0 : i32
    return %c0_i32, %c0_i32_0 : i32, i32
  }
  func.func @transform_3(%arg0: i32) -> (i32, i32) {
    %c0_i32 = arith.constant 0 : i32
    %c0_i32_0 = arith.constant 0 : i32
    return %arg0, %c0_i32 : i32, i32
  }
}

module attributes {stable_mosaic.version = 11 : i64} {
  func.func @_mm_kernel(%arg0: i32, %arg1: memref<256x48xbf16, #tpu.memory_space<vmem>>, %arg2: memref<48x16xbf16, #tpu.memory_space<vmem>>, %arg3: memref<1x16xf32, #tpu.memory_space<vmem>>, %arg4: memref<256x16xbf16, #tpu.memory_space<vmem>>) attributes {dimension_semantics = [#tpu.dimension_semantics<parallel>], iteration_bounds = array<i64: 2>, scalar_prefetch = 0 : i64, scratch_operands = 0 : i64, tpu.core_type = #tpu.core_type<tc>, window_params = [{transform_indices = @transform_0, window_bounds = array<i64: 256, 48>}, {pipeline_mode = #tpu.pipeline_mode<synchronous>, transform_indices = @transform_1, window_bounds = array<i64: 48, 16>}, {pipeline_mode = #tpu.pipeline_mode<synchronous>, transform_indices = @transform_2, window_bounds = array<i64: 1, 16>}, {transform_indices = @transform_3, window_bounds = array<i64: 256, 16>}]} {
    %c0 = arith.constant 0 : index
    %c0_0 = arith.constant 0 : index
    %0 = vector.load %arg1[%c0, %c0_0] : memref<256x48xbf16, #tpu.memory_space<vmem>>, vector<256x48xbf16>
    %c0_1 = arith.constant 0 : index
    %c0_2 = arith.constant 0 : index
    %1 = vector.load %arg2[%c0_1, %c0_2] : memref<48x16xbf16, #tpu.memory_space<vmem>>, vector<48x16xbf16>
    %cst = arith.constant dense<0.000000e+00> : vector<256x16xf32>
    %2 = tpu.matmul %0, %1, %cst {dimension_numbers = #tpu.dot_dimension_numbers<[1], [0], [0], [1], [0, 0, 1, 1], [], []>} : vector<256x48xbf16>, vector<48x16xbf16>, vector<256x16xf32> -> vector<256x16xf32>
    %c0_3 = arith.constant 0 : index
    %c0_4 = arith.constant 0 : index
    %3 = vector.load %arg3[%c0_3, %c0_4] : memref<1x16xf32, #tpu.memory_space<vmem>>, vector<1x16xf32>
    %4 = vector.broadcast %3 : vector<1x16xf32> to vector<256x16xf32>
    %5 = arith.addf %2, %4 : vector<256x16xf32>
    %cst_5 = arith.constant 0.000000e+00 : f32
    %6 = vector.broadcast %cst_5 : f32 to vector<256x16xf32>
    %7 = arith.maximumf %5, %6 : vector<256x16xf32>
    %8 = arith.truncf %7 : vector<256x16xf32> to vector<256x16xbf16>
    %c0_6 = arith.constant 0 : index
    %c0_7 = arith.constant 0 : index
    %9 = vector.load %arg4[%c0_6, %c0_7] : memref<256x16xbf16, #tpu.memory_space<vmem>>, vector<256x16xbf16>
    tpu.vector_store %arg4[%c0_6, %c0_7], %8 {strides = array<i32>} : memref<256x16xbf16, #tpu.memory_space<vmem>>, vector<256x16xbf16>,
    return
  }
  func.func @transform_0(%arg0: i32) -> (i32, i32) {
    %c0_i32 = arith.constant 0 : i32
    %c0_i32_0 = arith.constant 0 : i32
    return %arg0, %c0_i32 : i32, i32
  }
  func.func @transform_1(%arg0: i32) -> (i32, i32) {
    %c0_i32 = arith.constant 0 : i32
    %c0_i32_0 = arith.constant 0 : i32
    %c0_i32_1 = arith.constant 0 : i32
    return %c0_i32, %c0_i32_0 : i32, i32
  }
  func.func @transform_2(%arg0: i32) -> (i32, i32) {
    %c0_i32 = arith.constant 0 : i32
    %c0_i32_0 = arith.constant 0 : i32
    %c0_i32_1 = arith.constant 0 : i32
    return %c0_i32, %c0_i32_0 : i32, i32
  }
  func.func @transform_3(%arg0: i32) -> (i32, i32) {
    %c0_i32 = arith.constant 0 : i32
    %c0_i32_0 = arith.constant 0 : i32
    return %arg0, %c0_i32 : i32, i32
  }
}

module attributes {stable_mosaic.version = 11 : i64} {
  func.func @_mm_res_kernel(%arg0: i32, %arg1: memref<256x48xbf16, #tpu.memory_space<vmem>>, %arg2: memref<48x16xbf16, #tpu.memory_space<vmem>>, %arg3: memref<1x16xf32, #tpu.memory_space<vmem>>, %arg4: memref<256x16xbf16, #tpu.memory_space<vmem>>, %arg5: memref<256x16xbf16, #tpu.memory_space<vmem>>) attributes {dimension_semantics = [#tpu.dimension_semantics<parallel>], iteration_bounds = array<i64: 2>, scalar_prefetch = 0 : i64, scratch_operands = 0 : i64, tpu.core_type = #tpu.core_type<tc>, window_params = [{transform_indices = @transform_0, window_bounds = array<i64: 256, 48>}, {pipeline_mode = #tpu.pipeline_mode<synchronous>, transform_indices = @transform_1, window_bounds = array<i64: 48, 16>}, {pipeline_mode = #tpu.pipeline_mode<synchronous>, transform_indices = @transform_2, window_bounds = array<i64: 1, 16>}, {transform_indices = @transform_3, window_bounds = array<i64: 256, 16>}, {transform_indices = @transform_4, window_bounds = array<i64: 256, 16>}]} {
    %c0 = arith.constant 0 : index
    %c0_0 = arith.constant 0 : index
    %0 = vector.load %arg1[%c0, %c0_0] : memref<256x48xbf16, #tpu.memory_space<vmem>>, vector<256x48xbf16>
    %c0_1 = arith.constant 0 : index
    %c0_2 = arith.constant 0 : index
    %1 = vector.load %arg2[%c0_1, %c0_2] : memref<48x16xbf16, #tpu.memory_space<vmem>>, vector<48x16xbf16>
    %cst = arith.constant dense<0.000000e+00> : vector<256x16xf32>
    %2 = tpu.matmul %0, %1, %cst {dimension_numbers = #tpu.dot_dimension_numbers<[1], [0], [0], [1], [0, 0, 1, 1], [], []>} : vector<256x48xbf16>, vector<48x16xbf16>, vector<256x16xf32> -> vector<256x16xf32>
    %c0_3 = arith.constant 0 : index
    %c0_4 = arith.constant 0 : index
    %3 = vector.load %arg3[%c0_3, %c0_4] : memref<1x16xf32, #tpu.memory_space<vmem>>, vector<1x16xf32>
    %4 = vector.broadcast %3 : vector<1x16xf32> to vector<256x16xf32>
    %5 = arith.addf %2, %4 : vector<256x16xf32>
    %c0_5 = arith.constant 0 : index
    %c0_6 = arith.constant 0 : index
    %6 = vector.load %arg4[%c0_5, %c0_6] : memref<256x16xbf16, #tpu.memory_space<vmem>>, vector<256x16xbf16>
    %7 = arith.extf %6 : vector<256x16xbf16> to vector<256x16xf32>
    %8 = arith.addf %5, %7 : vector<256x16xf32>
    %cst_7 = arith.constant 0.000000e+00 : f32
    %9 = vector.broadcast %cst_7 : f32 to vector<256x16xf32>
    %10 = arith.maximumf %8, %9 : vector<256x16xf32>
    %11 = arith.truncf %10 : vector<256x16xf32> to vector<256x16xbf16>
    %c0_8 = arith.constant 0 : index
    %c0_9 = arith.constant 0 : index
    %12 = vector.load %arg5[%c0_8, %c0_9] : memref<256x16xbf16, #tpu.memory_space<vmem>>, vector<256x16xbf16>
    tpu.vector_store %arg5[%c0_8, %c0_9], %11 {strides = array<i32>} : memref<256x16xbf16, #tpu.memory_space<vmem>>, vector<256x16xbf16>,
    return
  }
  func.func @transform_0(%arg0: i32) -> (i32, i32) {
    %c0_i32 = arith.constant 0 : i32
    %c0_i32_0 = arith.constant 0 : i32
    return %arg0, %c0_i32 : i32, i32
  }
  func.func @transform_1(%arg0: i32) -> (i32, i32) {
    %c0_i32 = arith.constant 0 : i32
    %c0_i32_0 = arith.constant 0 : i32
    %c0_i32_1 = arith.constant 0 : i32
    return %c0_i32, %c0_i32_0 : i32, i32
  }
  func.func @transform_2(%arg0: i32) -> (i32, i32) {
    %c0_i32 = arith.constant 0 : i32
    %c0_i32_0 = arith.constant 0 : i32
    %c0_i32_1 = arith.constant 0 : i32
    return %c0_i32, %c0_i32_0 : i32, i32
  }
  func.func @transform_3(%arg0: i32) -> (i32, i32) {
    %c0_i32 = arith.constant 0 : i32
    %c0_i32_0 = arith.constant 0 : i32
    return %arg0, %c0_i32 : i32, i32
  }
  func.func @transform_4(%arg0: i32) -> (i32, i32) {
    %c0_i32 = arith.constant 0 : i32
    %c0_i32_0 = arith.constant 0 : i32
    return %arg0, %c0_i32 : i32, i32
  }
}

module attributes {stable_mosaic.version = 11 : i64} {
  func.func @_mm_kernel(%arg0: i32, %arg1: memref<256x16xbf16, #tpu.memory_space<vmem>>, %arg2: memref<16x12xbf16, #tpu.memory_space<vmem>>, %arg3: memref<1x12xf32, #tpu.memory_space<vmem>>, %arg4: memref<256x12xf32, #tpu.memory_space<vmem>>) attributes {dimension_semantics = [#tpu.dimension_semantics<parallel>], iteration_bounds = array<i64: 2>, scalar_prefetch = 0 : i64, scratch_operands = 0 : i64, tpu.core_type = #tpu.core_type<tc>, window_params = [{transform_indices = @transform_0, window_bounds = array<i64: 256, 16>}, {pipeline_mode = #tpu.pipeline_mode<synchronous>, transform_indices = @transform_1, window_bounds = array<i64: 16, 12>}, {pipeline_mode = #tpu.pipeline_mode<synchronous>, transform_indices = @transform_2, window_bounds = array<i64: 1, 12>}, {transform_indices = @transform_3, window_bounds = array<i64: 256, 12>}]} {
    %c0 = arith.constant 0 : index
    %c0_0 = arith.constant 0 : index
    %0 = vector.load %arg1[%c0, %c0_0] : memref<256x16xbf16, #tpu.memory_space<vmem>>, vector<256x16xbf16>
    %c0_1 = arith.constant 0 : index
    %c0_2 = arith.constant 0 : index
    %1 = vector.load %arg2[%c0_1, %c0_2] : memref<16x12xbf16, #tpu.memory_space<vmem>>, vector<16x12xbf16>
    %cst = arith.constant dense<0.000000e+00> : vector<256x12xf32>
    %2 = tpu.matmul %0, %1, %cst {dimension_numbers = #tpu.dot_dimension_numbers<[1], [0], [0], [1], [0, 0, 1, 1], [], []>} : vector<256x16xbf16>, vector<16x12xbf16>, vector<256x12xf32> -> vector<256x12xf32>
    %c0_3 = arith.constant 0 : index
    %c0_4 = arith.constant 0 : index
    %3 = vector.load %arg3[%c0_3, %c0_4] : memref<1x12xf32, #tpu.memory_space<vmem>>, vector<1x12xf32>
    %4 = vector.broadcast %3 : vector<1x12xf32> to vector<256x12xf32>
    %5 = arith.addf %2, %4 : vector<256x12xf32>
    %c0_5 = arith.constant 0 : index
    %c0_6 = arith.constant 0 : index
    %6 = vector.load %arg4[%c0_5, %c0_6] : memref<256x12xf32, #tpu.memory_space<vmem>>, vector<256x12xf32>
    tpu.vector_store %arg4[%c0_5, %c0_6], %5 {strides = array<i32>} : memref<256x12xf32, #tpu.memory_space<vmem>>, vector<256x12xf32>,
    return
  }
  func.func @transform_0(%arg0: i32) -> (i32, i32) {
    %c0_i32 = arith.constant 0 : i32
    %c0_i32_0 = arith.constant 0 : i32
    return %arg0, %c0_i32 : i32, i32
  }
  func.func @transform_1(%arg0: i32) -> (i32, i32) {
    %c0_i32 = arith.constant 0 : i32
    %c0_i32_0 = arith.constant 0 : i32
    %c0_i32_1 = arith.constant 0 : i32
    return %c0_i32, %c0_i32_0 : i32, i32
  }
  func.func @transform_2(%arg0: i32) -> (i32, i32) {
    %c0_i32 = arith.constant 0 : i32
    %c0_i32_0 = arith.constant 0 : i32
    %c0_i32_1 = arith.constant 0 : i32
    return %c0_i32, %c0_i32_0 : i32, i32
  }
  func.func @transform_3(%arg0: i32) -> (i32, i32) {
    %c0_i32 = arith.constant 0 : i32
    %c0_i32_0 = arith.constant 0 : i32
    return %arg0, %c0_i32 : i32, i32
  }
}

</mosaic_0001>

<bundles_post_ra>
// kernel: erfnet_forward.74
= control target key start
LH: loop header
LB: loop body
LE: loop exit
PB: predicated region body
PF: predicated region fallthrough
CT: control target
= control target key end

     0   :  { %s1936_s27 = smov 0   ;;  %s2271_s0 = inlined_call_operand.vmem [shape: bf16[512,27], index: 0, kind: input, shape index: {}]   ;;  %s2272_s1 = inlined_call_operand.vmem [shape: bf16[27,16], index: 1, kind: input, shape index: {}]   ;;  %s2273_s2 = inlined_call_operand.vmem [shape: bf16[512,3], index: 2, kind: input, shape index: {}]   ;;  %s2274_s3 = inlined_call_operand.vmem [shape: bf16[512,3], index: 3, kind: input, shape index: {}]   ;;  %s2275_s4 = inlined_call_operand.vmem [shape: bf16[512,3], index: 4, kind: input, shape index: {}]   ;;  %s2276_s5 = inlined_call_operand.vmem [shape: bf16[512,3], index: 5, kind: input, shape index: {}]   ;;  %s2277_s6 = inlined_call_operand.vmem [shape: bf16[3,16], index: 6, kind: input, shape index: {}]   ;;  %s2278_s7 = inlined_call_operand.vmem [shape: f32[1,16], index: 7, kind: input, shape index: {}]   ;;  %s2279_s8 = inlined_call_operand.vmem [shape: bf16[512,16], index: 8, kind: output, shape index: {}]  }
   0x1 LB: > { %s1600_s28 = sadd.s32 4294967295, %s1888_s27   ;;  %p1604_p0 = scmp.ge.s32.totalorder %s1888_s27, 1  ;;  %s1888_s27 = sphi %s1936_s27, %s18_s27  }
   0x2   : > { %p307_p1 = scmp.lt.s32.totalorder %s1888_s27, 3 }
   0x4   : > { %p308_p2 = pnand %p1604_p0, %p307_p1 }
   0x5   : > { %s1605_s13 = sshll.u32 (!%p308_p2), %s1600_s28, 5 }
   0x6   : > { %311 = sbr.rel (%p308_p2) target bundleno = 292 (0x124), region = 52  ;;  %p362_p3 = scmp.lt.s32.totalorder (!%p308_p2), %s1605_s13, 63 }
   0xb   : > { %vm1096_vm0 = vcmask 1044480   ;;  %v1864_v0 = vld [vmem:[%s2272_s1 + $0x8] sm:$0x3f]   ;;  %vm1097_vm1 = vcmask 1045504   ;;  %v1890_v1 = vmov 65535   ;;  %v1865_v5 = vld [vmem:[%s2272_s1] sm:$0xff]  }
   0xc   : > { %v1098_v2 = vsel %vm1096_vm0, 4294967295, %v1890_v1  ;;  %v658_v6 = vld [vmem:[%s2277_s6] sm:$0x3]  ;;  %vm788_vm2 = vcmask 1040384   ;;  %vm789_vm3 = vcmask 1041408   ;;  %s2281_s13 = smov (!%p362_p3, %s1605_s13), 63 }
   0xd   : > { %v1099_v3 = vsel %vm1097_vm1, %v1098_v2, 0  ;;  %v790_v7 = vsel %vm788_vm2, 4294967295, %v1890_v1  ;;  %s1953_s14 = sshll.u32 %s2281_s13, 2  ;;  %vm1047_vm4 = vcmask 220160   ;;  %vm739_vm5 = vcmask 23552  }
   0xe   : > { %v1101_v4 = vand.u32 %v1864_v0, %v1099_v3  ;;  %v791_v8 = vsel %vm789_vm3, %v790_v7, 0  ;;  %s1959_s17 = scalar_lea.vmem %s2271_s0, %s1953_s14  ;;  %s1965_s20 = scalar_lea.vmem %s2273_s2, %s1953_s14  ;;  %vm1463_vm6 = vcmask 125952  }
   0xf   : > { %v793_v9 = vand.u32 %v791_v8, %v658_v6  ;;  %v1866_v10 = vld [vmem:[%s1959_s17] sm:$0xff]   ;;  %s1972_s23 = scalar_lea.vmem %s2274_s3, %s1953_s14  ;;  %s1978_s26 = scalar_lea.vmem %s2275_s4, %s1953_s14  ;;  %v1867_v11 = vld [vmem:[%s1959_s17 + $0x8] sm:$0xff]   ;;  %v1868_v38 = vld [vmem:[%s1959_s17 + $0x10] sm:$0xff]  }
  0x10   : > { %1819 = vmatprep.subr.bf16.mxu1 %v1101_v4  ;;  %s1985_s30 = scalar_lea.vmem %s2276_s5, %s1953_s14  ;;  %1823 = vmatprep.mubr.msk.bf16.mxu1 %vm1047_vm4, %v1866_v10  ;;  %v434_v12 = vld [vmem:[%s1965_s20] sm:$0xf]  ;;  %v435_v13 = vld [vmem:[%s1965_s20 + $0x4] sm:$0xf]  ;;  %v436_v22 = vld [vmem:[%s1965_s20 + $0x8] sm:$0xf]  ;;  %s2172_s13 = scalar_lea.vmem %s2279_s8, %s1953_s14 }
  0x11   : > { %1820 = vmatpush3.bf16.msra.mxu1 %v1101_v4  ;;  %1785 = vmatprep.subr.bf16.mxu0 %v793_v9  ;;  %v466_v14 = vld [vmem:[%s1972_s23] sm:$0xf]  ;;  %v467_v15 = vld [vmem:[%s1972_s23 + $0x4] sm:$0xf]  ;;  %v437_v25 = vld [vmem:[%s1965_s20 + $0xc] sm:$0xf] }
  0x12   : > { %1821 = vmatprep.subr.bf16.mxu1 %v1865_v5  ;;  %1786 = vmatpush3.bf16.msra.mxu0 %v793_v9  ;;  %v498_v16 = vmax.bf16 %v466_v14, %v434_v12  ;;  %v530_v17 = vld [vmem:[%s1978_s26] sm:$0xf]  ;;  %v531_v18 = vld [vmem:[%s1978_s26 + $0x4] sm:$0xf]  ;;  %v499_v19 = vmax.bf16 %v467_v15, %v435_v13  ;;  %v468_v26 = vld [vmem:[%s1972_s23 + $0x8] sm:$0xf] }
  0x13   : > { %v562_v20 = vld [vmem:[%s1985_s30] sm:$0xf]  ;;  %v563_v21 = vld [vmem:[%s1985_s30 + $0x4] sm:$0xf]  ;;  %v469_v27 = vld [vmem:[%s1972_s23 + $0xc] sm:$0xf]  ;;  %v500_v28 = vmax.bf16 %v468_v26, %v436_v22 }
  0x14   : > { %v594_v23 = vmax.bf16 %v562_v20, %v530_v17  ;;  %v595_v24 = vmax.bf16 %v563_v21, %v531_v18  ;;  %v501_v29 = vmax.bf16 %v469_v27, %v437_v25  ;;  %v532_v30 = vld [vmem:[%s1978_s26 + $0x8] sm:$0xf]  ;;  %v533_v31 = vld [vmem:[%s1978_s26 + $0xc] sm:$0xf]  ;;  %v1869_v41 = vld [vmem:[%s1959_s17 + $0x18] sm:$0xff]  }
  0x15   : > { %1822 = vmatpush3.bf16.msra.mxu1 %v1865_v5  ;;  %v564_v32 = vld [vmem:[%s1985_s30 + $0x8] sm:$0xf]  ;;  %v565_v35 = vld [vmem:[%s1985_s30 + $0xc] sm:$0xf]  ;;  %v438_v42 = vld [vmem:[%s1965_s20 + $0x10] sm:$0xf] }
  0x16   : > { %v626_v33 = vmax.bf16 %v594_v23, %v498_v16  ;;  %v627_v34 = vmax.bf16 %v595_v24, %v499_v19  ;;  %v596_v36 = vmax.bf16 %v564_v32, %v532_v30  ;;  %v597_v37 = vmax.bf16 %v565_v35, %v533_v31  ;;  %v439_v43 = vld [vmem:[%s1965_s20 + $0x14] sm:$0xf]  ;;  %v470_v45 = vld [vmem:[%s1972_s23 + $0x10] sm:$0xf]  ;;  %v440_v56 = vld [vmem:[%s1965_s20 + $0x18] sm:$0xf] }
  0x17   : > { %v471_v46 = vld [vmem:[%s1972_s23 + $0x14] sm:$0xf]  ;;  %v534_v47 = vld [vmem:[%s1978_s26 + $0x10] sm:$0xf]  ;;  %v502_v48 = vmax.bf16 %v470_v45, %v438_v42  ;;  %v441_v57 = vld [vmem:[%s1965_s20 + $0x1c] sm:$0xf] }
  0x18   : > { %1824 = vmatmul.mubr.msk.bf16.vlgmr.msra.gmra.mxu1 %vm1047_vm4, %v1867_v11  ;;  %v1617_v39 = vcombine.low %v626_v33, %v627_v34  ;;  %v628_v40 = vmax.bf16 %v596_v36, %v500_v28  ;;  %v629_v44 = vmax.bf16 %v597_v37, %v501_v29  ;;  %v503_v49 = vmax.bf16 %v471_v46, %v439_v43  ;;  %v535_v50 = vld [vmem:[%s1978_s26 + $0x14] sm:$0xf]  ;;  %v566_v51 = vld [vmem:[%s1985_s30 + $0x10] sm:$0xf]  ;;  %v472_v58 = vld [vmem:[%s1972_s23 + $0x18] sm:$0xf] }
  0x19   : > { %1827 = vmatprep.mubr.msk.bf16.mxu1 %vm1047_vm4, %v1868_v38  ;;  %v567_v52 = vld [vmem:[%s1985_s30 + $0x14] sm:$0xf]  ;;  %v598_v54 = vmax.bf16 %v566_v51, %v534_v47  ;;  %v473_v59 = vld [vmem:[%s1972_s23 + $0x1c] sm:$0xf]  ;;  %v504_v60 = vmax.bf16 %v472_v58, %v440_v56  ;;  %v536_v61 = vld [vmem:[%s1978_s26 + $0x18] sm:$0xf] }
  0x1a   : > { %1787 = vmatprep.mubr.msk.bf16.mxu0 %vm739_vm5, %v1617_v39  ;;  %v1618_v53 = vcombine.low %v628_v40, %v629_v44  ;;  %v599_v55 = vmax.bf16 %v567_v52, %v535_v50  ;;  %v537_v62 = vld [vmem:[%s1978_s26 + $0x1c] sm:$0xf]  ;;  %v505_v1 = vmax.bf16 %v473_v59, %v441_v57  ;;  %v568_v2 = vld [vmem:[%s1985_s30 + $0x18] sm:$0xf]  ;;  %v1870_v6 = vld [vmem:[%s1959_s17 + $0x20] sm:$0xff]  }
  0x1b   : > { %v630_v63 = vmax.bf16 %v598_v54, %v502_v48  ;;  %v569_v3 = vld [vmem:[%s1985_s30 + $0x1c] sm:$0xf]  ;;  %v600_v4 = vmax.bf16 %v568_v2, %v536_v61  ;;  %v1871_v8 = vld [vmem:[%s1959_s17 + $0x28] sm:$0xff]   ;;  %v442_v9 = vld [vmem:[%s1965_s20 + $0x20] sm:$0xf] }
  0x1c   : > { %1788 = vmatmul.mubr.msk.bf16.vlgmr.msra.gmra.mxu0 %vm739_vm5, %v1618_v53  ;;  %v631_v0 = vmax.bf16 %v599_v55, %v503_v49  ;;  %v601_v5 = vmax.bf16 %v569_v3, %v537_v62  ;;  %v443_v12 = vld [vmem:[%s1965_s20 + $0x24] sm:$0xf]  ;;  %v474_v13 = vld [vmem:[%s1972_s23 + $0x20] sm:$0xf]  ;;  %v444_v23 = vld [vmem:[%s1965_s20 + $0x28] sm:$0xf] }
  0x1d   : > { %v632_v10 = vmax.bf16 %v600_v4, %v504_v60  ;;  %v475_v14 = vld [vmem:[%s1972_s23 + $0x24] sm:$0xf]  ;;  %v506_v15 = vmax.bf16 %v474_v13, %v442_v9  ;;  %v538_v17 = vld [vmem:[%s1978_s26 + $0x20] sm:$0xf]  ;;  %v445_v24 = vld [vmem:[%s1965_s20 + $0x2c] sm:$0xf] }
  0x1e   : > { %v1619_v7 = vcombine.low %v630_v63, %v631_v0  ;;  %v633_v11 = vmax.bf16 %v601_v5, %v505_v1  ;;  %v507_v16 = vmax.bf16 %v475_v14, %v443_v12  ;;  %v539_v18 = vld [vmem:[%s1978_s26 + $0x24] sm:$0xf]  ;;  %v570_v19 = vld [vmem:[%s1985_s30 + $0x20] sm:$0xf]  ;;  %v476_v26 = vld [vmem:[%s1972_s23 + $0x28] sm:$0xf] }
  0x1f   : > { %v571_v21 = vld [vmem:[%s1985_s30 + $0x24] sm:$0xf]  ;;  %v602_v22 = vmax.bf16 %v570_v19, %v538_v17  ;;  %v477_v27 = vld [vmem:[%s1972_s23 + $0x2c] sm:$0xf]  ;;  %v540_v28 = vld [vmem:[%s1978_s26 + $0x28] sm:$0xf]  ;;  %v508_v30 = vmax.bf16 %v476_v26, %v444_v23 }
  0x20   : > { %1828 = vmatmul.mubr.msk.bf16.gmra.mxu1 %vm1047_vm4, %v1869_v41  ;;  %1791 = vmatprep.mubr.msk.bf16.mxu0 %vm739_vm5, %v1619_v7  ;;  %v1620_v20 = vcombine.low %v632_v10, %v633_v11  ;;  %v603_v25 = vmax.bf16 %v571_v21, %v539_v18  ;;  %v509_v31 = vmax.bf16 %v477_v27, %v445_v24  ;;  %v541_v32 = vld [vmem:[%s1978_s26 + $0x2c] sm:$0xf]  ;;  %v572_v33 = vld [vmem:[%s1985_s30 + $0x28] sm:$0xf]  ;;  %v1872_v38 = vld [vmem:[%s1959_s17 + $0x30] sm:$0xff]  }
  0x21   : > { %1831 = vmatprep.mubr.msk.bf16.mxu1 %vm1047_vm4, %v1870_v6  ;;  %v634_v29 = vmax.bf16 %v602_v22, %v506_v15  ;;  %v573_v34 = vld [vmem:[%s1985_s30 + $0x2c] sm:$0xf]  ;;  %v604_v36 = vmax.bf16 %v572_v33, %v540_v28  ;;  %v1873_v39 = vld [vmem:[%s1959_s17 + $0x38] sm:$0xff]   ;;  %v446_v43 = vld [vmem:[%s1965_s20 + $0x30] sm:$0xf] }
  0x22   : > { %v635_v35 = vmax.bf16 %v603_v25, %v507_v16  ;;  %v605_v37 = vmax.bf16 %v573_v34, %v541_v32  ;;  %v447_v44 = vld [vmem:[%s1965_s20 + $0x34] sm:$0xf]  ;;  %v478_v45 = vld [vmem:[%s1972_s23 + $0x30] sm:$0xf]  ;;  %v448_v54 = vld [vmem:[%s1965_s20 + $0x38] sm:$0xf] }
  0x23   : > { %v636_v41 = vmax.bf16 %v604_v36, %v508_v30  ;;  %v479_v46 = vld [vmem:[%s1972_s23 + $0x34] sm:$0xf]  ;;  %v510_v47 = vmax.bf16 %v478_v45, %v446_v43  ;;  %v542_v48 = vld [vmem:[%s1978_s26 + $0x30] sm:$0xf]  ;;  %v449_v57 = vld [vmem:[%s1965_s20 + $0x3c] sm:$0xf] }
  0x24   : > { %1792 = vmatmul.mubr.msk.bf16.gmra.mxu0 %vm739_vm5, %v1620_v20  ;;  %v1621_v40 = vcombine.low %v634_v29, %v635_v35  ;;  %v637_v42 = vmax.bf16 %v605_v37, %v509_v31  ;;  %v543_v49 = vld [vmem:[%s1978_s26 + $0x34] sm:$0xf]  ;;  %v511_v51 = vmax.bf16 %v479_v46, %v447_v44  ;;  %v574_v52 = vld [vmem:[%s1985_s30 + $0x30] sm:$0xf]  ;;  %v480_v58 = vld [vmem:[%s1972_s23 + $0x38] sm:$0xf] }
  0x25   : > { %v575_v53 = vld [vmem:[%s1985_s30 + $0x34] sm:$0xf]  ;;  %v606_v55 = vmax.bf16 %v574_v52, %v542_v48  ;;  %v481_v59 = vld [vmem:[%s1972_s23 + $0x3c] sm:$0xf]  ;;  %v512_v60 = vmax.bf16 %v480_v58, %v448_v54  ;;  %v544_v62 = vld [vmem:[%s1978_s26 + $0x38] sm:$0xf] }
  0x26   : > { %1795 = vmatprep.mubr.msk.bf16.mxu0 %vm739_vm5, %v1621_v40  ;;  %v1622_v50 = vcombine.low %v636_v41, %v637_v42  ;;  %v607_v56 = vmax.bf16 %v575_v53, %v543_v49  ;;  %v513_v61 = vmax.bf16 %v481_v59, %v449_v57  ;;  %v545_v63 = vld [vmem:[%s1978_s26 + $0x3c] sm:$0xf]  ;;  %v576_v0 = vld [vmem:[%s1985_s30 + $0x38] sm:$0xf]  ;;  %v1874_v6 = vld [vmem:[%s1959_s17 + $0x40] sm:$0xff]  }
  0x27   : > { %v638_v1 = vmax.bf16 %v606_v55, %v510_v47  ;;  %v577_v3 = vld [vmem:[%s1985_s30 + $0x3c] sm:$0xf]  ;;  %v608_v4 = vmax.bf16 %v576_v0, %v544_v62  ;;  %v1875_v9 = vld [vmem:[%s1959_s17 + $0x48] sm:$0xff]   ;;  %v450_v10 = vld [vmem:[%s1965_s20 + $0x40] sm:$0xf] }
  0x28   : > { %1832 = vmatmul.mubr.msk.bf16.gmra.mxu1 %vm1047_vm4, %v1871_v8  ;;  %v639_v2 = vmax.bf16 %v607_v56, %v511_v51  ;;  %v609_v5 = vmax.bf16 %v577_v3, %v545_v63  ;;  %v451_v11 = vld [vmem:[%s1965_s20 + $0x44] sm:$0xf]  ;;  %v482_v13 = vld [vmem:[%s1972_s23 + $0x40] sm:$0xf]  ;;  %v452_v24 = vld [vmem:[%s1965_s20 + $0x48] sm:$0xf] }
  0x29   : > { %1835 = vmatprep.mubr.msk.bf16.mxu1 %vm1047_vm4, %v1872_v38  ;;  %v640_v8 = vmax.bf16 %v608_v4, %v512_v60  ;;  %v483_v14 = vld [vmem:[%s1972_s23 + $0x44] sm:$0xf]  ;;  %v546_v15 = vld [vmem:[%s1978_s26 + $0x40] sm:$0xf]  ;;  %v514_v16 = vmax.bf16 %v482_v13, %v450_v10  ;;  %v453_v25 = vld [vmem:[%s1965_s20 + $0x4c] sm:$0xf] }
  0x2a   : > { %v1623_v7 = vcombine.low %v638_v1, %v639_v2  ;;  %v641_v12 = vmax.bf16 %v609_v5, %v513_v61  ;;  %v515_v17 = vmax.bf16 %v483_v14, %v451_v11  ;;  %v547_v18 = vld [vmem:[%s1978_s26 + $0x44] sm:$0xf]  ;;  %v578_v19 = vld [vmem:[%s1985_s30 + $0x40] sm:$0xf]  ;;  %v484_v26 = vld [vmem:[%s1972_s23 + $0x48] sm:$0xf] }
  0x2b   : > { %v579_v20 = vld [vmem:[%s1985_s30 + $0x44] sm:$0xf]  ;;  %v610_v22 = vmax.bf16 %v578_v19, %v546_v15  ;;  %v485_v27 = vld [vmem:[%s1972_s23 + $0x4c] sm:$0xf]  ;;  %v516_v28 = vmax.bf16 %v484_v26, %v452_v24  ;;  %v548_v29 = vld [vmem:[%s1978_s26 + $0x48] sm:$0xf] }
  0x2c   : > { %1796 = vmatmul.mubr.msk.bf16.gmra.mxu0 %vm739_vm5, %v1622_v50  ;;  %v1624_v21 = vcombine.low %v640_v8, %v641_v12  ;;  %v611_v23 = vmax.bf16 %v579_v20, %v547_v18  ;;  %v549_v30 = vld [vmem:[%s1978_s26 + $0x4c] sm:$0xf]  ;;  %v517_v33 = vmax.bf16 %v485_v27, %v453_v25  ;;  %v580_v34 = vld [vmem:[%s1985_s30 + $0x48] sm:$0xf]  ;;  %v1876_v38 = vld [vmem:[%s1959_s17 + $0x50] sm:$0xff]  }
  0x2d   : > { %1799 = vmatprep.mubr.msk.bf16.mxu0 %vm739_vm5, %v1623_v7  ;;  %v642_v31 = vmax.bf16 %v610_v22, %v514_v16  ;;  %v581_v35 = vld [vmem:[%s1985_s30 + $0x4c] sm:$0xf]  ;;  %v612_v36 = vmax.bf16 %v580_v34, %v548_v29  ;;  %v1877_v40 = vld [vmem:[%s1959_s17 + $0x58] sm:$0xff]   ;;  %v454_v41 = vld [vmem:[%s1965_s20 + $0x50] sm:$0xf] }
  0x2e   : > { %v643_v32 = vmax.bf16 %v611_v23, %v515_v17  ;;  %v613_v37 = vmax.bf16 %v581_v35, %v549_v30  ;;  %v455_v44 = vld [vmem:[%s1965_s20 + $0x54] sm:$0xf]  ;;  %v486_v45 = vld [vmem:[%s1972_s23 + $0x50] sm:$0xf]  ;;  %v456_v54 = vld [vmem:[%s1965_s20 + $0x58] sm:$0xf] }
  0x2f   : > { %v644_v42 = vmax.bf16 %v612_v36, %v516_v28  ;;  %v487_v46 = vld [vmem:[%s1972_s23 + $0x54] sm:$0xf]  ;;  %v518_v47 = vmax.bf16 %v486_v45, %v454_v41  ;;  %v550_v49 = vld [vmem:[%s1978_s26 + $0x50] sm:$0xf]  ;;  %v457_v55 = vld [vmem:[%s1965_s20 + $0x5c] sm:$0xf] }
  0x30   : > { %1836 = vmatmul.mubr.msk.bf16.gmra.mxu1 %vm1047_vm4, %v1873_v39  ;;  %v1625_v39 = vcombine.low %v642_v31, %v643_v32  ;;  %v645_v43 = vmax.bf16 %v613_v37, %v517_v33  ;;  %v519_v48 = vmax.bf16 %v487_v46, %v455_v44  ;;  %v551_v50 = vld [vmem:[%s1978_s26 + $0x54] sm:$0xf]  ;;  %v582_v51 = vld [vmem:[%s1985_s30 + $0x50] sm:$0xf]  ;;  %v488_v58 = vld [vmem:[%s1972_s23 + $0x58] sm:$0xf] }
  0x31   : > { %1839 = vmatprep.mubr.msk.bf16.mxu1 %vm1047_vm4, %v1874_v6  ;;  %v583_v52 = vld [vmem:[%s1985_s30 + $0x54] sm:$0xf]  ;;  %v614_v53 = vmax.bf16 %v582_v51, %v550_v49  ;;  %v489_v59 = vld [vmem:[%s1972_s23 + $0x5c] sm:$0xf]  ;;  %v552_v60 = vld [vmem:[%s1978_s26 + $0x58] sm:$0xf]  ;;  %v520_v62 = vmax.bf16 %v488_v58, %v456_v54 }
  0x32   : > { %v1626_v56 = vcombine.low %v644_v42, %v645_v43  ;;  %v615_v57 = vmax.bf16 %v583_v52, %v551_v50  ;;  %v521_v63 = vmax.bf16 %v489_v59, %v457_v55  ;;  %v553_v0 = vld [vmem:[%s1978_s26 + $0x5c] sm:$0xf]  ;;  %v584_v1 = vld [vmem:[%s1985_s30 + $0x58] sm:$0xf]  ;;  %v1878_v6 = vld [vmem:[%s1959_s17 + $0x60] sm:$0xff]  }
  0x33   : > { %v646_v61 = vmax.bf16 %v614_v53, %v518_v47  ;;  %v585_v2 = vld [vmem:[%s1985_s30 + $0x5c] sm:$0xf]  ;;  %v616_v4 = vmax.bf16 %v584_v1, %v552_v60  ;;  %v1879_v7 = vld [vmem:[%s1959_s17 + $0x68] sm:$0xff]   ;;  %v458_v11 = vld [vmem:[%s1965_s20 + $0x60] sm:$0xf] }
  0x34   : > { %1800 = vmatmul.mubr.msk.bf16.gmra.mxu0 %vm739_vm5, %v1624_v21  ;;  %v647_v3 = vmax.bf16 %v615_v57, %v519_v48  ;;  %v617_v5 = vmax.bf16 %v585_v2, %v553_v0  ;;  %v459_v12 = vld [vmem:[%s1965_s20 + $0x64] sm:$0xf]  ;;  %v490_v13 = vld [vmem:[%s1972_s23 + $0x60] sm:$0xf]  ;;  %v460_v21 = vld [vmem:[%s1965_s20 + $0x68] sm:$0xf] }
  0x35   : > { %1803 = vmatprep.mubr.msk.bf16.mxu0 %vm739_vm5, %v1625_v39  ;;  %v491_v14 = vld [vmem:[%s1972_s23 + $0x64] sm:$0xf]  ;;  %v522_v15 = vmax.bf16 %v490_v13, %v458_v11  ;;  %v554_v16 = vld [vmem:[%s1978_s26 + $0x60] sm:$0xf]  ;;  %v461_v24 = vld [vmem:[%s1965_s20 + $0x6c] sm:$0xf] }
  0x36   : > { %v1627_v8 = vcombine.low %v646_v61, %v647_v3  ;;  %v649_v10 = vmax.bf16 %v617_v5, %v521_v63  ;;  %v555_v17 = vld [vmem:[%s1978_s26 + $0x64] sm:$0xf]  ;;  %v523_v18 = vmax.bf16 %v491_v14, %v459_v12  ;;  %v586_v19 = vld [vmem:[%s1985_s30 + $0x60] sm:$0xf]  ;;  %v492_v25 = vld [vmem:[%s1972_s23 + $0x68] sm:$0xf] }
  0x37   : > { %v587_v20 = vld [vmem:[%s1985_s30 + $0x64] sm:$0xf]  ;;  %v618_v22 = vmax.bf16 %v586_v19, %v554_v16  ;;  %v493_v26 = vld [vmem:[%s1972_s23 + $0x6c] sm:$0xf]  ;;  %v524_v28 = vmax.bf16 %v492_v25, %v460_v21  ;;  %v556_v30 = vld [vmem:[%s1978_s26 + $0x68] sm:$0xf] }
  0x38   : > { %1840 = vmatmul.mubr.msk.bf16.gmra.mxu1 %vm1047_vm4, %v1875_v9  ;;  %v648_v9 = vmax.bf16 %v616_v4, %v520_v62  ;;  %v619_v23 = vmax.bf16 %v587_v20, %v555_v17  ;;  %v525_v29 = vmax.bf16 %v493_v26, %v461_v24  ;;  %v557_v31 = vld [vmem:[%s1978_s26 + $0x6c] sm:$0xf]  ;;  %v588_v32 = vld [vmem:[%s1985_s30 + $0x68] sm:$0xf]  ;;  %v1881_v41 = vld [vmem:[%s1959_s17 + $0x78] sm:$0xff]  }
  0x39   : > { %1843 = vmatprep.mubr.msk.bf16.mxu1 %vm1047_vm4, %v1876_v38  ;;  %v650_v33 = vmax.bf16 %v618_v22, %v522_v15  ;;  %v589_v35 = vld [vmem:[%s1985_s30 + $0x6c] sm:$0xf]  ;;  %v620_v36 = vmax.bf16 %v588_v32, %v556_v30  ;;  %v1880_v38 = vld [vmem:[%s1959_s17 + $0x70] sm:$0xff]   ;;  %v464_v55 = vld [vmem:[%s1965_s20 + $0x78] sm:$0xf] }
  0x3a   : > { %v1628_v27 = vcombine.low %v648_v9, %v649_v10  ;;  %v651_v34 = vmax.bf16 %v619_v23, %v523_v18  ;;  %v621_v37 = vmax.bf16 %v589_v35, %v557_v31  ;;  %v462_v42 = vld [vmem:[%s1965_s20 + $0x70] sm:$0xf]  ;;  %v463_v43 = vld [vmem:[%s1965_s20 + $0x74] sm:$0xf]  ;;  %v496_v57 = vld [vmem:[%s1972_s23 + $0x78] sm:$0xf] }
  0x3b   : > { %v494_v45 = vld [vmem:[%s1972_s23 + $0x70] sm:$0xf]  ;;  %v495_v46 = vld [vmem:[%s1972_s23 + $0x74] sm:$0xf]  ;;  %v497_v59 = vld [vmem:[%s1972_s23 + $0x7c] sm:$0xf]  ;;  %v528_v0 = vmax.bf16 %v496_v57, %v464_v55 }
  0x3c   : > { %1804 = vmatmul.mubr.msk.bf16.gmra.mxu0 %vm739_vm5, %v1626_v56  ;;  %v1629_v39 = vcombine.low %v650_v33, %v651_v34  ;;  %v653_v44 = vmax.bf16 %v621_v37, %v525_v29  ;;  %v558_v47 = vld [vmem:[%s1978_s26 + $0x70] sm:$0xf]  ;;  %v526_v48 = vmax.bf16 %v494_v45, %v462_v42  ;;  %v527_v49 = vmax.bf16 %v495_v46, %v463_v43  ;;  %v559_v50 = vld [vmem:[%s1978_s26 + $0x74] sm:$0xf]  ;;  %v465_v56 = vld [vmem:[%s1965_s20 + $0x7c] sm:$0xf] }
  0x3d   : > { %1807 = vmatprep.mubr.msk.bf16.mxu0 %vm739_vm5, %v1627_v8  ;;  %v590_v51 = vld [vmem:[%s1985_s30 + $0x70] sm:$0xf]  ;;  %v591_v52 = vld [vmem:[%s1985_s30 + $0x74] sm:$0xf]  ;;  %v560_v60 = vld [vmem:[%s1978_s26 + $0x78] sm:$0xf]  ;;  %v529_v1 = vmax.bf16 %v497_v59, %v465_v56 }
  0x3e   : > { %v622_v53 = vmax.bf16 %v590_v51, %v558_v47  ;;  %v623_v54 = vmax.bf16 %v591_v52, %v559_v50  ;;  %v561_v61 = vld [vmem:[%s1978_s26 + $0x7c] sm:$0xf]  ;;  %v592_v2 = vld [vmem:[%s1985_s30 + $0x78] sm:$0xf]  ;;  %v2164_v17 = vld [vmem:[%s2278_s7] ss:$0 sm:$0xff] }
  0x3f   : > { %v593_v3 = vld [vmem:[%s1985_s30 + $0x7c] sm:$0xf]  ;;  %v624_v4 = vmax.bf16 %v592_v2, %v560_v60 }
  0x40   : > { %1844 = vmatmul.mubr.msk.bf16.gmra.mxu1 %vm1047_vm4, %v1877_v40  ;;  %v652_v40 = vmax.bf16 %v620_v36, %v524_v28  ;;  %v654_v62 = vmax.bf16 %v622_v53, %v526_v48  ;;  %v655_v63 = vmax.bf16 %v623_v54, %v527_v49  ;;  %v625_v5 = vmax.bf16 %v593_v3, %v561_v61 }
  0x41   : > { %1847 = vmatprep.mubr.msk.bf16.mxu1 %vm1047_vm4, %v1878_v6 }
  0x42   : > { %v1630_v58 = vcombine.low %v652_v40, %v653_v44  ;;  %v1631_v6 = vcombine.low %v654_v62, %v655_v63  ;;  %v657_v8 = vmax.bf16 %v625_v5, %v529_v1 }
  0x44   : > { %1808 = vmatmul.mubr.msk.bf16.gmra.mxu0 %vm739_vm5, %v1628_v27 }
  0x45   : > { %1811 = vmatprep.mubr.msk.bf16.mxu0 %vm739_vm5, %v1629_v39 }
  0x48   : > { %1848 = vmatmul.mubr.msk.bf16.gmra.mxu1 %vm1047_vm4, %v1879_v7  ;;  %v656_v7 = vmax.bf16 %v624_v4, %v528_v0 }
  0x49   : > { %1851 = vmatprep.mubr.msk.bf16.mxu1 %vm1047_vm4, %v1880_v38 }
  0x4a   : > { %v1632_v9 = vcombine.low %v656_v7, %v657_v8 }
  0x4c   : > { %1812 = vmatmul.mubr.msk.bf16.gmra.mxu0 %vm739_vm5, %v1630_v58 }
  0x4d   : > { %1815 = vmatprep.mubr.msk.bf16.mxu0 %vm739_vm5, %v1631_v6 }
  0x50   : > { %1852 = vmatmul.mubr.msk.bf16.gmra.mxu1 %vm1047_vm4, %v1881_v41 }
  0x54   : > { %1816 = vmatmul.mubr.msk.bf16.gmra.mxu0 %vm739_vm5, %v1632_v9 }
  0xd8   : > { %v1825_v10 = vpop.f32.mrf.mxu1 }
  0xda   : > { %v1137_v11 = vpop.f32.mrf.mxu1 }
  0xdc   : > { %v1826_v12 = vpop.f32.mrf.mxu1  ;;  %v1789_v16 = vpop.f32.mrf.mxu0 }
  0xdd   : > { %v1146_v18 = vadd.f32 %v1825_v10, %v1789_v16 }
  0xde   : > { %v1140_v13 = vpop.f32.mrf.mxu1  ;;  %v829_v20 = vpop.f32.mrf.mxu0 }
  0xdf   : > { %v1273_v21 = vadd.f32 %v2164_v17, %v1146_v18  ;;  %v1138_v22 = vadd.f32 %v1137_v11, %v829_v20 }
  0xe0   : > { %v1829_v14 = vpop.f32.mrf.mxu1  ;;  %v1790_v24 = vpop.f32.mrf.mxu0 }
  0xe1   : > { %v1305_v25 = vmax.f32 %v1273_v21, 0.0  ;;  %v1271_v26 = vadd.f32 %v2164_v17, %v1138_v22  ;;  %v1149_v27 = vadd.f32 %v1826_v12, %v1790_v24 }
  0xe2   : > { %v1153_v15 = vpop.f32.mrf.mxu1  ;;  %v832_v29 = vpop.f32.mrf.mxu0 }
  0xe3   : > { %v1720_v30 = vpack.c.bf16 %v1305_v25, %v1305_v25  ;;  %v1303_v31 = vmax.f32 %v1271_v26, 0.0  ;;  %v1274_v32 = vadd.f32 %v2164_v17, %v1149_v27  ;;  %v1141_v33 = vadd.f32 %v1140_v13, %v832_v29 }
  0xe4   : > { %v1830_v19 = vpop.f32.mrf.mxu1  ;;  %v1793_v35 = vpop.f32.mrf.mxu0 }
  0xe5   : > { %1466 = vst.msk [vmem:[%s2172_s13 + $0x8] sm:$0xf] %vm1463_vm6, %v1720_v30  ;;  %v1718_v36 = vpack.c.bf16 %v1303_v31, %v1303_v31  ;;  %v1306_v37 = vmax.f32 %v1274_v32, 0.0  ;;  %v1272_v38 = vadd.f32 %v2164_v17, %v1141_v33  ;;  %v1162_v39 = vadd.f32 %v1829_v14, %v1793_v35 }
  0xe6   : > { %v1156_v23 = vpop.f32.mrf.mxu1  ;;  %v845_v41 = vpop.f32.mrf.mxu0 }
  0xe7   : > { %1464 = vst.msk [vmem:[%s2172_s13] sm:$0xf] %vm1463_vm6, %v1718_v36  ;;  %v1721_v42 = vpack.c.bf16 %v1306_v37, %v1306_v37  ;;  %v1304_v43 = vmax.f32 %v1272_v38, 0.0  ;;  %v1277_v44 = vadd.f32 %v2164_v17, %v1162_v39  ;;  %v1154_v45 = vadd.f32 %v1153_v15, %v845_v41 }
  0xe8   : > { %v1833_v28 = vpop.f32.mrf.mxu1  ;;  %v1794_v47 = vpop.f32.mrf.mxu0 }
  0xe9   : > { %1467 = vst.msk [vmem:[%s2172_s13 + $0xc] sm:$0xf] %vm1463_vm6, %v1721_v42  ;;  %v1719_v48 = vpack.c.bf16 %v1304_v43, %v1304_v43  ;;  %v1309_v49 = vmax.f32 %v1277_v44, 0.0  ;;  %v1275_v50 = vadd.f32 %v2164_v17, %v1154_v45  ;;  %v1165_v51 = vadd.f32 %v1830_v19, %v1794_v47 }
  0xea   : > { %v1169_v34 = vpop.f32.mrf.mxu1  ;;  %v848_v53 = vpop.f32.mrf.mxu0 }
  0xeb   : > { %1465 = vst.msk [vmem:[%s2172_s13 + $0x4] sm:$0xf] %vm1463_vm6, %v1719_v48  ;;  %v1724_v54 = vpack.c.bf16 %v1309_v49, %v1309_v49  ;;  %v1307_v55 = vmax.f32 %v1275_v50, 0.0  ;;  %v1278_v56 = vadd.f32 %v2164_v17, %v1165_v51  ;;  %v1157_v57 = vadd.f32 %v1156_v23, %v848_v53 }
  0xec   : > { %v1834_v40 = vpop.f32.mrf.mxu1  ;;  %v1797_v59 = vpop.f32.mrf.mxu0 }
  0xed   : > { %1470 = vst.msk [vmem:[%s2172_s13 + $0x18] sm:$0xf] %vm1463_vm6, %v1724_v54  ;;  %v1722_v60 = vpack.c.bf16 %v1307_v55, %v1307_v55  ;;  %v1310_v61 = vmax.f32 %v1278_v56, 0.0  ;;  %v1276_v62 = vadd.f32 %v2164_v17, %v1157_v57  ;;  %v1178_v63 = vadd.f32 %v1833_v28, %v1797_v59 }
  0xee   : > { %v1172_v46 = vpop.f32.mrf.mxu1  ;;  %v861_v1 = vpop.f32.mrf.mxu0 }
  0xef   : > { %1468 = vst.msk [vmem:[%s2172_s13 + $0x10] sm:$0xf] %vm1463_vm6, %v1722_v60  ;;  %v1725_v2 = vpack.c.bf16 %v1310_v61, %v1310_v61  ;;  %v1308_v3 = vmax.f32 %v1276_v62, 0.0  ;;  %v1281_v4 = vadd.f32 %v2164_v17, %v1178_v63  ;;  %v1170_v5 = vadd.f32 %v1169_v34, %v861_v1 }
  0xf0   : > { %v1837_v52 = vpop.f32.mrf.mxu1  ;;  %v1798_v7 = vpop.f32.mrf.mxu0 }
  0xf1   : > { %1471 = vst.msk [vmem:[%s2172_s13 + $0x1c] sm:$0xf] %vm1463_vm6, %v1725_v2  ;;  %v1723_v8 = vpack.c.bf16 %v1308_v3, %v1308_v3  ;;  %v1313_v9 = vmax.f32 %v1281_v4, 0.0  ;;  %v1279_v10 = vadd.f32 %v2164_v17, %v1170_v5  ;;  %v1181_v11 = vadd.f32 %v1834_v40, %v1798_v7 }
  0xf2   : > { %v1185_v58 = vpop.f32.mrf.mxu1  ;;  %v864_v13 = vpop.f32.mrf.mxu0 }
  0xf3   : > { %1469 = vst.msk [vmem:[%s2172_s13 + $0x14] sm:$0xf] %vm1463_vm6, %v1723_v8  ;;  %v1728_v14 = vpack.c.bf16 %v1313_v9, %v1313_v9  ;;  %v1311_v15 = vmax.f32 %v1279_v10, 0.0  ;;  %v1282_v16 = vadd.f32 %v2164_v17, %v1181_v11  ;;  %v1173_v18 = vadd.f32 %v1172_v46, %v864_v13 }
  0xf4   : > { %v1838_v0 = vpop.f32.mrf.mxu1  ;;  %v1801_v20 = vpop.f32.mrf.mxu0 }
  0xf5   : > { %1474 = vst.msk [vmem:[%s2172_s13 + $0x28] sm:$0xf] %vm1463_vm6, %v1728_v14  ;;  %v1726_v21 = vpack.c.bf16 %v1311_v15, %v1311_v15  ;;  %v1314_v22 = vmax.f32 %v1282_v16, 0.0  ;;  %v1280_v23 = vadd.f32 %v2164_v17, %v1173_v18  ;;  %v1194_v24 = vadd.f32 %v1837_v52, %v1801_v20 }
  0xf6   : > { %v1188_v6 = vpop.f32.mrf.mxu1  ;;  %v877_v26 = vpop.f32.mrf.mxu0 }
  0xf7   : > { %1472 = vst.msk [vmem:[%s2172_s13 + $0x20] sm:$0xf] %vm1463_vm6, %v1726_v21  ;;  %v1729_v27 = vpack.c.bf16 %v1314_v22, %v1314_v22  ;;  %v1312_v28 = vmax.f32 %v1280_v23, 0.0  ;;  %v1285_v29 = vadd.f32 %v2164_v17, %v1194_v24  ;;  %v1186_v30 = vadd.f32 %v1185_v58, %v877_v26 }
  0xf8   : > { %v1841_v12 = vpop.f32.mrf.mxu1  ;;  %v1802_v32 = vpop.f32.mrf.mxu0 }
  0xf9   : > { %1475 = vst.msk [vmem:[%s2172_s13 + $0x2c] sm:$0xf] %vm1463_vm6, %v1729_v27  ;;  %v1727_v33 = vpack.c.bf16 %v1312_v28, %v1312_v28  ;;  %v1317_v34 = vmax.f32 %v1285_v29, 0.0  ;;  %v1283_v35 = vadd.f32 %v2164_v17, %v1186_v30  ;;  %v1197_v36 = vadd.f32 %v1838_v0, %v1802_v32 }
  0xfa   : > { %v1201_v19 = vpop.f32.mrf.mxu1  ;;  %v880_v38 = vpop.f32.mrf.mxu0 }
  0xfb   : > { %1473 = vst.msk [vmem:[%s2172_s13 + $0x24] sm:$0xf] %vm1463_vm6, %v1727_v33  ;;  %v1732_v39 = vpack.c.bf16 %v1317_v34, %v1317_v34  ;;  %v1315_v40 = vmax.f32 %v1283_v35, 0.0  ;;  %v1286_v41 = vadd.f32 %v2164_v17, %v1197_v36  ;;  %v1189_v42 = vadd.f32 %v1188_v6, %v880_v38 }
  0xfc   : > { %v1842_v25 = vpop.f32.mrf.mxu1  ;;  %v1805_v44 = vpop.f32.mrf.mxu0 }
  0xfd   : > { %1478 = vst.msk [vmem:[%s2172_s13 + $0x38] sm:$0xf] %vm1463_vm6, %v1732_v39  ;;  %v1730_v45 = vpack.c.bf16 %v1315_v40, %v1315_v40  ;;  %v1318_v46 = vmax.f32 %v1286_v41, 0.0  ;;  %v1284_v47 = vadd.f32 %v2164_v17, %v1189_v42  ;;  %v1210_v48 = vadd.f32 %v1841_v12, %v1805_v44 }
  0xfe   : > { %v1204_v31 = vpop.f32.mrf.mxu1  ;;  %v893_v50 = vpop.f32.mrf.mxu0 }
  0xff   : > { %1476 = vst.msk [vmem:[%s2172_s13 + $0x30] sm:$0xf] %vm1463_vm6, %v1730_v45  ;;  %v1733_v51 = vpack.c.bf16 %v1318_v46, %v1318_v46  ;;  %v1316_v52 = vmax.f32 %v1284_v47, 0.0  ;;  %v1289_v53 = vadd.f32 %v2164_v17, %v1210_v48  ;;  %v1202_v54 = vadd.f32 %v1201_v19, %v893_v50 }
 0x100   : > { %v1845_v37 = vpop.f32.mrf.mxu1  ;;  %v1806_v56 = vpop.f32.mrf.mxu0 }
 0x101   : > { %1479 = vst.msk [vmem:[%s2172_s13 + $0x3c] sm:$0xf] %vm1463_vm6, %v1733_v51  ;;  %v1731_v57 = vpack.c.bf16 %v1316_v52, %v1316_v52  ;;  %v1321_v58 = vmax.f32 %v1289_v53, 0.0  ;;  %v1287_v59 = vadd.f32 %v2164_v17, %v1202_v54  ;;  %v1213_v60 = vadd.f32 %v1842_v25, %v1806_v56 }
 0x102   : > { %v1217_v43 = vpop.f32.mrf.mxu1  ;;  %v896_v62 = vpop.f32.mrf.mxu0 }
 0x103   : > { %1477 = vst.msk [vmem:[%s2172_s13 + $0x34] sm:$0xf] %vm1463_vm6, %v1731_v57  ;;  %v1736_v63 = vpack.c.bf16 %v1321_v58, %v1321_v58  ;;  %v1319_v0 = vmax.f32 %v1287_v59, 0.0  ;;  %v1290_v1 = vadd.f32 %v2164_v17, %v1213_v60  ;;  %v1205_v2 = vadd.f32 %v1204_v31, %v896_v62 }
 0x104   : > { %v1846_v49 = vpop.f32.mrf.mxu1  ;;  %v1809_v4 = vpop.f32.mrf.mxu0 }
 0x105   : > { %1482 = vst.msk [vmem:[%s2172_s13 + $0x48] sm:$0xf] %vm1463_vm6, %v1736_v63  ;;  %v1734_v5 = vpack.c.bf16 %v1319_v0, %v1319_v0  ;;  %v1322_v6 = vmax.f32 %v1290_v1, 0.0  ;;  %v1288_v7 = vadd.f32 %v2164_v17, %v1205_v2  ;;  %v1226_v8 = vadd.f32 %v1845_v37, %v1809_v4 }
 0x106   : > { %v1220_v55 = vpop.f32.mrf.mxu1  ;;  %v909_v9 = vpop.f32.mrf.mxu0 }
 0x107   : > { %1480 = vst.msk [vmem:[%s2172_s13 + $0x40] sm:$0xf] %vm1463_vm6, %v1734_v5  ;;  %v1737_v11 = vpack.c.bf16 %v1322_v6, %v1322_v6  ;;  %v1320_v12 = vmax.f32 %v1288_v7, 0.0  ;;  %v1293_v13 = vadd.f32 %v2164_v17, %v1226_v8  ;;  %v1218_v14 = vadd.f32 %v1217_v43, %v909_v9 }
 0x108   : > { %v1849_v61 = vpop.f32.mrf.mxu1  ;;  %v1810_v15 = vpop.f32.mrf.mxu0 }
 0x109   : > { %1483 = vst.msk [vmem:[%s2172_s13 + $0x4c] sm:$0xf] %vm1463_vm6, %v1737_v11  ;;  %v1735_v16 = vpack.c.bf16 %v1320_v12, %v1320_v12  ;;  %v1325_v18 = vmax.f32 %v1293_v13, 0.0  ;;  %v1291_v19 = vadd.f32 %v2164_v17, %v1218_v14  ;;  %v1229_v20 = vadd.f32 %v1846_v49, %v1810_v15 }
 0x10a   : > { %v1233_v3 = vpop.f32.mrf.mxu1  ;;  %v912_v21 = vpop.f32.mrf.mxu0 }
 0x10b   : > { %1481 = vst.msk [vmem:[%s2172_s13 + $0x44] sm:$0xf] %vm1463_vm6, %v1735_v16  ;;  %v1740_v23 = vpack.c.bf16 %v1325_v18, %v1325_v18  ;;  %v1323_v24 = vmax.f32 %v1291_v19, 0.0  ;;  %v1294_v25 = vadd.f32 %v2164_v17, %v1229_v20  ;;  %v1221_v26 = vadd.f32 %v1220_v55, %v912_v21 }
 0x10c   : > { %v1850_v10 = vpop.f32.mrf.mxu1  ;;  %v1813_v27 = vpop.f32.mrf.mxu0 }
 0x10d   : > { %1486 = vst.msk [vmem:[%s2172_s13 + $0x58] sm:$0xf] %vm1463_vm6, %v1740_v23  ;;  %v1738_v28 = vpack.c.bf16 %v1323_v24, %v1323_v24  ;;  %v1326_v29 = vmax.f32 %v1294_v25, 0.0  ;;  %v1292_v30 = vadd.f32 %v2164_v17, %v1221_v26  ;;  %v1242_v31 = vadd.f32 %v1849_v61, %v1813_v27 }
 0x10e   : > { %v1236_v22 = vpop.f32.mrf.mxu1  ;;  %v925_v32 = vpop.f32.mrf.mxu0 }
 0x10f   : > { %1484 = vst.msk [vmem:[%s2172_s13 + $0x50] sm:$0xf] %vm1463_vm6, %v1738_v28  ;;  %v1741_v34 = vpack.c.bf16 %v1326_v29, %v1326_v29  ;;  %v1324_v35 = vmax.f32 %v1292_v30, 0.0  ;;  %v1297_v36 = vadd.f32 %v2164_v17, %v1242_v31  ;;  %v1234_v37 = vadd.f32 %v1233_v3, %v925_v32 }
 0x110   : > { %v1853_v33 = vpop.f32.mrf.mxu1  ;;  %v1814_v38 = vpop.f32.mrf.mxu0 }
 0x111   : > { %1487 = vst.msk [vmem:[%s2172_s13 + $0x5c] sm:$0xf] %vm1463_vm6, %v1741_v34  ;;  %v1739_v39 = vpack.c.bf16 %v1324_v35, %v1324_v35  ;;  %v1329_v40 = vmax.f32 %v1297_v36, 0.0  ;;  %v1295_v41 = vadd.f32 %v2164_v17, %v1234_v37  ;;  %v1245_v42 = vadd.f32 %v1850_v10, %v1814_v38 }
 0x112   : > { %v928_v43 = vpop.f32.mrf.mxu0  ;;  %v1249_v44 = vpop.f32.mrf.mxu1 }
 0x113   : > { %1485 = vst.msk [vmem:[%s2172_s13 + $0x54] sm:$0xf] %vm1463_vm6, %v1739_v39  ;;  %v1744_v45 = vpack.c.bf16 %v1329_v40, %v1329_v40  ;;  %v1327_v46 = vmax.f32 %v1295_v41, 0.0  ;;  %v1298_v47 = vadd.f32 %v2164_v17, %v1245_v42  ;;  %v1237_v48 = vadd.f32 %v1236_v22, %v928_v43 }
 0x114   : > { %v1817_v49 = vpop.f32.mrf.mxu0  ;;  %v1854_v55 = vpop.f32.mrf.mxu1 }
 0x115   : > { %1490 = vst.msk [vmem:[%s2172_s13 + $0x68] sm:$0xf] %vm1463_vm6, %v1744_v45  ;;  %v1742_v50 = vpack.c.bf16 %v1327_v46, %v1327_v46  ;;  %v1330_v51 = vmax.f32 %v1298_v47, 0.0  ;;  %v1296_v52 = vadd.f32 %v2164_v17, %v1237_v48  ;;  %v1258_v53 = vadd.f32 %v1853_v33, %v1817_v49 }
 0x116   : > { %v941_v54 = vpop.f32.mrf.mxu0  ;;  %v1252_v1 = vpop.f32.mrf.mxu1 }
 0x117   : > { %1488 = vst.msk [vmem:[%s2172_s13 + $0x60] sm:$0xf] %vm1463_vm6, %v1742_v50  ;;  %v1745_v56 = vpack.c.bf16 %v1330_v51, %v1330_v51  ;;  %v1328_v57 = vmax.f32 %v1296_v52, 0.0  ;;  %v1301_v58 = vadd.f32 %v2164_v17, %v1258_v53  ;;  %v1250_v59 = vadd.f32 %v1249_v44, %v941_v54 }
 0x118   : > { %v1818_v60 = vpop.f32.mrf.mxu0 }
 0x119   : > { %1491 = vst.msk [vmem:[%s2172_s13 + $0x6c] sm:$0xf] %vm1463_vm6, %v1745_v56  ;;  %v1743_v61 = vpack.c.bf16 %v1328_v57, %v1328_v57  ;;  %v1333_v62 = vmax.f32 %v1301_v58, 0.0  ;;  %v1299_v63 = vadd.f32 %v2164_v17, %v1250_v59  ;;  %v1261_v0 = vadd.f32 %v1854_v55, %v1818_v60 }
 0x11a   : > { %v944_v2 = vpop.f32.mrf.mxu0 }
 0x11b   : > { %1489 = vst.msk [vmem:[%s2172_s13 + $0x64] sm:$0xf] %vm1463_vm6, %v1743_v61  ;;  %v1748_v3 = vpack.c.bf16 %v1333_v62, %v1333_v62  ;;  %v1331_v4 = vmax.f32 %v1299_v63, 0.0  ;;  %v1302_v5 = vadd.f32 %v2164_v17, %v1261_v0  ;;  %v1253_v6 = vadd.f32 %v1252_v1, %v944_v2 }
 0x11d   : > { %1494 = vst.msk [vmem:[%s2172_s13 + $0x78] sm:$0xf] %vm1463_vm6, %v1748_v3  ;;  %v1746_v7 = vpack.c.bf16 %v1331_v4, %v1331_v4  ;;  %v1334_v8 = vmax.f32 %v1302_v5, 0.0  ;;  %v1300_v9 = vadd.f32 %v2164_v17, %v1253_v6 }
 0x11f   : > { %1492 = vst.msk [vmem:[%s2172_s13 + $0x70] sm:$0xf] %vm1463_vm6, %v1746_v7  ;;  %v1749_v10 = vpack.c.bf16 %v1334_v8, %v1334_v8  ;;  %v1332_v11 = vmax.f32 %v1300_v9, 0.0 }
 0x121   : > { %1495 = vst.msk [vmem:[%s2172_s13 + $0x7c] sm:$0xf] %vm1463_vm6, %v1749_v10  ;;  %v1747_v12 = vpack.c.bf16 %v1332_v11, %v1332_v11 }
 0x123   : > { %1493 = vst.msk [vmem:[%s2172_s13 + $0x74] sm:$0xf] %vm1463_vm6, %v1747_v12 }
 0x124 PF: > { %s18_s27 = sadd.s32 1, %s1888_s27  }
 0x125   : > { %p15_p4 = scmp.ge.s32.totalorder %s18_s27, 4  }
 0x127   :  { %17 = sbr.rel (!%p15_p4) target bundleno = 1 (0x1), region = 94 }

// kernel: erfnet_forward.75
= control target key start
LH: loop header
LB: loop body
LE: loop exit
PB: predicated region body
PF: predicated region fallthrough
CT: control target
= control target key end

     0   :  { %s1110_s27 = smov 0   ;;  %s1301_s0 = inlined_call_operand.vmem [shape: bf16[128,144], index: 0, kind: input, shape index: {}]   ;;  %s1302_s1 = inlined_call_operand.vmem [shape: bf16[144,64], index: 1, kind: input, shape index: {}]   ;;  %s1303_s2 = inlined_call_operand.vmem [shape: bf16[128,16], index: 2, kind: input, shape index: {}]   ;;  %s1304_s3 = inlined_call_operand.vmem [shape: bf16[128,16], index: 3, kind: input, shape index: {}]   ;;  %s1305_s4 = inlined_call_operand.vmem [shape: bf16[128,16], index: 4, kind: input, shape index: {}]   ;;  %s1306_s5 = inlined_call_operand.vmem [shape: bf16[128,16], index: 5, kind: input, shape index: {}]   ;;  %s1307_s6 = inlined_call_operand.vmem [shape: bf16[16,64], index: 6, kind: input, shape index: {}]   ;;  %s1308_s7 = inlined_call_operand.vmem [shape: f32[1,64], index: 7, kind: input, shape index: {}]   ;;  %s1309_s8 = inlined_call_operand.vmem [shape: bf16[128,64], index: 8, kind: output, shape index: {}]  }
   0x1 LB: > { %s924_s28 = sadd.s32 4294967295, %s1062_s27   ;;  %p928_p0 = scmp.ge.s32.totalorder %s1062_s27, 1  ;;  %s1062_s27 = sphi %s1110_s27, %s18_s27  }
   0x2   : > { %p308_p1 = scmp.lt.s32.totalorder %s1062_s27, 3 }
   0x4   : > { %p309_p2 = pnand %p928_p0, %p308_p1 }
   0x5   : > { %s929_s11 = sshll.u32 (!%p309_p2), %s924_s28, 3 }
   0x6   : > { %312 = sbr.rel (%p309_p2) target bundleno = 270 (0x10e), region = 52  ;;  %p364_p3 = scmp.lt.s32.totalorder (!%p309_p2), %s929_s11, 15 }
   0xb   : > { %v1121_v0 = vld [vmem:[%s1302_s1 + $0x38] sm:$0xff]   ;;  %v1064_v1 = vmov 0   ;;  %v1127_v2 = vld [vmem:[%s1302_s1 + $0x30] sm:$0xff]   ;;  %v1036_v3 = vld [vmem:[%s1307_s6] sm:$0xff]   ;;  %s1311_s11 = smov (!%p364_p3, %s929_s11), 15  ;;  %vm511_vm0 = vcmask 130048  }
   0xc   : > { %1007 = vmatprep.subr.bf16.mxu1 %v1064_v1  ;;  %997 = vmatprep.subr.bf16.mxu0 %v1036_v3  ;;  %v1140_v4 = vld [vmem:[%s1302_s1 + $0x28] sm:$0xff]   ;;  %s1143_s16 = sshll.u32 %s1311_s11, 2  ;;  %v1177_v8 = vld [vmem:[%s1302_s1 + $0x20] sm:$0xff]   ;;  %v1198_v32 = vld [vmem:[%s1302_s1 + $0x18] sm:$0xff]   ;;  %s983_s13 = sshll.u32 %s1311_s11, 3  ;;  %vm811_vm1 = vcmask 519168  }
   0xd   : > { %1016 = vmatpush1.bf16.msra.mxu1 %v1121_v0  ;;  %998 = vmatpush3.bf16.msra.mxu0 %v1036_v3  ;;  %s1151_s19 = scalar_lea.vmem %s1303_s2, %s1143_s16  ;;  %s1157_s22 = scalar_lea.vmem %s1304_s3, %s1143_s16  ;;  %v1212_v38 = vld [vmem:[%s1302_s1 + $0x10] sm:$0xff]   ;;  %v1041_v62 = vld [vmem:[%s1302_s1 + $0x8] sm:$0xff]  }
   0xe   : > { %1008 = vmatprep.subr.bf16.mxu1 %v1064_v1  ;;  %691 = vmatprep.subr.bf16.mxu0 %v1064_v1  ;;  %s1163_s25 = scalar_lea.vmem %s1305_s4, %s1143_s16  ;;  %s1169_s29 = scalar_lea.vmem %s1306_s5, %s1143_s16  ;;  %v427_v5 = vld [vmem:[%s1151_s19] sm:$0xf]  ;;  %v428_v6 = vld [vmem:[%s1151_s19 + $0x4] sm:$0xf]  ;;  %v429_v16 = vld [vmem:[%s1151_s19 + $0x8] sm:$0xf] }
   0xf   : > { %v435_v7 = vld [vmem:[%s1157_s22] sm:$0xf]  ;;  %v436_v9 = vld [vmem:[%s1157_s22 + $0x4] sm:$0xf]  ;;  %v430_v19 = vld [vmem:[%s1151_s19 + $0xc] sm:$0xf]  ;;  %s1205_s17 = scalar_lea.vmem %s1301_s0, %s983_s13  ;;  %s1280_s30 = scalar_lea.vmem %s1309_s8, %s1143_s16 }
  0x10   : > { %v443_v10 = vmax.bf16 %v435_v7, %v427_v5  ;;  %v451_v11 = vld [vmem:[%s1163_s25] sm:$0xf]  ;;  %v452_v12 = vld [vmem:[%s1163_s25 + $0x4] sm:$0xf]  ;;  %v444_v13 = vmax.bf16 %v436_v9, %v428_v6  ;;  %v437_v20 = vld [vmem:[%s1157_s22 + $0x8] sm:$0xf] }
  0x11   : > { %1017 = vmatpush1.bf16.msra.mxu1 %v1127_v2  ;;  %v459_v14 = vld [vmem:[%s1169_s29] sm:$0xf]  ;;  %v460_v15 = vld [vmem:[%s1169_s29 + $0x4] sm:$0xf]  ;;  %v438_v21 = vld [vmem:[%s1157_s22 + $0xc] sm:$0xf]  ;;  %v445_v22 = vmax.bf16 %v437_v20, %v429_v16 }
  0x12   : > { %1009 = vmatprep.subr.bf16.mxu1 %v1064_v1  ;;  %v467_v17 = vmax.bf16 %v459_v14, %v451_v11  ;;  %v468_v18 = vmax.bf16 %v460_v15, %v452_v12  ;;  %v446_v23 = vmax.bf16 %v438_v21, %v430_v19  ;;  %v453_v24 = vld [vmem:[%s1163_s25 + $0x8] sm:$0xf]  ;;  %v454_v25 = vld [vmem:[%s1163_s25 + $0xc] sm:$0xf]  ;;  %v431_v35 = vld [vmem:[%s1151_s19 + $0x10] sm:$0xf] }
  0x13   : > { %v461_v26 = vld [vmem:[%s1169_s29 + $0x8] sm:$0xf]  ;;  %v462_v29 = vld [vmem:[%s1169_s29 + $0xc] sm:$0xf]  ;;  %v432_v36 = vld [vmem:[%s1151_s19 + $0x14] sm:$0xf] }
  0x14   : > { %v475_v27 = vmax.bf16 %v467_v17, %v443_v10  ;;  %v476_v28 = vmax.bf16 %v468_v18, %v444_v13  ;;  %v469_v30 = vmax.bf16 %v461_v26, %v453_v24  ;;  %v470_v31 = vmax.bf16 %v462_v29, %v454_v25  ;;  %v1046_v39 = vld [vmem:[%s1205_s17 + $0x14] ss:$8 sps:$4 sm:$0xff]   ;;  %v439_v40 = vld [vmem:[%s1157_s22 + $0x10] sm:$0xf]  ;;  %v433_v50 = vld [vmem:[%s1151_s19 + $0x18] sm:$0xf] }
  0x15   : > { %1018 = vmatpush1.bf16.msra.mxu1 %v1140_v4  ;;  %v440_v41 = vld [vmem:[%s1157_s22 + $0x14] sm:$0xf]  ;;  %v447_v43 = vmax.bf16 %v439_v40, %v431_v35  ;;  %v455_v45 = vld [vmem:[%s1163_s25 + $0x10] sm:$0xf]  ;;  %969 = vmatprep.mubr.msk.bf16.mxu1 %vm511_vm0, %v1046_v39  ;;  %v434_v51 = vld [vmem:[%s1151_s19 + $0x1c] sm:$0xf] }
  0x16   : > { %1010 = vmatprep.subr.bf16.mxu1 %v1064_v1  ;;  %v942_v33 = vcombine.low %v475_v27, %v476_v28  ;;  %v477_v34 = vmax.bf16 %v469_v30, %v445_v22  ;;  %v478_v37 = vmax.bf16 %v470_v31, %v446_v23  ;;  %v448_v44 = vmax.bf16 %v440_v41, %v432_v36  ;;  %v456_v46 = vld [vmem:[%s1163_s25 + $0x14] sm:$0xf]  ;;  %v463_v47 = vld [vmem:[%s1169_s29 + $0x10] sm:$0xf]  ;;  %v441_v53 = vld [vmem:[%s1157_s22 + $0x18] sm:$0xf] }
  0x17   : > { %v464_v48 = vld [vmem:[%s1169_s29 + $0x14] sm:$0xf]  ;;  %v471_v49 = vmax.bf16 %v463_v47, %v455_v45  ;;  %v442_v54 = vld [vmem:[%s1157_s22 + $0x1c] sm:$0xf]  ;;  %v457_v55 = vld [vmem:[%s1163_s25 + $0x18] sm:$0xf]  ;;  %v449_v57 = vmax.bf16 %v441_v53, %v433_v50 }
  0x18   : > { %999 = vmatprep.mubr.msk.bf16.mxu0 %vm511_vm0, %v942_v33  ;;  %v943_v42 = vcombine.low %v477_v34, %v478_v37  ;;  %v472_v52 = vmax.bf16 %v464_v48, %v456_v46  ;;  %v450_v58 = vmax.bf16 %v442_v54, %v434_v51  ;;  %v458_v59 = vld [vmem:[%s1163_s25 + $0x1c] sm:$0xf]  ;;  %v465_v60 = vld [vmem:[%s1169_s29 + $0x18] sm:$0xf]  ;;  %v1052_v9 = vld [vmem:[%s1205_s17 + $0x4] ss:$8 sps:$4 sm:$0xff]  }
  0x19   : > { %1019 = vmatpush1.bf16.msra.mxu1 %v1177_v8  ;;  %v479_v56 = vmax.bf16 %v471_v49, %v447_v43  ;;  %v466_v61 = vld [vmem:[%s1169_s29 + $0x1c] sm:$0xf]  ;;  %v473_v3 = vmax.bf16 %v465_v60, %v457_v55  ;;  %v1042_v10 = vld [vmem:[%s1302_s1] sm:$0xff]   ;;  %v1044_v12 = vld [vmem:[%s1205_s17 + $0x10] ss:$8 sps:$4 sm:$0xff]  }
  0x1a   : > { %1011 = vmatprep.subr.bf16.mxu1 %v1064_v1  ;;  %1000 = vmatmul.mubr.msk.bf16.vlgmr.msra.gmra.mxu0 %vm511_vm0, %v943_v42  ;;  %v480_v63 = vmax.bf16 %v472_v52, %v448_v44  ;;  %v474_v5 = vmax.bf16 %v466_v61, %v458_v59  ;;  %v1049_v13 = vld [vmem:[%s1205_s17 + $0x20] ss:$8 sps:$4 sm:$0xff]   ;;  %v1055_v14 = vld [vmem:[%s1205_s17 + $0x30] ss:$8 sps:$4 sm:$0xff]  }
  0x1b   : > { %692 = vmatpush1.bf16.msra.mxu0 %v1121_v0  ;;  %v481_v6 = vmax.bf16 %v473_v3, %v449_v57  ;;  %v1050_v15 = vld [vmem:[%s1205_s17] ss:$8 sps:$4 sm:$0xff]  }
  0x1c   : > { %693 = vmatprep.subr.bf16.mxu0 %v1064_v1  ;;  %v944_v0 = vcombine.low %v479_v56, %v480_v63  ;;  %v482_v7 = vmax.bf16 %v474_v5, %v450_v58  ;;  %v972_v21 = vld [vmem:[%s1308_s7] ss:$0 sm:$0xff] }
  0x1d   : > { %1020 = vmatpush1.bf16.msra.mxu1 %v1198_v32 }
  0x1e   : > { %1012 = vmatprep.subr.bf16.mxu1 %v1064_v1  ;;  %v945_v11 = vcombine.low %v481_v6, %v482_v7  ;;  %1003 = vmatprep.mubr.msk.bf16.mxu0 %vm511_vm0, %v944_v0 }
  0x1f   : > { %694 = vmatpush1.bf16.msra.mxu0 %v1127_v2  ;;  %v1043_v2 = vld [vmem:[%s1302_s1 + $0x40] sm:$0xff]  }
  0x20   : > { %695 = vmatprep.subr.bf16.mxu0 %v1064_v1 }
  0x21   : > { %1021 = vmatpush1.bf16.msra.mxu1 %v1212_v38 }
  0x22   : > { %1013 = vmatprep.subr.bf16.mxu1 %v1064_v1  ;;  %1004 = vmatmul.mubr.msk.bf16.gmra.mxu0 %vm511_vm0, %v945_v11 }
  0x23   : > { %696 = vmatpush1.bf16.msra.mxu0 %v1140_v4  ;;  %968 = vmatprep.mubr.msk.bf16.mxu0 %vm511_vm0, %v1052_v9  ;;  %v1047_v4 = vld [vmem:[%s1205_s17 + $0x24] ss:$8 sps:$4 sm:$0xff]  }
  0x24   : > { %697 = vmatprep.subr.bf16.mxu0 %v1064_v1 }
  0x25   : > { %1022 = vmatpush1.bf16.msra.mxu1 %v1041_v62 }
  0x26   : > { %1014 = vmatprep.subr.bf16.mxu1 %v1064_v1 }
  0x27   : > { %698 = vmatpush1.bf16.msra.mxu0 %v1177_v8  ;;  %v1053_v8 = vld [vmem:[%s1205_s17 + $0x34] ss:$8 sps:$4 sm:$0xff]  }
  0x28   : > { %699 = vmatprep.subr.bf16.mxu0 %v1064_v1 }
  0x29   : > { %1023 = vmatpush1.bf16.msra.mxu1 %v1042_v10 }
  0x2a   : > { %1015 = vmatprep.subr.bf16.mxu1 %v1064_v1 }
  0x2b   : > { %700 = vmatpush1.bf16.msra.mxu0 %v1198_v32 }
  0x2c   : > { %701 = vmatprep.subr.bf16.mxu0 %v1064_v1 }
  0x2d   : > { %1024 = vmatpush2.bf16.msra.mxu1 %v1043_v2 }
  0x2f   : > { %702 = vmatpush1.bf16.msra.mxu0 %v1212_v38 }
  0x30   : > { %732 = vmatmul.mubr.bf16.vlgmr.msra.gmra.mxu1 %v1044_v12  ;;  %703 = vmatprep.subr.bf16.mxu0 %v1064_v1 }
  0x31   : > { %970 = vmatprep.mubr.msk.bf16.mxu1 %vm511_vm0, %v1047_v4 }
  0x33   : > { %704 = vmatpush1.bf16.msra.mxu0 %v1041_v62 }
  0x34   : > { %705 = vmatprep.subr.bf16.mxu0 %v1064_v1 }
  0x37   : > { %706 = vmatpush1.bf16.msra.mxu0 %v1042_v10 }
  0x38   : > { %740 = vmatmul.mubr.bf16.gmra.mxu1 %v1049_v13  ;;  %721 = vmatprep.subr.bf16.mxu0 %v1064_v1 }
  0x39   : > { %971 = vmatprep.mubr.msk.bf16.mxu1 %vm511_vm0, %v1053_v8 }
  0x3b   : > { %722 = vmatpush2.bf16.msra.mxu0 %v1043_v2 }
  0x3e   : > { %724 = vmatmul.mubr.bf16.vlgmr.msra.gmra.mxu0 %v1050_v15 }
  0x40   : > { %748 = vmatmul.mubr.bf16.gmra.mxu1 %v1055_v14 }
  0xda   : > { %v1001_v16 = vpop.f32.mrf.mxu0 }
  0xdc   : > { %v558_v17 = vpop.f32.mrf.mxu0 }
  0xde   : > { %v1002_v18 = vpop.f32.mrf.mxu0 }
  0xe0   : > { %v561_v19 = vpop.f32.mrf.mxu0 }
  0xe2   : > { %v1005_v22 = vpop.f32.mrf.mxu0 }
  0xe4   : > { %v574_v26 = vpop.f32.mrf.mxu0 }
  0xe6   : > { %v1006_v32 = vpop.f32.mrf.mxu0 }
  0xe8   : > { %v577_v39 = vpop.f32.mrf.mxu0 }
  0xf0   : > { %v733_v20 = vpop.f32.mrf.mxu1 }
  0xf1   : > { %v734_v23 = vadd.f32 %v1001_v16, %v733_v20 }
  0xf2   : > { %v735_v24 = vpop.f32.mrf.mxu1 }
  0xf3   : > { %v765_v25 = vadd.f32 %v972_v21, %v734_v23 }
  0xf4   : > { %v736_v1 = vpop.f32.mrf.mxu1 }
  0xf5   : > { %v773_v27 = vmax.f32 %v765_v25, 0.0  ;;  %v737_v28 = vadd.f32 %v1002_v18, %v736_v1 }
  0xf6   : > { %v738_v29 = vpop.f32.mrf.mxu1 }
  0xf7   : > { %v986_v30 = vpack.c.bf16 %v773_v27, %v773_v27  ;;  %v766_v31 = vadd.f32 %v972_v21, %v737_v28 }
  0xf8   : > { %v741_v33 = vpop.f32.mrf.mxu1 }
  0xf9   : > { %814 = vst.msk [vmem:[%s1280_s30 + $0x8] sm:$0xf] %vm811_vm1, %v986_v30  ;;  %v774_v34 = vmax.f32 %v766_v31, 0.0  ;;  %v742_v35 = vadd.f32 %v741_v33, %v574_v26 }
  0xfa   : > { %v743_v36 = vpop.f32.mrf.mxu1 }
  0xfb   : > { %v987_v37 = vpack.c.bf16 %v774_v34, %v774_v34  ;;  %v767_v38 = vadd.f32 %v972_v21, %v742_v35 }
  0xfc   : > { %v744_v40 = vpop.f32.mrf.mxu1 }
  0xfd   : > { %815 = vst.msk [vmem:[%s1280_s30 + $0xc] sm:$0xf] %vm811_vm1, %v987_v37  ;;  %v775_v41 = vmax.f32 %v767_v38, 0.0  ;;  %v745_v42 = vadd.f32 %v744_v40, %v577_v39 }
  0xfe   : > { %v746_v43 = vpop.f32.mrf.mxu1  ;;  %v725_v50 = vpop.f32.mrf.mxu0 }
  0xff   : > { %v988_v44 = vpack.c.bf16 %v775_v41, %v775_v41  ;;  %v768_v45 = vadd.f32 %v972_v21, %v745_v42  ;;  %v726_v53 = vadd.f32 %v725_v50, %v558_v17 }
 0x100   : > { %v749_v46 = vpop.f32.mrf.mxu1  ;;  %v727_v55 = vpop.f32.mrf.mxu0 }
 0x101   : > { %816 = vst.msk [vmem:[%s1280_s30 + $0x10] sm:$0xf] %vm811_vm1, %v988_v44  ;;  %v776_v47 = vmax.f32 %v768_v45, 0.0  ;;  %v750_v48 = vadd.f32 %v1005_v22, %v749_v46  ;;  %v763_v58 = vadd.f32 %v972_v21, %v726_v53 }
 0x102   : > { %v751_v49 = vpop.f32.mrf.mxu1  ;;  %v728_v60 = vpop.f32.mrf.mxu0 }
 0x103   : > { %v989_v51 = vpack.c.bf16 %v776_v47, %v776_v47  ;;  %v769_v52 = vadd.f32 %v972_v21, %v750_v48  ;;  %v771_v63 = vmax.f32 %v763_v58, 0.0  ;;  %v729_v3 = vadd.f32 %v728_v60, %v561_v19 }
 0x104   : > { %v752_v54 = vpop.f32.mrf.mxu1  ;;  %v730_v5 = vpop.f32.mrf.mxu0 }
 0x105   : > { %817 = vst.msk [vmem:[%s1280_s30 + $0x14] sm:$0xf] %vm811_vm1, %v989_v51  ;;  %v777_v56 = vmax.f32 %v769_v52, 0.0  ;;  %v753_v57 = vadd.f32 %v1006_v32, %v752_v54  ;;  %v984_v6 = vpack.c.bf16 %v771_v63, %v771_v63  ;;  %v764_v7 = vadd.f32 %v972_v21, %v729_v3 }
 0x106   : > { %v754_v59 = vpop.f32.mrf.mxu1 }
 0x107   : > { %v990_v61 = vpack.c.bf16 %v777_v56, %v777_v56  ;;  %v770_v62 = vadd.f32 %v972_v21, %v753_v57  ;;  %812 = vst.msk [vmem:[%s1280_s30] sm:$0xf] %vm811_vm1, %v984_v6  ;;  %v772_v10 = vmax.f32 %v764_v7, 0.0 }
 0x109   : > { %818 = vst.msk [vmem:[%s1280_s30 + $0x18] sm:$0xf] %vm811_vm1, %v990_v61  ;;  %v778_v0 = vmax.f32 %v770_v62, 0.0  ;;  %v985_v11 = vpack.c.bf16 %v772_v10, %v772_v10 }
 0x10b   : > { %v991_v9 = vpack.c.bf16 %v778_v0, %v778_v0  ;;  %813 = vst.msk [vmem:[%s1280_s30 + $0x4] sm:$0xf] %vm811_vm1, %v985_v11 }
 0x10d   : > { %819 = vst.msk [vmem:[%s1280_s30 + $0x1c] sm:$0xf] %vm811_vm1, %v991_v9 }
 0x10e PF: > { %s18_s27 = sadd.s32 1, %s1062_s27  }
 0x10f   : > { %p15_p4 = scmp.ge.s32.totalorder %s18_s27, 4  }
 0x111   :  { %17 = sbr.rel (!%p15_p4) target bundleno = 1 (0x1), region = 94 }

// kernel: erfnet_forward.79
= control target key start
LH: loop header
LB: loop body
LE: loop exit
PB: predicated region body
PF: predicated region fallthrough
CT: control target
= control target key end

     0   :  { %s759_s15 = smov 0   ;;  %s878_s0 = inlined_call_operand.vmem [shape: bf16[128,192], index: 0, kind: input, shape index: {}]   ;;  %s879_s1 = inlined_call_operand.vmem [shape: bf16[192,64], index: 1, kind: input, shape index: {}]   ;;  %s880_s2 = inlined_call_operand.vmem [shape: f32[1,64], index: 2, kind: input, shape index: {}]   ;;  %s881_s3 = inlined_call_operand.vmem [shape: bf16[128,64], index: 3, kind: input, shape index: {}]   ;;  %s882_s4 = inlined_call_operand.vmem [shape: bf16[128,64], index: 4, kind: output, shape index: {}]  }
   0x1 LB: > { %s593_s16 = sadd.s32 4294967295, %s731_s15   ;;  %p597_p0 = scmp.ge.s32.totalorder %s731_s15, 1  ;;  %s731_s15 = sphi %s759_s15, %s14_s15  }
   0x2   : > { %p175_p1 = scmp.lt.s32.totalorder %s731_s15, 3 }
   0x4   : > { %p176_p2 = pnand %p597_p0, %p175_p1 }
   0x5   : > { %s598_s19 = sshll.u32 (!%p176_p2), %s593_s16, 3 }
   0x6   : > { %179 = sbr.rel (%p176_p2) target bundleno = 274 (0x112), region = 36  ;;  %p208_p3 = scmp.lt.s32.totalorder (!%p176_p2), %s598_s19, 15 }
   0xb   : > { %v701_v0 = vld [vmem:[%s879_s1 + $0x38] sm:$0xff]   ;;  %v733_v1 = vmov 0   ;;  %v702_v2 = vld [vmem:[%s879_s1 + $0x30] sm:$0xff]   ;;  %s884_s19 = smov (!%p208_p3, %s598_s19), 15  ;;  %v703_v3 = vld [vmem:[%s879_s1 + $0x28] sm:$0xff]   ;;  %vm374_vm0 = vcmask 523264  }
   0xc   : > { %387 = vmatprep.subr.bf16.mxu0 %v733_v1  ;;  %668 = vmatprep.subr.bf16.mxu1 %v733_v1  ;;  %s640_s24 = sshll.u32 %s884_s19, 3  ;;  %v704_v4 = vld [vmem:[%s879_s1 + $0x20] sm:$0xff]   ;;  %v705_v6 = vld [vmem:[%s879_s1 + $0x18] sm:$0xff]   ;;  %v706_v8 = vld [vmem:[%s879_s1 + $0x10] sm:$0xff]   ;;  %s602_s22 = sshll.u32 %s884_s19, 2  ;;  %vm516_vm1 = vcmask 519168  }
   0xd   : > { %388 = vmatpush1.bf16.msra.mxu0 %v701_v0  ;;  %680 = vmatpush1.bf16.msra.mxu1 %v701_v0  ;;  %s791_s29 = scalar_lea.vmem %s878_s0, %s640_s24  ;;  %v707_v9 = vld [vmem:[%s879_s1 + $0x8] sm:$0xff]   ;;  %v708_v10 = vld [vmem:[%s879_s1] sm:$0xff]   ;;  %v709_v11 = vld [vmem:[%s879_s1 + $0x58] sm:$0xff]   ;;  %s218_s25 = scalar_lea.vmem %s881_s3, %s602_s22 }
   0xe   : > { %389 = vmatprep.subr.bf16.mxu0 %v733_v1  ;;  %669 = vmatprep.subr.bf16.mxu1 %v733_v1  ;;  %v715_v5 = vld [vmem:[%s791_s29 + $0x4] ss:$8 sps:$4 sm:$0xff]   ;;  %v710_v12 = vld [vmem:[%s879_s1 + $0x50] sm:$0xff]   ;;  %v713_v15 = vld [vmem:[%s791_s29] ss:$8 sps:$4 sm:$0xff]  }
   0xf   : > { %v718_v7 = vld [vmem:[%s791_s29 + $0x24] ss:$8 sps:$4 sm:$0xff]   ;;  %626 = vmatprep.mubr.msk.bf16.mxu0 %vm374_vm0, %v715_v5  ;;  %v716_v16 = vld [vmem:[%s791_s29 + $0x20] ss:$8 sps:$4 sm:$0xff]   ;;  %v719_v17 = vld [vmem:[%s791_s29 + $0x14] ss:$8 sps:$4 sm:$0xff]  }
  0x10   : > { %628 = vmatprep.mubr.msk.bf16.mxu1 %vm374_vm0, %v718_v7  ;;  %v711_v13 = vld [vmem:[%s879_s1 + $0x48] sm:$0xff]   ;;  %v712_v14 = vld [vmem:[%s879_s1 + $0x40] sm:$0xff]   ;;  %v721_v18 = vld [vmem:[%s791_s29 + $0x34] ss:$8 sps:$4 sm:$0xff]  }
  0x11   : > { %390 = vmatpush1.bf16.msra.mxu0 %v702_v2  ;;  %681 = vmatpush1.bf16.msra.mxu1 %v702_v2  ;;  %v723_v19 = vld [vmem:[%s791_s29 + $0x10] ss:$8 sps:$4 sm:$0xff]   ;;  %v650_v21 = vld [vmem:[%s218_s25] sm:$0xff]   ;;  %v665_v36 = vld [vmem:[%s218_s25 + $0x8] sm:$0xff]  }
  0x12   : > { %391 = vmatprep.subr.bf16.mxu0 %v733_v1  ;;  %670 = vmatprep.subr.bf16.mxu1 %v733_v1  ;;  %v724_v20 = vld [vmem:[%s791_s29 + $0x30] ss:$8 sps:$4 sm:$0xff]   ;;  %v605_v23 = vld [vmem:[%s880_s2] ss:$0 sm:$0xff]  ;;  %v651_v24 = vunpack.c.l.bf16 %v650_v21  ;;  %v652_v34 = vunpack.c.h.bf16 %v650_v21  ;;  %s857_s29 = scalar_lea.vmem %s882_s4, %s602_s22  ;;  %v655_v46 = vunpack.c.l.bf16 %v665_v36  ;;  %v656_v60 = vunpack.c.h.bf16 %v665_v36 }
  0x13   : > { %v666_v22 = vld [vmem:[%s218_s25 + $0x10] sm:$0xff]   ;;  %v667_v37 = vld [vmem:[%s218_s25 + $0x18] sm:$0xff]  }
  0x14   : > { %v659_v25 = vunpack.c.l.bf16 %v666_v22  ;;  %v660_v35 = vunpack.c.h.bf16 %v666_v22  ;;  %v663_v47 = vunpack.c.l.bf16 %v667_v37  ;;  %v664_v61 = vunpack.c.h.bf16 %v667_v37 }
  0x15   : > { %392 = vmatpush1.bf16.msra.mxu0 %v703_v3  ;;  %682 = vmatpush1.bf16.msra.mxu1 %v703_v3 }
  0x16   : > { %393 = vmatprep.subr.bf16.mxu0 %v733_v1  ;;  %671 = vmatprep.subr.bf16.mxu1 %v733_v1 }
  0x19   : > { %394 = vmatpush1.bf16.msra.mxu0 %v704_v4  ;;  %683 = vmatpush1.bf16.msra.mxu1 %v704_v4 }
  0x1a   : > { %395 = vmatprep.subr.bf16.mxu0 %v733_v1  ;;  %672 = vmatprep.subr.bf16.mxu1 %v733_v1 }
  0x1d   : > { %396 = vmatpush1.bf16.msra.mxu0 %v705_v6  ;;  %684 = vmatpush1.bf16.msra.mxu1 %v705_v6 }
  0x1e   : > { %397 = vmatprep.subr.bf16.mxu0 %v733_v1  ;;  %673 = vmatprep.subr.bf16.mxu1 %v733_v1 }
  0x21   : > { %398 = vmatpush1.bf16.msra.mxu0 %v706_v8  ;;  %685 = vmatpush1.bf16.msra.mxu1 %v706_v8 }
  0x22   : > { %399 = vmatprep.subr.bf16.mxu0 %v733_v1  ;;  %674 = vmatprep.subr.bf16.mxu1 %v733_v1 }
  0x25   : > { %400 = vmatpush1.bf16.msra.mxu0 %v707_v9  ;;  %686 = vmatpush1.bf16.msra.mxu1 %v707_v9 }
  0x26   : > { %401 = vmatprep.subr.bf16.mxu0 %v733_v1  ;;  %675 = vmatprep.subr.bf16.mxu1 %v733_v1 }
  0x29   : > { %402 = vmatpush1.bf16.msra.mxu0 %v708_v10  ;;  %687 = vmatpush1.bf16.msra.mxu1 %v708_v10 }
  0x2a   : > { %411 = vmatprep.subr.bf16.mxu0 %v733_v1  ;;  %676 = vmatprep.subr.bf16.mxu1 %v733_v1 }
  0x2d   : > { %412 = vmatpush2.bf16.msra.mxu0 %v709_v11  ;;  %688 = vmatpush2.bf16.msra.mxu1 %v709_v11 }
  0x2e   : > { %413 = vmatprep.subr.bf16.mxu0 %v733_v1  ;;  %677 = vmatprep.subr.bf16.mxu1 %v733_v1 }
  0x31   : > { %414 = vmatpush2.bf16.msra.mxu0 %v710_v12  ;;  %689 = vmatpush2.bf16.msra.mxu1 %v710_v12 }
  0x32   : > { %415 = vmatprep.subr.bf16.mxu0 %v733_v1  ;;  %678 = vmatprep.subr.bf16.mxu1 %v733_v1 }
  0x35   : > { %416 = vmatpush2.bf16.msra.mxu0 %v711_v13  ;;  %690 = vmatpush2.bf16.msra.mxu1 %v711_v13 }
  0x36   : > { %417 = vmatprep.subr.bf16.mxu0 %v733_v1  ;;  %679 = vmatprep.subr.bf16.mxu1 %v733_v1 }
  0x39   : > { %418 = vmatpush2.bf16.msra.mxu0 %v712_v14  ;;  %691 = vmatpush2.bf16.msra.mxu1 %v712_v14 }
  0x3c   : > { %420 = vmatmul.mubr.bf16.vlgmr.msra.gmra.mxu0 %v713_v15  ;;  %436 = vmatmul.mubr.bf16.vlgmr.msra.gmra.mxu1 %v716_v16 }
  0x3d   : > { %627 = vmatprep.mubr.msk.bf16.mxu0 %vm374_vm0, %v719_v17  ;;  %629 = vmatprep.mubr.msk.bf16.mxu1 %vm374_vm0, %v721_v18 }
  0x44   : > { %428 = vmatmul.mubr.bf16.gmra.mxu0 %v723_v19  ;;  %444 = vmatmul.mubr.bf16.gmra.mxu1 %v724_v20 }
  0xfc   : > { %v421_v26 = vpop.f32.mrf.mxu0  ;;  %v437_v27 = vpop.f32.mrf.mxu1 }
  0xfd   : > { %v422_v28 = vadd.f32 %v605_v23, %v421_v26  ;;  %v438_v29 = vadd.f32 %v605_v23, %v437_v27 }
  0xfe   : > { %v423_v30 = vpop.f32.mrf.mxu0  ;;  %v439_v31 = vpop.f32.mrf.mxu1 }
  0xff   : > { %v468_v32 = vadd.f32 %v651_v24, %v422_v28  ;;  %v472_v33 = vadd.f32 %v659_v25, %v438_v29 }
 0x100   : > { %v424_v38 = vpop.f32.mrf.mxu0  ;;  %v440_v39 = vpop.f32.mrf.mxu1 }
 0x101   : > { %v476_v40 = vmax.f32 %v468_v32, 0.0  ;;  %v480_v41 = vmax.f32 %v472_v33, 0.0  ;;  %v425_v42 = vadd.f32 %v605_v23, %v424_v38  ;;  %v441_v43 = vadd.f32 %v605_v23, %v440_v39 }
 0x102   : > { %v426_v44 = vpop.f32.mrf.mxu0  ;;  %v442_v45 = vpop.f32.mrf.mxu1 }
 0x103   : > { %v641_v48 = vpack.c.bf16 %v476_v40, %v476_v40  ;;  %v645_v49 = vpack.c.bf16 %v480_v41, %v480_v41  ;;  %v469_v50 = vadd.f32 %v652_v34, %v425_v42  ;;  %v473_v51 = vadd.f32 %v660_v35, %v441_v43 }
 0x104   : > { %v429_v52 = vpop.f32.mrf.mxu0  ;;  %v445_v53 = vpop.f32.mrf.mxu1 }
 0x105   : > { %517 = vst.msk [vmem:[%s857_s29] sm:$0xf] %vm516_vm1, %v641_v48  ;;  %521 = vst.msk [vmem:[%s857_s29 + $0x10] sm:$0xf] %vm516_vm1, %v645_v49  ;;  %v477_v54 = vmax.f32 %v469_v50, 0.0  ;;  %v481_v55 = vmax.f32 %v473_v51, 0.0  ;;  %v430_v56 = vadd.f32 %v605_v23, %v429_v52  ;;  %v446_v57 = vadd.f32 %v605_v23, %v445_v53 }
 0x106   : > { %v431_v58 = vpop.f32.mrf.mxu0  ;;  %v447_v59 = vpop.f32.mrf.mxu1 }
 0x107   : > { %v642_v62 = vpack.c.bf16 %v477_v54, %v477_v54  ;;  %v646_v63 = vpack.c.bf16 %v481_v55, %v481_v55  ;;  %v470_v0 = vadd.f32 %v655_v46, %v430_v56  ;;  %v474_v1 = vadd.f32 %v663_v47, %v446_v57 }
 0x108   : > { %v432_v2 = vpop.f32.mrf.mxu0  ;;  %v448_v3 = vpop.f32.mrf.mxu1 }
 0x109   : > { %518 = vst.msk [vmem:[%s857_s29 + $0x4] sm:$0xf] %vm516_vm1, %v642_v62  ;;  %522 = vst.msk [vmem:[%s857_s29 + $0x14] sm:$0xf] %vm516_vm1, %v646_v63  ;;  %v478_v4 = vmax.f32 %v470_v0, 0.0  ;;  %v482_v5 = vmax.f32 %v474_v1, 0.0  ;;  %v433_v6 = vadd.f32 %v605_v23, %v432_v2  ;;  %v449_v7 = vadd.f32 %v605_v23, %v448_v3 }
 0x10a   : > { %v434_v8 = vpop.f32.mrf.mxu0  ;;  %v450_v9 = vpop.f32.mrf.mxu1 }
 0x10b   : > { %v643_v10 = vpack.c.bf16 %v478_v4, %v478_v4  ;;  %v647_v11 = vpack.c.bf16 %v482_v5, %v482_v5  ;;  %v471_v12 = vadd.f32 %v656_v60, %v433_v6  ;;  %v475_v13 = vadd.f32 %v664_v61, %v449_v7 }
 0x10d   : > { %519 = vst.msk [vmem:[%s857_s29 + $0x8] sm:$0xf] %vm516_vm1, %v643_v10  ;;  %523 = vst.msk [vmem:[%s857_s29 + $0x18] sm:$0xf] %vm516_vm1, %v647_v11  ;;  %v479_v14 = vmax.f32 %v471_v12, 0.0  ;;  %v483_v15 = vmax.f32 %v475_v13, 0.0 }
 0x10f   : > { %v644_v16 = vpack.c.bf16 %v479_v14, %v479_v14  ;;  %v648_v17 = vpack.c.bf16 %v483_v15, %v483_v15 }
 0x111   : > { %520 = vst.msk [vmem:[%s857_s29 + $0xc] sm:$0xf] %vm516_vm1, %v644_v16  ;;  %524 = vst.msk [vmem:[%s857_s29 + $0x1c] sm:$0xf] %vm516_vm1, %v648_v17 }
 0x112 PF: > { %s14_s15 = sadd.s32 1, %s731_s15  }
 0x113   : > { %p11_p4 = scmp.ge.s32.totalorder %s14_s15, 4  }
 0x115   :  { %13 = sbr.rel (!%p11_p4) target bundleno = 1 (0x1), region = 69 }

// kernel: erfnet_forward.76
= control target key start
LH: loop header
LB: loop body
LE: loop exit
PB: predicated region body
PF: predicated region fallthrough
CT: control target
= control target key end

     0   :  { %s648_s12 = smov 0   ;;  %s764_s0 = inlined_call_operand.vmem [shape: bf16[128,192], index: 0, kind: input, shape index: {}]   ;;  %s765_s1 = inlined_call_operand.vmem [shape: bf16[192,64], index: 1, kind: input, shape index: {}]   ;;  %s766_s2 = inlined_call_operand.vmem [shape: f32[1,64], index: 2, kind: input, shape index: {}]   ;;  %s767_s3 = inlined_call_operand.vmem [shape: bf16[128,64], index: 3, kind: output, shape index: {}]  }
   0x1 LB: > { %s508_s13 = sadd.s32 4294967295, %s625_s12   ;;  %p512_p0 = scmp.ge.s32.totalorder %s625_s12, 1  ;;  %s625_s12 = sphi %s648_s12, %s13_s12  }
   0x2   : > { %p139_p1 = scmp.lt.s32.totalorder %s625_s12, 3 }
   0x4   : > { %p140_p2 = pnand %p512_p0, %p139_p1 }
   0x5   : > { %s513_s16 = sshll.u32 (!%p140_p2), %s508_s13, 3 }
   0x6   : > { %143 = sbr.rel (%p140_p2) target bundleno = 272 (0x110), region = 32  ;;  %p165_p3 = scmp.lt.s32.totalorder (!%p140_p2), %s513_s16, 15 }
   0xb   : > { %v595_v0 = vld [vmem:[%s765_s1 + $0x38] sm:$0xff]   ;;  %v627_v1 = vmov 0   ;;  %v596_v2 = vld [vmem:[%s765_s1 + $0x30] sm:$0xff]   ;;  %s769_s16 = smov (!%p165_p3, %s513_s16), 15  ;;  %v597_v3 = vld [vmem:[%s765_s1 + $0x28] sm:$0xff]   ;;  %vm325_vm0 = vcmask 523264  }
   0xc   : > { %338 = vmatprep.subr.bf16.mxu0 %v627_v1  ;;  %562 = vmatprep.subr.bf16.mxu1 %v627_v1  ;;  %s553_s21 = sshll.u32 %s769_s16, 3  ;;  %v598_v4 = vld [vmem:[%s765_s1 + $0x20] sm:$0xff]   ;;  %v599_v6 = vld [vmem:[%s765_s1 + $0x18] sm:$0xff]   ;;  %v600_v8 = vld [vmem:[%s765_s1 + $0x10] sm:$0xff]   ;;  %s517_s20 = sshll.u32 %s769_s16, 2  ;;  %vm443_vm1 = vcmask 519168  }
   0xd   : > { %339 = vmatpush1.bf16.msra.mxu0 %v595_v0  ;;  %574 = vmatpush1.bf16.msra.mxu1 %v595_v0  ;;  %s680_s26 = scalar_lea.vmem %s764_s0, %s553_s21  ;;  %v601_v9 = vld [vmem:[%s765_s1 + $0x8] sm:$0xff]   ;;  %v602_v10 = vld [vmem:[%s765_s1] sm:$0xff]   ;;  %v603_v11 = vld [vmem:[%s765_s1 + $0x58] sm:$0xff]   ;;  %s743_s23 = scalar_lea.vmem %s767_s3, %s517_s20 }
   0xe   : > { %340 = vmatprep.subr.bf16.mxu0 %v627_v1  ;;  %563 = vmatprep.subr.bf16.mxu1 %v627_v1  ;;  %v609_v5 = vld [vmem:[%s680_s26 + $0x4] ss:$8 sps:$4 sm:$0xff]   ;;  %v604_v12 = vld [vmem:[%s765_s1 + $0x50] sm:$0xff]   ;;  %v607_v15 = vld [vmem:[%s680_s26] ss:$8 sps:$4 sm:$0xff]  }
   0xf   : > { %v612_v7 = vld [vmem:[%s680_s26 + $0x24] ss:$8 sps:$4 sm:$0xff]   ;;  %539 = vmatprep.mubr.msk.bf16.mxu0 %vm325_vm0, %v609_v5  ;;  %v610_v16 = vld [vmem:[%s680_s26 + $0x20] ss:$8 sps:$4 sm:$0xff]   ;;  %v613_v17 = vld [vmem:[%s680_s26 + $0x14] ss:$8 sps:$4 sm:$0xff]  }
  0x10   : > { %541 = vmatprep.mubr.msk.bf16.mxu1 %vm325_vm0, %v612_v7  ;;  %v605_v13 = vld [vmem:[%s765_s1 + $0x48] sm:$0xff]   ;;  %v606_v14 = vld [vmem:[%s765_s1 + $0x40] sm:$0xff]   ;;  %v615_v18 = vld [vmem:[%s680_s26 + $0x34] ss:$8 sps:$4 sm:$0xff]  }
  0x11   : > { %341 = vmatpush1.bf16.msra.mxu0 %v596_v2  ;;  %575 = vmatpush1.bf16.msra.mxu1 %v596_v2  ;;  %v617_v19 = vld [vmem:[%s680_s26 + $0x10] ss:$8 sps:$4 sm:$0xff]   ;;  %v518_v21 = vld [vmem:[%s766_s2] ss:$0 sm:$0xff] }
  0x12   : > { %342 = vmatprep.subr.bf16.mxu0 %v627_v1  ;;  %564 = vmatprep.subr.bf16.mxu1 %v627_v1  ;;  %v618_v20 = vld [vmem:[%s680_s26 + $0x30] ss:$8 sps:$4 sm:$0xff]  }
  0x15   : > { %343 = vmatpush1.bf16.msra.mxu0 %v597_v3  ;;  %576 = vmatpush1.bf16.msra.mxu1 %v597_v3 }
  0x16   : > { %344 = vmatprep.subr.bf16.mxu0 %v627_v1  ;;  %565 = vmatprep.subr.bf16.mxu1 %v627_v1 }
  0x19   : > { %345 = vmatpush1.bf16.msra.mxu0 %v598_v4  ;;  %577 = vmatpush1.bf16.msra.mxu1 %v598_v4 }
  0x1a   : > { %346 = vmatprep.subr.bf16.mxu0 %v627_v1  ;;  %566 = vmatprep.subr.bf16.mxu1 %v627_v1 }
  0x1d   : > { %347 = vmatpush1.bf16.msra.mxu0 %v599_v6  ;;  %578 = vmatpush1.bf16.msra.mxu1 %v599_v6 }
  0x1e   : > { %348 = vmatprep.subr.bf16.mxu0 %v627_v1  ;;  %567 = vmatprep.subr.bf16.mxu1 %v627_v1 }
  0x21   : > { %349 = vmatpush1.bf16.msra.mxu0 %v600_v8  ;;  %579 = vmatpush1.bf16.msra.mxu1 %v600_v8 }
  0x22   : > { %350 = vmatprep.subr.bf16.mxu0 %v627_v1  ;;  %568 = vmatprep.subr.bf16.mxu1 %v627_v1 }
  0x25   : > { %351 = vmatpush1.bf16.msra.mxu0 %v601_v9  ;;  %580 = vmatpush1.bf16.msra.mxu1 %v601_v9 }
  0x26   : > { %352 = vmatprep.subr.bf16.mxu0 %v627_v1  ;;  %569 = vmatprep.subr.bf16.mxu1 %v627_v1 }
  0x29   : > { %353 = vmatpush1.bf16.msra.mxu0 %v602_v10  ;;  %581 = vmatpush1.bf16.msra.mxu1 %v602_v10 }
  0x2a   : > { %362 = vmatprep.subr.bf16.mxu0 %v627_v1  ;;  %570 = vmatprep.subr.bf16.mxu1 %v627_v1 }
  0x2d   : > { %363 = vmatpush2.bf16.msra.mxu0 %v603_v11  ;;  %582 = vmatpush2.bf16.msra.mxu1 %v603_v11 }
  0x2e   : > { %364 = vmatprep.subr.bf16.mxu0 %v627_v1  ;;  %571 = vmatprep.subr.bf16.mxu1 %v627_v1 }
  0x31   : > { %365 = vmatpush2.bf16.msra.mxu0 %v604_v12  ;;  %583 = vmatpush2.bf16.msra.mxu1 %v604_v12 }
  0x32   : > { %366 = vmatprep.subr.bf16.mxu0 %v627_v1  ;;  %572 = vmatprep.subr.bf16.mxu1 %v627_v1 }
  0x35   : > { %367 = vmatpush2.bf16.msra.mxu0 %v605_v13  ;;  %584 = vmatpush2.bf16.msra.mxu1 %v605_v13 }
  0x36   : > { %368 = vmatprep.subr.bf16.mxu0 %v627_v1  ;;  %573 = vmatprep.subr.bf16.mxu1 %v627_v1 }
  0x39   : > { %369 = vmatpush2.bf16.msra.mxu0 %v606_v14  ;;  %585 = vmatpush2.bf16.msra.mxu1 %v606_v14 }
  0x3c   : > { %371 = vmatmul.mubr.bf16.vlgmr.msra.gmra.mxu0 %v607_v15  ;;  %387 = vmatmul.mubr.bf16.vlgmr.msra.gmra.mxu1 %v610_v16 }
  0x3d   : > { %540 = vmatprep.mubr.msk.bf16.mxu0 %vm325_vm0, %v613_v17  ;;  %542 = vmatprep.mubr.msk.bf16.mxu1 %vm325_vm0, %v615_v18 }
  0x44   : > { %379 = vmatmul.mubr.bf16.gmra.mxu0 %v617_v19  ;;  %395 = vmatmul.mubr.bf16.gmra.mxu1 %v618_v20 }
  0xfc   : > { %v372_v22 = vpop.f32.mrf.mxu0  ;;  %v388_v23 = vpop.f32.mrf.mxu1 }
  0xfd   : > { %v373_v24 = vadd.f32 %v518_v21, %v372_v22  ;;  %v389_v25 = vadd.f32 %v518_v21, %v388_v23 }
  0xfe   : > { %v374_v26 = vpop.f32.mrf.mxu0  ;;  %v390_v27 = vpop.f32.mrf.mxu1 }
  0xff   : > { %v403_v28 = vmax.f32 %v373_v24, 0.0  ;;  %v407_v29 = vmax.f32 %v389_v25, 0.0 }
 0x100   : > { %v375_v30 = vpop.f32.mrf.mxu0  ;;  %v391_v31 = vpop.f32.mrf.mxu1 }
 0x101   : > { %v554_v32 = vpack.c.bf16 %v403_v28, %v403_v28  ;;  %v558_v33 = vpack.c.bf16 %v407_v29, %v407_v29  ;;  %v376_v34 = vadd.f32 %v518_v21, %v375_v30  ;;  %v392_v35 = vadd.f32 %v518_v21, %v391_v31 }
 0x102   : > { %v377_v36 = vpop.f32.mrf.mxu0  ;;  %v393_v37 = vpop.f32.mrf.mxu1 }
 0x103   : > { %444 = vst.msk [vmem:[%s743_s23] sm:$0xf] %vm443_vm1, %v554_v32  ;;  %448 = vst.msk [vmem:[%s743_s23 + $0x10] sm:$0xf] %vm443_vm1, %v558_v33  ;;  %v404_v38 = vmax.f32 %v376_v34, 0.0  ;;  %v408_v39 = vmax.f32 %v392_v35, 0.0 }
 0x104   : > { %v380_v40 = vpop.f32.mrf.mxu0  ;;  %v396_v41 = vpop.f32.mrf.mxu1 }
 0x105   : > { %v555_v42 = vpack.c.bf16 %v404_v38, %v404_v38  ;;  %v559_v43 = vpack.c.bf16 %v408_v39, %v408_v39  ;;  %v381_v44 = vadd.f32 %v518_v21, %v380_v40  ;;  %v397_v45 = vadd.f32 %v518_v21, %v396_v41 }
 0x106   : > { %v382_v46 = vpop.f32.mrf.mxu0  ;;  %v398_v47 = vpop.f32.mrf.mxu1 }
 0x107   : > { %445 = vst.msk [vmem:[%s743_s23 + $0x4] sm:$0xf] %vm443_vm1, %v555_v42  ;;  %449 = vst.msk [vmem:[%s743_s23 + $0x14] sm:$0xf] %vm443_vm1, %v559_v43  ;;  %v405_v48 = vmax.f32 %v381_v44, 0.0  ;;  %v409_v49 = vmax.f32 %v397_v45, 0.0 }
 0x108   : > { %v383_v50 = vpop.f32.mrf.mxu0  ;;  %v399_v51 = vpop.f32.mrf.mxu1 }
 0x109   : > { %v556_v52 = vpack.c.bf16 %v405_v48, %v405_v48  ;;  %v560_v53 = vpack.c.bf16 %v409_v49, %v409_v49  ;;  %v384_v54 = vadd.f32 %v518_v21, %v383_v50  ;;  %v400_v55 = vadd.f32 %v518_v21, %v399_v51 }
 0x10a   : > { %v385_v56 = vpop.f32.mrf.mxu0  ;;  %v401_v57 = vpop.f32.mrf.mxu1 }
 0x10b   : > { %446 = vst.msk [vmem:[%s743_s23 + $0x8] sm:$0xf] %vm443_vm1, %v556_v52  ;;  %450 = vst.msk [vmem:[%s743_s23 + $0x18] sm:$0xf] %vm443_vm1, %v560_v53  ;;  %v406_v58 = vmax.f32 %v384_v54, 0.0  ;;  %v410_v59 = vmax.f32 %v400_v55, 0.0 }
 0x10d   : > { %v557_v60 = vpack.c.bf16 %v406_v58, %v406_v58  ;;  %v561_v61 = vpack.c.bf16 %v410_v59, %v410_v59 }
 0x10f   : > { %447 = vst.msk [vmem:[%s743_s23 + $0xc] sm:$0xf] %vm443_vm1, %v557_v60  ;;  %451 = vst.msk [vmem:[%s743_s23 + $0x1c] sm:$0xf] %vm443_vm1, %v561_v61 }
 0x110 PF: > { %s13_s12 = sadd.s32 1, %s625_s12  }
 0x111   : > { %p10_p4 = scmp.ge.s32.totalorder %s13_s12, 4  }
 0x113   :  { %12 = sbr.rel (!%p10_p4) target bundleno = 1 (0x1), region = 62 }

// kernel: erfnet_forward.96
= control target key start
LH: loop header
LB: loop body
LE: loop exit
PB: predicated region body
PF: predicated region fallthrough
CT: control target
= control target key end

     0   :  { %s1335_s27 = smov 0   ;;  %s1519_s0 = inlined_call_operand.vmem [shape: bf16[32,576], index: 0, kind: input, shape index: {}]   ;;  %s1520_s1 = inlined_call_operand.vmem [shape: bf16[576,128], index: 1, kind: input, shape index: {}]   ;;  %s1521_s2 = inlined_call_operand.vmem [shape: bf16[32,64], index: 2, kind: input, shape index: {}]   ;;  %s1522_s3 = inlined_call_operand.vmem [shape: bf16[32,64], index: 3, kind: input, shape index: {}]   ;;  %s1523_s4 = inlined_call_operand.vmem [shape: bf16[32,64], index: 4, kind: input, shape index: {}]   ;;  %s1524_s5 = inlined_call_operand.vmem [shape: bf16[32,64], index: 5, kind: input, shape index: {}]   ;;  %s1525_s6 = inlined_call_operand.vmem [shape: bf16[64,128], index: 6, kind: input, shape index: {}]   ;;  %s1526_s7 = inlined_call_operand.vmem [shape: f32[1,128], index: 7, kind: input, shape index: {}]   ;;  %s1527_s8 = inlined_call_operand.vmem [shape: bf16[32,128], index: 8, kind: output, shape index: {}]  }
   0x1 LB: > { %s1067_s28 = sadd.s32 4294967295, %s1286_s27   ;;  %p1071_p0 = scmp.ge.s32.totalorder %s1286_s27, 1  ;;  %s1286_s27 = sphi %s1335_s27, %s18_s27  }
   0x2   : > { %p308_p1 = scmp.lt.s32.totalorder %s1286_s27, 3 }
   0x4   : > { %p309_p2 = pnand %p1071_p0, %p308_p1 }
   0x5   : > { %s1072_s13 = sshll.u32 (!%p309_p2), %s1067_s28, 1 }
   0x6   : > { %312 = sbr.rel (%p309_p2) target bundleno = 272 (0x110), region = 52  ;;  %p364_p3 = scmp.lt.s32.totalorder (!%p309_p2), %s1072_s13, 3 }
   0xb   : > { %v1233_v0 = vld [vmem:[%s1525_s6 + $0x18] sm:$0xff]   ;;  %v1288_v1 = vmov 0.0   ;;  %vm1289_vm0 = vmmov 0   ;;  %v1236_v4 = vld [vmem:[%s1525_s6 + $0x10] sm:$0xff]   ;;  %s1529_s13 = smov (!%p364_p3, %s1072_s13), 3  ;;  %v1239_v7 = vld [vmem:[%s1525_s6 + $0x8] sm:$0xff]  }
   0xc   : > { %1198 = vmatprep.subr.bf16.mxu0 %v1288_v1  ;;  %v1234_v2 = vld [vmem:[%s1520_s1 + $0x78] sm:$0xff]   ;;  %1206 = vmatprep.mubr.msk.bf16.mxu0 %vm1289_vm0, %v1288_v1  ;;  %v1237_v5 = vld [vmem:[%s1520_s1 + $0x70] sm:$0xff]   ;;  %v1240_v8 = vld [vmem:[%s1520_s1 + $0x68] sm:$0xff]   ;;  %s1375_s24 = sshll.u32 %s1529_s13, 2  ;;  %vm530_vm1 = vcmask 523264   ;;  %s1222_s28 = smul.u32 20, %s1529_s13 }
   0xd   : > { %1199 = vmatpush3.bf16.msra.mxu0 %v1233_v0  ;;  %v1235_v3 = vld [vmem:[%s1520_s1 + $0x38] sm:$0xff]   ;;  %1149 = vmatprep.subr.bf16.mxu1 %v1234_v2  ;;  %v1238_v6 = vld [vmem:[%s1520_s1 + $0x30] sm:$0xff]   ;;  %v1241_v9 = vld [vmem:[%s1520_s1 + $0x28] sm:$0xff]   ;;  %s374_s10 = scalar_lea.vmem %s1521_s2, %s1375_s24  ;;  %s380_s14 = scalar_lea.vmem %s1522_s3, %s1375_s24 }
   0xe   : > { %1200 = vmatprep.subr.bf16.mxu0 %v1288_v1  ;;  %1150 = vmatpush3.bf16.msra.mxu1 %v1235_v3  ;;  %v1242_v10 = vld [vmem:[%s1525_s6] sm:$0xff]   ;;  %s386_s19 = scalar_lea.vmem %s1523_s4, %s1375_s24  ;;  %s392_s25 = scalar_lea.vmem %s1524_s5, %s1375_s24  ;;  %v1245_v25 = vld [vmem:[%s1520_s1 + $0xf8] sm:$0xff]   ;;  %v1249_v32 = vld [vmem:[%s1520_s1 + $0xf0] sm:$0xff]  }
   0xf   : > { %1151 = vmatprep.subr.bf16.mxu1 %v1237_v5  ;;  %v1243_v11 = vld [vmem:[%s1520_s1 + $0x60] sm:$0xff]   ;;  %v1246_v26 = vld [vmem:[%s1520_s1 + $0x58] sm:$0xff]   ;;  %v1250_v33 = vld [vmem:[%s1520_s1 + $0x50] sm:$0xff]   ;;  %s1453_s17 = scalar_lea.vmem %s1519_s0, %s1222_s28 }
  0x10   : > { %v1244_v12 = vld [vmem:[%s1520_s1 + $0x20] sm:$0xff]   ;;  %v1247_v29 = vld [vmem:[%s1520_s1 + $0xb8] sm:$0xff]   ;;  %v1251_v34 = vld [vmem:[%s1520_s1 + $0xb0] sm:$0xff]  }
  0x11   : > { %1201 = vmatpush3.bf16.msra.mxu0 %v1236_v4  ;;  %v479_v13 = vld [vmem:[%s374_s10] sm:$0xf]  ;;  %v480_v14 = vld [vmem:[%s374_s10 + $0x4] sm:$0xf]  ;;  %v1248_v30 = vld [vmem:[%s1520_s1 + $0x18] sm:$0xff]   ;;  %s398_s10 = scalar_lea.vmem %s1527_s8, %s1375_s24 }
  0x12   : > { %1202 = vmatprep.subr.bf16.mxu0 %v1288_v1  ;;  %1152 = vmatpush3.bf16.msra.mxu1 %v1238_v6  ;;  %v481_v15 = vld [vmem:[%s380_s14] sm:$0xf]  ;;  %v482_v16 = vld [vmem:[%s380_s14 + $0x4] sm:$0xf]  ;;  %v1252_v35 = vld [vmem:[%s1520_s1 + $0x10] sm:$0xff]  }
  0x13   : > { %1153 = vmatprep.subr.bf16.mxu1 %v1240_v8  ;;  %v483_v17 = vmax.bf16 %v481_v15, %v479_v13  ;;  %v485_v18 = vld [vmem:[%s386_s19] sm:$0xf]  ;;  %v486_v19 = vld [vmem:[%s386_s19 + $0x4] sm:$0xf]  ;;  %v484_v20 = vmax.bf16 %v482_v16, %v480_v14  ;;  %v1253_v36 = vld [vmem:[%s1520_s1 + $0xe8] sm:$0xff]  }
  0x14   : > { %v487_v21 = vld [vmem:[%s392_s25] sm:$0xf]  ;;  %v488_v22 = vld [vmem:[%s392_s25 + $0x4] sm:$0xf]  ;;  %v1254_v37 = vld [vmem:[%s1520_s1 + $0x48] sm:$0xff]  }
  0x15   : > { %1203 = vmatpush3.bf16.msra.mxu0 %v1239_v7  ;;  %v489_v23 = vmax.bf16 %v487_v21, %v485_v18  ;;  %v490_v24 = vmax.bf16 %v488_v22, %v486_v19  ;;  %v1255_v38 = vld [vmem:[%s1520_s1 + $0xa8] sm:$0xff]   ;;  %v1257_v40 = vld [vmem:[%s1520_s1 + $0xe0] sm:$0xff]   ;;  %v1264_v46 = vld [vmem:[%s1520_s1 + $0xd8] sm:$0xff]  }
  0x16   : > { %1204 = vmatprep.subr.bf16.mxu0 %v1288_v1  ;;  %1154 = vmatpush3.bf16.msra.mxu1 %v1241_v9  ;;  %v1256_v39 = vld [vmem:[%s1520_s1 + $0x8] sm:$0xff]   ;;  %v1258_v41 = vld [vmem:[%s1520_s1 + $0x40] sm:$0xff]   ;;  %v1265_v47 = vld [vmem:[%s1520_s1 + $0x98] sm:$0xff]  }
  0x17   : > { %1155 = vmatprep.subr.bf16.mxu1 %v1243_v11  ;;  %v491_v27 = vmax.bf16 %v489_v23, %v483_v17  ;;  %v492_v28 = vmax.bf16 %v490_v24, %v484_v20  ;;  %v1259_v42 = vld [vmem:[%s1520_s1 + $0xa0] sm:$0xff]   ;;  %v1266_v48 = vld [vmem:[%s1520_s1 + $0x118] sm:$0xff]   ;;  %v1267_v49 = vld [vmem:[%s1520_s1 + $0xd0] sm:$0xff]  }
  0x18   : > { %v1260_v43 = vld [vmem:[%s1520_s1] sm:$0xff]   ;;  %v1269_v50 = vld [vmem:[%s1520_s1 + $0x110] sm:$0xff]   ;;  %v1270_v52 = vld [vmem:[%s1520_s1 + $0xc8] sm:$0xff]  }
  0x19   : > { %1205 = vmatpush3.bf16.msra.mxu0 %v1242_v10  ;;  %v1084_v31 = vcombine.low %v491_v27, %v492_v28  ;;  %v1261_v44 = vld [vmem:[%s1453_s17] ss:$20 sps:$4 sm:$0xff]   ;;  %v1263_v45 = vld [vmem:[%s1453_s17 + $0x4] ss:$20 sps:$4 sm:$0xff]   ;;  %v1272_v53 = vld [vmem:[%s1520_s1 + $0x108] sm:$0xff]  }
  0x1a   : > { %1156 = vmatpush3.bf16.msra.mxu1 %v1244_v12  ;;  %1171 = vmatprep.subr.bf16.mxu0 %v1245_v25  ;;  %v1268_v51 = vld [vmem:[%s1520_s1 + $0x90] sm:$0xff]   ;;  %v1271_v54 = vld [vmem:[%s1520_s1 + $0x88] sm:$0xff]   ;;  %v1273_v55 = vld [vmem:[%s1520_s1 + $0xc0] sm:$0xff]  }
  0x1b   : > { %1157 = vmatprep.subr.bf16.mxu1 %v1246_v26  ;;  %851 = vmatprep.mubr.bf16.mxu1 %v1263_v45  ;;  %v1275_v56 = vld [vmem:[%s1520_s1 + $0x100] sm:$0xff]   ;;  %v1276_v60 = vld [vmem:[%s1453_s17 + $0x8] ss:$20 sps:$4 sm:$0xff]  }
  0x1c   : > { %1207 = vmatmul.mubr.msk.bf16.vlgmr.msra.gmra.mxu0 %vm530_vm1, %v1084_v31  ;;  %v1278_v57 = vld [vmem:[%s1453_s17 + $0xc] ss:$20 sps:$4 sm:$0xff]   ;;  %v1279_v59 = vld [vmem:[%s1453_s17 + $0x10] ss:$20 sps:$4 sm:$0xff]  }
  0x1d   : > { %1172 = vmatpush3.bf16.msra.mxu0 %v1247_v29  ;;  %v1274_v58 = vld [vmem:[%s1520_s1 + $0x80] sm:$0xff]   ;;  %892 = vmatprep.mubr.bf16.mxu0 %v1278_v57 }
  0x1e   : > { %1158 = vmatpush3.bf16.msra.mxu1 %v1248_v30  ;;  %1173 = vmatprep.subr.bf16.mxu0 %v1249_v32  ;;  %v1132_v21 = vld [vmem:[%s1526_s7] ss:$0 sm:$0xff] }
  0x1f   : > { %1159 = vmatprep.subr.bf16.mxu1 %v1250_v33 }
  0x21   : > { %1174 = vmatpush3.bf16.msra.mxu0 %v1251_v34 }
  0x22   : > { %1160 = vmatpush3.bf16.msra.mxu1 %v1252_v35  ;;  %1175 = vmatprep.subr.bf16.mxu0 %v1253_v36 }
  0x23   : > { %1161 = vmatprep.subr.bf16.mxu1 %v1254_v37 }
  0x25   : > { %1176 = vmatpush3.bf16.msra.mxu0 %v1255_v38 }
  0x26   : > { %1162 = vmatpush3.bf16.msra.mxu1 %v1256_v39  ;;  %1177 = vmatprep.subr.bf16.mxu0 %v1257_v40 }
  0x27   : > { %1163 = vmatprep.subr.bf16.mxu1 %v1258_v41 }
  0x29   : > { %1178 = vmatpush3.bf16.msra.mxu0 %v1259_v42 }
  0x2a   : > { %1164 = vmatpush3.bf16.msra.mxu1 %v1260_v43  ;;  %1179 = vmatprep.subr.bf16.mxu0 %v1264_v46 }
  0x2b   : > { %1210 = vmatprep.subr.bf16.mxu1 %v1288_v1 }
  0x2d   : > { %852 = vmatmul.mubr.bf16.vlgmr.msra.gmra.mxu1 %v1261_v44  ;;  %1180 = vmatpush3.bf16.msra.mxu0 %v1265_v47 }
  0x2e   : > { %1211 = vmatpush3.bf16.msra.mxu1 %v1266_v48  ;;  %1218 = vmatprep.mubr.msk.bf16.mxu1 %vm1289_vm0, %v1288_v1 }
  0x2f   : > { %1212 = vmatprep.subr.bf16.mxu1 %v1288_v1  ;;  %1181 = vmatprep.subr.bf16.mxu0 %v1267_v49 }
  0x31   : > { %1182 = vmatpush3.bf16.msra.mxu0 %v1268_v51 }
  0x32   : > { %1213 = vmatpush3.bf16.msra.mxu1 %v1269_v50  ;;  %1183 = vmatprep.subr.bf16.mxu0 %v1270_v52 }
  0x33   : > { %1214 = vmatprep.subr.bf16.mxu1 %v1288_v1 }
  0x35   : > { %1184 = vmatpush3.bf16.msra.mxu0 %v1271_v54 }
  0x36   : > { %1215 = vmatpush3.bf16.msra.mxu1 %v1272_v53  ;;  %1185 = vmatprep.subr.bf16.mxu0 %v1273_v55 }
  0x37   : > { %1216 = vmatprep.subr.bf16.mxu1 %v1288_v1 }
  0x39   : > { %1186 = vmatpush3.bf16.msra.mxu0 %v1274_v58 }
  0x3a   : > { %1217 = vmatpush3.bf16.msra.mxu1 %v1275_v56 }
  0x3c   : > { %893 = vmatmul.mubr.bf16.vlgmr.msra.gmra.mxu0 %v1276_v60 }
  0x3d   : > { %1219 = vmatmul.mubr.msk.bf16.vlgmr.msra.gmra.mxu1 %vm530_vm1, %v1279_v59 }
  0xdc   : > { %v568_v61 = vpop.f32.mrf.mxu0 }
  0xde   : > { %v1208_v62 = vpop.f32.mrf.mxu0 }
  0xe0   : > { %v571_v63 = vpop.f32.mrf.mxu0 }
  0xe2   : > { %v1209_v0 = vpop.f32.mrf.mxu0 }
  0xed   : > { %v1165_v1 = vpop.f32.mrf.mxu1 }
  0xef   : > { %v1166_v2 = vpop.f32.mrf.mxu1 }
  0xf0   : > { %v1167_v6 = vadd.f32 %v1166_v2, %v1165_v1 }
  0xf1   : > { %v1168_v3 = vpop.f32.mrf.mxu1 }
  0xf2   : > { %v854_v11 = vadd.f32 %v1167_v6, %v568_v61 }
  0xf3   : > { %v1169_v4 = vpop.f32.mrf.mxu1 }
  0xf4   : > { %v1170_v12 = vadd.f32 %v1169_v4, %v1168_v3 }
  0xf6   : > { %v857_v18 = vadd.f32 %v1170_v12, %v571_v63 }
  0xfc   : > { %v1187_v7 = vpop.f32.mrf.mxu0 }
  0xfd   : > { %v935_v5 = vpop.f32.mrf.mxu1 }
  0xfe   : > { %v1188_v9 = vpop.f32.mrf.mxu0 }
  0xff   : > { %v1220_v8 = vpop.f32.mrf.mxu1  ;;  %v1189_v13 = vadd.f32 %v1188_v9, %v1187_v7 }
 0x100   : > { %v1190_v14 = vpop.f32.mrf.mxu0 }
 0x101   : > { %v938_v10 = vpop.f32.mrf.mxu1  ;;  %v895_v16 = vadd.f32 %v1189_v13, %v854_v11 }
 0x102   : > { %v1191_v17 = vpop.f32.mrf.mxu0 }
 0x103   : > { %v1221_v15 = vpop.f32.mrf.mxu1  ;;  %v936_v19 = vadd.f32 %v935_v5, %v895_v16  ;;  %v1192_v20 = vadd.f32 %v1191_v17, %v1190_v14 }
 0x105   : > { %v898_v22 = vadd.f32 %v1192_v20, %v857_v18  ;;  %v949_v23 = vadd.f32 %v1132_v21, %v936_v19 }
 0x107   : > { %v939_v24 = vadd.f32 %v938_v10, %v898_v22  ;;  %v951_v26 = vmax.f32 %v949_v23, 0.0 }
 0x109   : > { %v950_v25 = vadd.f32 %v1132_v21, %v939_v24 }
 0x10b   : > { %v952_v27 = vmax.f32 %v950_v25, 0.0 }
 0x10d   : > { %v1142_v28 = vpack.c.bf16 %v952_v27, %v951_v26 }
 0x10f   : > { %1143 = vst [vmem:[%s398_s10] sm:$0xff] %v1142_v28  }
 0x110 PF: > { %s18_s27 = sadd.s32 1, %s1286_s27  }
 0x111   : > { %p15_p4 = scmp.ge.s32.totalorder %s18_s27, 4  }
 0x113   :  { %17 = sbr.rel (!%p15_p4) target bundleno = 1 (0x1), region = 94 }

// kernel: erfnet_forward.97
= control target key start
LH: loop header
LB: loop body
LE: loop exit
PB: predicated region body
PF: predicated region fallthrough
CT: control target
= control target key end

     0   :  { %s715_s12 = smov 0   ;;  %s811_s0 = inlined_call_operand.vmem [shape: bf16[32,384], index: 0, kind: input, shape index: {}]   ;;  %s812_s1 = inlined_call_operand.vmem [shape: bf16[384,128], index: 1, kind: input, shape index: {}]   ;;  %s813_s2 = inlined_call_operand.vmem [shape: f32[1,128], index: 2, kind: input, shape index: {}]   ;;  %s814_s3 = inlined_call_operand.vmem [shape: bf16[32,128], index: 3, kind: output, shape index: {}]  }
   0x1 LB: > { %s547_s13 = sadd.s32 4294967295, %s691_s12   ;;  %p551_p0 = scmp.ge.s32.totalorder %s691_s12, 1  ;;  %s691_s12 = sphi %s715_s12, %s13_s12  }
   0x2   : > { %p139_p1 = scmp.lt.s32.totalorder %s691_s12, 3 }
   0x4   : > { %p140_p2 = pnand %p551_p0, %p139_p1 }
   0x5   : > { %s552_s30 = sshll.u32 (!%p140_p2), %s547_s13, 1 }
   0x6   : > { %143 = sbr.rel (%p140_p2) target bundleno = 254 (0xfe), region = 32  ;;  %p165_p3 = scmp.lt.s32.totalorder (!%p140_p2), %s552_s30, 3 }
   0xb   : > { %v657_v0 = vld [vmem:[%s812_s1 + $0x78] sm:$0xff]   ;;  %v693_v1 = vmov 0.0   ;;  %v660_v4 = vld [vmem:[%s812_s1 + $0x70] sm:$0xff]   ;;  %vm694_vm0 = vmmov 0   ;;  %v663_v7 = vld [vmem:[%s812_s1 + $0x68] sm:$0xff]   ;;  %s816_s30 = smov (!%p165_p3, %s552_s30), 3 }
   0xc   : > { %626 = vmatprep.subr.bf16.mxu1 %v693_v1  ;;  %v658_v2 = vld [vmem:[%s812_s1 + $0x38] sm:$0xff]   ;;  %595 = vmatprep.subr.bf16.mxu0 %v657_v0  ;;  %v661_v5 = vld [vmem:[%s812_s1 + $0x30] sm:$0xff]   ;;  %v664_v8 = vld [vmem:[%s812_s1 + $0x28] sm:$0xff]   ;;  %s646_s23 = smul.u32 12, %s816_s30  ;;  %s555_s18 = sshll.u32 %s816_s30, 2 }
   0xd   : > { %v659_v3 = vld [vmem:[%s812_s1 + $0xb8] sm:$0xff]   ;;  %596 = vmatpush3.bf16.msra.mxu0 %v658_v2  ;;  %642 = vmatprep.mubr.msk.bf16.mxu1 %vm694_vm0, %v693_v1  ;;  %v662_v6 = vld [vmem:[%s812_s1 + $0xb0] sm:$0xff]   ;;  %v665_v9 = vld [vmem:[%s812_s1 + $0xa8] sm:$0xff]   ;;  %s175_s21 = scalar_lea.vmem %s814_s3, %s555_s18 }
   0xe   : > { %627 = vmatpush3.bf16.msra.mxu1 %v659_v3  ;;  %597 = vmatprep.subr.bf16.mxu0 %v660_v4  ;;  %v666_v10 = vld [vmem:[%s812_s1 + $0x60] sm:$0xff]   ;;  %v669_v13 = vld [vmem:[%s812_s1 + $0x58] sm:$0xff]   ;;  %v672_v16 = vld [vmem:[%s812_s1 + $0x50] sm:$0xff]   ;;  %s169_s6 = scalar_lea.vmem %s811_s0, %s646_s23 }
   0xf   : > { %628 = vmatprep.subr.bf16.mxu1 %v693_v1  ;;  %v667_v11 = vld [vmem:[%s812_s1 + $0x20] sm:$0xff]   ;;  %v670_v14 = vld [vmem:[%s812_s1 + $0x18] sm:$0xff]   ;;  %v673_v17 = vld [vmem:[%s812_s1 + $0x10] sm:$0xff]  }
  0x10   : > { %v668_v12 = vld [vmem:[%s812_s1 + $0xa0] sm:$0xff]   ;;  %v671_v15 = vld [vmem:[%s812_s1 + $0x98] sm:$0xff]   ;;  %v674_v18 = vld [vmem:[%s812_s1 + $0x90] sm:$0xff]  }
  0x11   : > { %598 = vmatpush3.bf16.msra.mxu0 %v661_v5  ;;  %v675_v19 = vld [vmem:[%s812_s1 + $0x48] sm:$0xff]   ;;  %v678_v22 = vld [vmem:[%s812_s1 + $0x40] sm:$0xff]  }
  0x12   : > { %629 = vmatpush3.bf16.msra.mxu1 %v662_v6  ;;  %599 = vmatprep.subr.bf16.mxu0 %v663_v7  ;;  %v676_v20 = vld [vmem:[%s812_s1 + $0x8] sm:$0xff]   ;;  %v683_v23 = vld [vmem:[%s169_s6 + $0x4] ss:$12 sps:$4 sm:$0xff]   ;;  %v556_v30 = vld [vmem:[%s813_s2] ss:$0 sm:$0xff] }
  0x13   : > { %630 = vmatprep.subr.bf16.mxu1 %v693_v1  ;;  %v677_v21 = vld [vmem:[%s812_s1 + $0x88] sm:$0xff]   ;;  %v679_v24 = vld [vmem:[%s812_s1] sm:$0xff]   ;;  %429 = vmatprep.mubr.bf16.mxu0 %v683_v23 }
  0x14   : > { %v680_v25 = vld [vmem:[%s812_s1 + $0x80] sm:$0xff]   ;;  %v684_v27 = vld [vmem:[%s169_s6 + $0x8] ss:$12 sps:$4 sm:$0xff]  }
  0x15   : > { %600 = vmatpush3.bf16.msra.mxu0 %v664_v8  ;;  %v681_v26 = vld [vmem:[%s169_s6] ss:$12 sps:$4 sm:$0xff]  }
  0x16   : > { %631 = vmatpush3.bf16.msra.mxu1 %v665_v9  ;;  %601 = vmatprep.subr.bf16.mxu0 %v666_v10 }
  0x17   : > { %632 = vmatprep.subr.bf16.mxu1 %v693_v1 }
  0x19   : > { %602 = vmatpush3.bf16.msra.mxu0 %v667_v11 }
  0x1a   : > { %633 = vmatpush3.bf16.msra.mxu1 %v668_v12  ;;  %603 = vmatprep.subr.bf16.mxu0 %v669_v13 }
  0x1b   : > { %634 = vmatprep.subr.bf16.mxu1 %v693_v1 }
  0x1d   : > { %604 = vmatpush3.bf16.msra.mxu0 %v670_v14 }
  0x1e   : > { %635 = vmatpush3.bf16.msra.mxu1 %v671_v15  ;;  %605 = vmatprep.subr.bf16.mxu0 %v672_v16 }
  0x1f   : > { %636 = vmatprep.subr.bf16.mxu1 %v693_v1 }
  0x21   : > { %606 = vmatpush3.bf16.msra.mxu0 %v673_v17 }
  0x22   : > { %637 = vmatpush3.bf16.msra.mxu1 %v674_v18  ;;  %607 = vmatprep.subr.bf16.mxu0 %v675_v19 }
  0x23   : > { %638 = vmatprep.subr.bf16.mxu1 %v693_v1 }
  0x25   : > { %608 = vmatpush3.bf16.msra.mxu0 %v676_v20 }
  0x26   : > { %639 = vmatpush3.bf16.msra.mxu1 %v677_v21  ;;  %609 = vmatprep.subr.bf16.mxu0 %v678_v22 }
  0x27   : > { %640 = vmatprep.subr.bf16.mxu1 %v693_v1 }
  0x29   : > { %610 = vmatpush3.bf16.msra.mxu0 %v679_v24 }
  0x2a   : > { %641 = vmatpush3.bf16.msra.mxu1 %v680_v25 }
  0x2c   : > { %430 = vmatmul.mubr.bf16.vlgmr.msra.gmra.mxu0 %v681_v26 }
  0x2d   : > { %643 = vmatmul.mubr.bf16.vlgmr.msra.gmra.mxu1 %v684_v27 }
  0xec   : > { %v611_v28 = vpop.f32.mrf.mxu0 }
  0xed   : > { %v472_v29 = vpop.f32.mrf.mxu1 }
  0xee   : > { %v612_v31 = vpop.f32.mrf.mxu0 }
  0xef   : > { %v613_v32 = vadd.f32 %v612_v31, %v611_v28  ;;  %v644_v33 = vpop.f32.mrf.mxu1 }
  0xf0   : > { %v614_v34 = vpop.f32.mrf.mxu0 }
  0xf1   : > { %v432_v35 = vadd.f32 %v613_v32, %v556_v30  ;;  %v475_v36 = vpop.f32.mrf.mxu1 }
  0xf2   : > { %v615_v37 = vpop.f32.mrf.mxu0 }
  0xf3   : > { %v616_v38 = vadd.f32 %v615_v37, %v614_v34  ;;  %v645_v39 = vpop.f32.mrf.mxu1  ;;  %v473_v40 = vadd.f32 %v472_v29, %v432_v35 }
  0xf5   : > { %v435_v41 = vadd.f32 %v616_v38, %v556_v30  ;;  %v479_v43 = vmax.f32 %v473_v40, 0.0 }
  0xf7   : > { %v476_v42 = vadd.f32 %v475_v36, %v435_v41 }
  0xf9   : > { %v480_v44 = vmax.f32 %v476_v42, 0.0 }
  0xfb   : > { %v593_v45 = vpack.c.bf16 %v480_v44, %v479_v43 }
  0xfd   : > { %594 = vst [vmem:[%s175_s21] sm:$0xff] %v593_v45  }
  0xfe PF: > { %s13_s12 = sadd.s32 1, %s691_s12  }
  0xff   : > { %p10_p4 = scmp.ge.s32.totalorder %s13_s12, 4  }
 0x101   :  { %12 = sbr.rel (!%p10_p4) target bundleno = 1 (0x1), region = 62 }

// kernel: erfnet_forward.100
= control target key start
LH: loop header
LB: loop body
LE: loop exit
PB: predicated region body
PF: predicated region fallthrough
CT: control target
= control target key end

     0   :  { %s793_s15 = smov 0   ;;  %s892_s0 = inlined_call_operand.vmem [shape: bf16[32,384], index: 0, kind: input, shape index: {}]   ;;  %s893_s1 = inlined_call_operand.vmem [shape: bf16[384,128], index: 1, kind: input, shape index: {}]   ;;  %s894_s2 = inlined_call_operand.vmem [shape: f32[1,128], index: 2, kind: input, shape index: {}]   ;;  %s895_s3 = inlined_call_operand.vmem [shape: bf16[32,128], index: 3, kind: input, shape index: {}]   ;;  %s896_s4 = inlined_call_operand.vmem [shape: bf16[32,128], index: 4, kind: output, shape index: {}]  }
   0x1 LB: > { %s614_s16 = sadd.s32 4294967295, %s764_s15   ;;  %p618_p0 = scmp.ge.s32.totalorder %s764_s15, 1  ;;  %s764_s15 = sphi %s793_s15, %s14_s15  }
   0x2   : > { %p175_p1 = scmp.lt.s32.totalorder %s764_s15, 3 }
   0x4   : > { %p176_p2 = pnand %p618_p0, %p175_p1 }
   0x5   : > { %s619_s7 = sshll.u32 (!%p176_p2), %s614_s16, 1 }
   0x6   : > { %179 = sbr.rel (%p176_p2) target bundleno = 256 (0x100), region = 36  ;;  %p208_p3 = scmp.lt.s32.totalorder (!%p176_p2), %s619_s7, 3 }
   0xb   : > { %v730_v0 = vld [vmem:[%s893_s1 + $0x78] sm:$0xff]   ;;  %v766_v1 = vmov 0.0   ;;  %v733_v4 = vld [vmem:[%s893_s1 + $0x70] sm:$0xff]   ;;  %vm767_vm0 = vmmov 0   ;;  %v736_v7 = vld [vmem:[%s893_s1 + $0x68] sm:$0xff]   ;;  %s898_s7 = smov (!%p208_p3, %s619_s7), 3 }
   0xc   : > { %699 = vmatprep.subr.bf16.mxu1 %v766_v1  ;;  %v731_v2 = vld [vmem:[%s893_s1 + $0x38] sm:$0xff]   ;;  %668 = vmatprep.subr.bf16.mxu0 %v730_v0  ;;  %v734_v5 = vld [vmem:[%s893_s1 + $0x30] sm:$0xff]   ;;  %v737_v8 = vld [vmem:[%s893_s1 + $0x28] sm:$0xff]   ;;  %s719_s27 = smul.u32 12, %s898_s7  ;;  %s622_s21 = sshll.u32 %s898_s7, 2 }
   0xd   : > { %v732_v3 = vld [vmem:[%s893_s1 + $0xb8] sm:$0xff]   ;;  %669 = vmatpush3.bf16.msra.mxu0 %v731_v2  ;;  %715 = vmatprep.mubr.msk.bf16.mxu1 %vm767_vm0, %v766_v1  ;;  %v735_v6 = vld [vmem:[%s893_s1 + $0xb0] sm:$0xff]   ;;  %v738_v9 = vld [vmem:[%s893_s1 + $0xa8] sm:$0xff]   ;;  %s218_s24 = scalar_lea.vmem %s895_s3, %s622_s21  ;;  %s224_s28 = scalar_lea.vmem %s896_s4, %s622_s21 }
   0xe   : > { %700 = vmatpush3.bf16.msra.mxu1 %v732_v3  ;;  %670 = vmatprep.subr.bf16.mxu0 %v733_v4  ;;  %v739_v10 = vld [vmem:[%s893_s1 + $0x60] sm:$0xff]   ;;  %v742_v13 = vld [vmem:[%s893_s1 + $0x58] sm:$0xff]   ;;  %v745_v16 = vld [vmem:[%s893_s1 + $0x50] sm:$0xff]   ;;  %s212_s11 = scalar_lea.vmem %s892_s0, %s719_s27 }
   0xf   : > { %701 = vmatprep.subr.bf16.mxu1 %v766_v1  ;;  %v740_v11 = vld [vmem:[%s893_s1 + $0x20] sm:$0xff]   ;;  %v743_v14 = vld [vmem:[%s893_s1 + $0x18] sm:$0xff]   ;;  %v746_v17 = vld [vmem:[%s893_s1 + $0x10] sm:$0xff]  }
  0x10   : > { %v741_v12 = vld [vmem:[%s893_s1 + $0xa0] sm:$0xff]   ;;  %v744_v15 = vld [vmem:[%s893_s1 + $0x98] sm:$0xff]   ;;  %v747_v18 = vld [vmem:[%s893_s1 + $0x90] sm:$0xff]  }
  0x11   : > { %671 = vmatpush3.bf16.msra.mxu0 %v734_v5  ;;  %v748_v19 = vld [vmem:[%s893_s1 + $0x48] sm:$0xff]   ;;  %v751_v22 = vld [vmem:[%s893_s1 + $0x40] sm:$0xff]  }
  0x12   : > { %702 = vmatpush3.bf16.msra.mxu1 %v735_v6  ;;  %672 = vmatprep.subr.bf16.mxu0 %v736_v7  ;;  %v749_v20 = vld [vmem:[%s893_s1 + $0x8] sm:$0xff]   ;;  %v756_v23 = vld [vmem:[%s212_s11 + $0x4] ss:$12 sps:$4 sm:$0xff]   ;;  %v625_v30 = vld [vmem:[%s894_s2] ss:$0 sm:$0xff] }
  0x13   : > { %703 = vmatprep.subr.bf16.mxu1 %v766_v1  ;;  %v750_v21 = vld [vmem:[%s893_s1 + $0x88] sm:$0xff]   ;;  %v752_v24 = vld [vmem:[%s893_s1] sm:$0xff]   ;;  %478 = vmatprep.mubr.bf16.mxu0 %v756_v23 }
  0x14   : > { %v753_v25 = vld [vmem:[%s893_s1 + $0x80] sm:$0xff]   ;;  %v757_v27 = vld [vmem:[%s212_s11 + $0x8] ss:$12 sps:$4 sm:$0xff]  }
  0x15   : > { %673 = vmatpush3.bf16.msra.mxu0 %v737_v8  ;;  %v754_v26 = vld [vmem:[%s212_s11] ss:$12 sps:$4 sm:$0xff]  }
  0x16   : > { %704 = vmatpush3.bf16.msra.mxu1 %v738_v9  ;;  %674 = vmatprep.subr.bf16.mxu0 %v739_v10  ;;  %v660_v34 = vld [vmem:[%s218_s24] sm:$0xff]  }
  0x17   : > { %705 = vmatprep.subr.bf16.mxu1 %v766_v1  ;;  %v661_v40 = vunpack.c.l.bf16 %v660_v34  ;;  %v662_v44 = vunpack.c.h.bf16 %v660_v34 }
  0x19   : > { %675 = vmatpush3.bf16.msra.mxu0 %v740_v11 }
  0x1a   : > { %706 = vmatpush3.bf16.msra.mxu1 %v741_v12  ;;  %676 = vmatprep.subr.bf16.mxu0 %v742_v13 }
  0x1b   : > { %707 = vmatprep.subr.bf16.mxu1 %v766_v1 }
  0x1d   : > { %677 = vmatpush3.bf16.msra.mxu0 %v743_v14 }
  0x1e   : > { %708 = vmatpush3.bf16.msra.mxu1 %v744_v15  ;;  %678 = vmatprep.subr.bf16.mxu0 %v745_v16 }
  0x1f   : > { %709 = vmatprep.subr.bf16.mxu1 %v766_v1 }
  0x21   : > { %679 = vmatpush3.bf16.msra.mxu0 %v746_v17 }
  0x22   : > { %710 = vmatpush3.bf16.msra.mxu1 %v747_v18  ;;  %680 = vmatprep.subr.bf16.mxu0 %v748_v19 }
  0x23   : > { %711 = vmatprep.subr.bf16.mxu1 %v766_v1 }
  0x25   : > { %681 = vmatpush3.bf16.msra.mxu0 %v749_v20 }
  0x26   : > { %712 = vmatpush3.bf16.msra.mxu1 %v750_v21  ;;  %682 = vmatprep.subr.bf16.mxu0 %v751_v22 }
  0x27   : > { %713 = vmatprep.subr.bf16.mxu1 %v766_v1 }
  0x29   : > { %683 = vmatpush3.bf16.msra.mxu0 %v752_v24 }
  0x2a   : > { %714 = vmatpush3.bf16.msra.mxu1 %v753_v25 }
  0x2c   : > { %479 = vmatmul.mubr.bf16.vlgmr.msra.gmra.mxu0 %v754_v26 }
  0x2d   : > { %716 = vmatmul.mubr.bf16.vlgmr.msra.gmra.mxu1 %v757_v27 }
  0xec   : > { %v684_v28 = vpop.f32.mrf.mxu0 }
  0xed   : > { %v521_v29 = vpop.f32.mrf.mxu1 }
  0xee   : > { %v685_v31 = vpop.f32.mrf.mxu0 }
  0xef   : > { %v686_v32 = vadd.f32 %v685_v31, %v684_v28  ;;  %v717_v33 = vpop.f32.mrf.mxu1 }
  0xf0   : > { %v687_v35 = vpop.f32.mrf.mxu0 }
  0xf1   : > { %v481_v36 = vadd.f32 %v686_v32, %v625_v30  ;;  %v524_v37 = vpop.f32.mrf.mxu1 }
  0xf2   : > { %v688_v38 = vpop.f32.mrf.mxu0 }
  0xf3   : > { %v522_v39 = vadd.f32 %v521_v29, %v481_v36  ;;  %v689_v41 = vadd.f32 %v688_v38, %v687_v35  ;;  %v718_v42 = vpop.f32.mrf.mxu1 }
  0xf5   : > { %v484_v43 = vadd.f32 %v689_v41, %v625_v30  ;;  %v532_v45 = vadd.f32 %v661_v40, %v522_v39 }
  0xf7   : > { %v525_v46 = vadd.f32 %v524_v37, %v484_v43  ;;  %v534_v48 = vmax.f32 %v532_v45, 0.0 }
  0xf9   : > { %v533_v47 = vadd.f32 %v662_v44, %v525_v46 }
  0xfb   : > { %v535_v49 = vmax.f32 %v533_v47, 0.0 }
  0xfd   : > { %v666_v50 = vpack.c.bf16 %v535_v49, %v534_v48 }
  0xff   : > { %667 = vst [vmem:[%s224_s28] sm:$0xff] %v666_v50  }
 0x100 PF: > { %s14_s15 = sadd.s32 1, %s764_s15  }
 0x101   : > { %p11_p4 = scmp.ge.s32.totalorder %s14_s15, 4  }
 0x103   :  { %13 = sbr.rel (!%p11_p4) target bundleno = 1 (0x1), region = 69 }

// kernel: erfnet_forward.129
= control target key start
LH: loop header
LB: loop body
LE: loop exit
PB: predicated region body
PF: predicated region fallthrough
CT: control target
= control target key end

     0   :  { %s986_s12 = smov 0   ;;  %s1210_s0 = inlined_call_operand.vmem [shape: bf16[32,512], index: 0, kind: input, shape index: {}]   ;;  %s1211_s1 = inlined_call_operand.vmem [shape: bf16[512,256], index: 1, kind: input, shape index: {}]   ;;  %s1212_s2 = inlined_call_operand.vmem [shape: f32[1,256], index: 2, kind: input, shape index: {}]   ;;  %s1213_s3 = inlined_call_operand.vmem [shape: bf16[32,256], index: 3, kind: output, shape index: {}]  }
   0x1 LB: > { %s761_s13 = sadd.s32 4294967295, %s964_s12   ;;  %p765_p0 = scmp.ge.s32.totalorder %s964_s12, 1  ;;  %s964_s12 = sphi %s986_s12, %s13_s12  }
   0x2   : > { %p139_p1 = scmp.lt.s32.totalorder %s964_s12, 3 }
   0x4   : > { %p140_p2 = pnand %p765_p0, %p139_p1 }
   0x5   : > { %s766_s24 = sshll.u32 (!%p140_p2), %s761_s13, 1 }
   0x6   : > { %143 = sbr.rel (%p140_p2) target bundleno = 284 (0x11c), region = 32  ;;  %p166_p3 = scmp.lt.s32.totalorder (!%p140_p2), %s766_s24, 3 }
   0xb   : > { %v856_v0 = vld [vmem:[%s1211_s1 + $0x74] ss:$8 sps:$4 sm:$0xff]   ;;  %v860_v2 = vld [vmem:[%s1211_s1 + $0x70] ss:$8 sps:$4 sm:$0xff]   ;;  %v862_v4 = vld [vmem:[%s1211_s1 + $0x64] ss:$8 sps:$4 sm:$0xff]  }
   0xc   : > { %v858_v1 = vld [vmem:[%s1211_s1 + $0x174] ss:$8 sps:$4 sm:$0xff]   ;;  %599 = vmatprep.subr.bf16.mxu0 %v856_v0  ;;  %v861_v3 = vld [vmem:[%s1211_s1 + $0x170] ss:$8 sps:$4 sm:$0xff]   ;;  %v864_v5 = vld [vmem:[%s1211_s1 + $0x164] ss:$8 sps:$4 sm:$0xff]  }
   0xd   : > { %642 = vmatprep.subr.bf16.mxu1 %v858_v1  ;;  %600 = vmatpush1.bf16.msra.mxu0 %v860_v2  ;;  %v866_v6 = vld [vmem:[%s1211_s1 + $0x60] ss:$8 sps:$4 sm:$0xff]   ;;  %v868_v8 = vld [vmem:[%s1211_s1 + $0x54] ss:$8 sps:$4 sm:$0xff]   ;;  %v872_v10 = vld [vmem:[%s1211_s1 + $0x50] ss:$8 sps:$4 sm:$0xff]  }
   0xe   : > { %643 = vmatpush1.bf16.msra.mxu1 %v861_v3  ;;  %601 = vmatprep.subr.bf16.mxu0 %v862_v4  ;;  %v867_v7 = vld [vmem:[%s1211_s1 + $0x160] ss:$8 sps:$4 sm:$0xff]   ;;  %v870_v9 = vld [vmem:[%s1211_s1 + $0x154] ss:$8 sps:$4 sm:$0xff]   ;;  %v873_v11 = vld [vmem:[%s1211_s1 + $0x150] ss:$8 sps:$4 sm:$0xff]   ;;  %v249_v4 = vlaneseq }
   0xf   : > { %644 = vmatprep.subr.bf16.mxu1 %v864_v5  ;;  %v874_v12 = vld [vmem:[%s1211_s1 + $0x44] ss:$8 sps:$4 sm:$0xff]   ;;  %v878_v14 = vld [vmem:[%s1211_s1 + $0x40] ss:$8 sps:$4 sm:$0xff]   ;;  %v880_v16 = vld [vmem:[%s1211_s1 + $0x34] ss:$8 sps:$4 sm:$0xff]  }
  0x10   : > { %v876_v13 = vld [vmem:[%s1211_s1 + $0x144] ss:$8 sps:$4 sm:$0xff]   ;;  %v879_v15 = vld [vmem:[%s1211_s1 + $0x140] ss:$8 sps:$4 sm:$0xff]   ;;  %v882_v17 = vld [vmem:[%s1211_s1 + $0x134] ss:$8 sps:$4 sm:$0xff]  }
  0x11   : > { %602 = vmatpush1.bf16.msra.mxu0 %v866_v6  ;;  %v884_v18 = vld [vmem:[%s1211_s1 + $0x30] ss:$8 sps:$4 sm:$0xff]   ;;  %v886_v20 = vld [vmem:[%s1211_s1 + $0x24] ss:$8 sps:$4 sm:$0xff]   ;;  %v890_v22 = vld [vmem:[%s1211_s1 + $0x20] ss:$8 sps:$4 sm:$0xff]  }
  0x12   : > { %645 = vmatpush1.bf16.msra.mxu1 %v867_v7  ;;  %603 = vmatprep.subr.bf16.mxu0 %v868_v8  ;;  %v885_v19 = vld [vmem:[%s1211_s1 + $0x130] ss:$8 sps:$4 sm:$0xff]   ;;  %v888_v21 = vld [vmem:[%s1211_s1 + $0x124] ss:$8 sps:$4 sm:$0xff]   ;;  %v891_v23 = vld [vmem:[%s1211_s1 + $0x120] ss:$8 sps:$4 sm:$0xff]  }
  0x13   : > { %646 = vmatprep.subr.bf16.mxu1 %v870_v9  ;;  %v892_v24 = vld [vmem:[%s1211_s1 + $0x14] ss:$8 sps:$4 sm:$0xff]   ;;  %v896_v26 = vld [vmem:[%s1211_s1 + $0x10] ss:$8 sps:$4 sm:$0xff]   ;;  %v898_v28 = vld [vmem:[%s1211_s1 + $0x4] ss:$8 sps:$4 sm:$0xff]  }
  0x14   : > { %v894_v25 = vld [vmem:[%s1211_s1 + $0x114] ss:$8 sps:$4 sm:$0xff]   ;;  %v897_v27 = vld [vmem:[%s1211_s1 + $0x110] ss:$8 sps:$4 sm:$0xff]   ;;  %v900_v29 = vld [vmem:[%s1211_s1 + $0x104] ss:$8 sps:$4 sm:$0xff]  }
  0x15   : > { %604 = vmatpush1.bf16.msra.mxu0 %v872_v10  ;;  %v902_v30 = vld [vmem:[%s1211_s1] ss:$8 sps:$4 sm:$0xff]   ;;  %v904_v32 = vld [vmem:[%s1211_s1 + $0xf4] ss:$8 sps:$4 sm:$0xff]   ;;  %v908_v34 = vld [vmem:[%s1211_s1 + $0xf0] ss:$8 sps:$4 sm:$0xff]  }
  0x16   : > { %647 = vmatpush1.bf16.msra.mxu1 %v873_v11  ;;  %605 = vmatprep.subr.bf16.mxu0 %v874_v12  ;;  %v903_v31 = vld [vmem:[%s1211_s1 + $0x100] ss:$8 sps:$4 sm:$0xff]   ;;  %v906_v33 = vld [vmem:[%s1211_s1 + $0x1f4] ss:$8 sps:$4 sm:$0xff]   ;;  %v909_v35 = vld [vmem:[%s1211_s1 + $0x1f0] ss:$8 sps:$4 sm:$0xff]  }
  0x17   : > { %648 = vmatprep.subr.bf16.mxu1 %v876_v13  ;;  %v910_v36 = vld [vmem:[%s1211_s1 + $0xe4] ss:$8 sps:$4 sm:$0xff]   ;;  %s1215_s24 = smov (!%p166_p3, %s766_s24), 3  ;;  %v914_v38 = vld [vmem:[%s1211_s1 + $0xe0] ss:$8 sps:$4 sm:$0xff]   ;;  %v250_v5 = vshrl.u32 %v249_v4, 7 }
  0x18   : > { %v912_v37 = vld [vmem:[%s1211_s1 + $0x1e4] ss:$8 sps:$4 sm:$0xff]   ;;  %v915_v39 = vld [vmem:[%s1211_s1 + $0x1e0] ss:$8 sps:$4 sm:$0xff]   ;;  %v916_v40 = vld [vmem:[%s1211_s1 + $0xd4] ss:$8 sps:$4 sm:$0xff]  }
  0x19   : > { %606 = vmatpush1.bf16.msra.mxu0 %v878_v14  ;;  %v918_v41 = vld [vmem:[%s1211_s1 + $0x1d4] ss:$8 sps:$4 sm:$0xff]   ;;  %s844_s23 = sshll.u32 %s1215_s24, 4  ;;  %v920_v42 = vld [vmem:[%s1211_s1 + $0xd0] ss:$8 sps:$4 sm:$0xff]   ;;  %v251_v6 = vsub.s32 0, %v250_v5 }
  0x1a   : > { %649 = vmatpush1.bf16.msra.mxu1 %v879_v15  ;;  %607 = vmatprep.subr.bf16.mxu0 %v880_v16  ;;  %v921_v43 = vld [vmem:[%s1211_s1 + $0x1d0] ss:$8 sps:$4 sm:$0xff]   ;;  %v922_v44 = vld [vmem:[%s1211_s1 + $0xc4] ss:$8 sps:$4 sm:$0xff]   ;;  %s1137_s13 = scalar_lea.vmem %s1210_s0, %s844_s23  ;;  %v926_v46 = vld [vmem:[%s1211_s1 + $0xc0] ss:$8 sps:$4 sm:$0xff]  }
  0x1b   : > { %650 = vmatprep.subr.bf16.mxu1 %v882_v17  ;;  %v924_v45 = vld [vmem:[%s1211_s1 + $0x1c4] ss:$8 sps:$4 sm:$0xff]   ;;  %v927_v48 = vld [vmem:[%s1211_s1 + $0x1c0] ss:$8 sps:$4 sm:$0xff]   ;;  %v928_v49 = vld [vmem:[%s1211_s1 + $0xb4] ss:$8 sps:$4 sm:$0xff]  }
  0x1c   : > { %v954_v47 = vld [vmem:[%s1137_s13 + $0x4] ss:$16 sps:$4 sm:$0xff]   ;;  %v957_v51 = vld [vmem:[%s1137_s13 + $0xc] ss:$16 sps:$4 sm:$0xff]   ;;  %v932_v52 = vld [vmem:[%s1211_s1 + $0xb0] ss:$8 sps:$4 sm:$0xff]  }
  0x1d   : > { %608 = vmatpush1.bf16.msra.mxu0 %v884_v18  ;;  %v930_v50 = vld [vmem:[%s1211_s1 + $0x1b4] ss:$8 sps:$4 sm:$0xff]   ;;  %631 = vmatprep.mubr.bf16.mxu0 %v954_v47  ;;  %v933_v53 = vld [vmem:[%s1211_s1 + $0x1b0] ss:$8 sps:$4 sm:$0xff]   ;;  %v934_v54 = vld [vmem:[%s1211_s1 + $0xa4] ss:$8 sps:$4 sm:$0xff]  }
  0x1e   : > { %651 = vmatpush1.bf16.msra.mxu1 %v885_v19  ;;  %609 = vmatprep.subr.bf16.mxu0 %v886_v20  ;;  %v936_v55 = vld [vmem:[%s1211_s1 + $0x1a4] ss:$8 sps:$4 sm:$0xff]   ;;  %v938_v56 = vld [vmem:[%s1211_s1 + $0xa0] ss:$8 sps:$4 sm:$0xff]   ;;  %v940_v58 = vld [vmem:[%s1211_s1 + $0x94] ss:$8 sps:$4 sm:$0xff]  }
  0x1f   : > { %652 = vmatprep.subr.bf16.mxu1 %v888_v21  ;;  %674 = vmatprep.mubr.bf16.mxu1 %v957_v51  ;;  %v939_v57 = vld [vmem:[%s1211_s1 + $0x1a0] ss:$8 sps:$4 sm:$0xff]   ;;  %v942_v59 = vld [vmem:[%s1211_s1 + $0x194] ss:$8 sps:$4 sm:$0xff]   ;;  %v944_v60 = vld [vmem:[%s1211_s1 + $0x90] ss:$8 sps:$4 sm:$0xff]  }
  0x20   : > { %v945_v61 = vld [vmem:[%s1211_s1 + $0x190] ss:$8 sps:$4 sm:$0xff]   ;;  %v946_v62 = vld [vmem:[%s1211_s1 + $0x84] ss:$8 sps:$4 sm:$0xff]   ;;  %v950_v0 = vld [vmem:[%s1211_s1 + $0x80] ss:$8 sps:$4 sm:$0xff]  }
  0x21   : > { %610 = vmatpush1.bf16.msra.mxu0 %v890_v22  ;;  %v948_v63 = vld [vmem:[%s1211_s1 + $0x184] ss:$8 sps:$4 sm:$0xff]   ;;  %v951_v1 = vld [vmem:[%s1211_s1 + $0x180] ss:$8 sps:$4 sm:$0xff]   ;;  %v255_v8 = vsub.s32 1, %v250_v5 }
  0x22   : > { %653 = vmatpush1.bf16.msra.mxu1 %v891_v23  ;;  %611 = vmatprep.subr.bf16.mxu0 %v892_v24  ;;  %v952_v2 = vld [vmem:[%s1137_s13] ss:$16 sps:$4 sm:$0xff]   ;;  %v955_v3 = vld [vmem:[%s1137_s13 + $0x8] ss:$16 sps:$4 sm:$0xff]   ;;  %s845_s13 = sshll.u32 %s1215_s24, 3 }
  0x23   : > { %654 = vmatprep.subr.bf16.mxu1 %v894_v25  ;;  %v247_v7 = vld [vmem:[%s1212_s2] sm:$0x3]  ;;  %s177_s27 = scalar_lea.vmem %s1213_s3, %s845_s13 }
  0x24   : > { %v252_v9 = vrot.slane %v247_v7, %v251_v6  ;;  %v256_v10 = vrot.slane %v247_v7, %v255_v8 }
  0x25   : > { %612 = vmatpush1.bf16.msra.mxu0 %v896_v26 }
  0x26   : > { %655 = vmatpush1.bf16.msra.mxu1 %v897_v27  ;;  %613 = vmatprep.subr.bf16.mxu0 %v898_v28 }
  0x27   : > { %656 = vmatprep.subr.bf16.mxu1 %v900_v29 }
  0x29   : > { %614 = vmatpush1.bf16.msra.mxu0 %v902_v30 }
  0x2a   : > { %657 = vmatpush1.bf16.msra.mxu1 %v903_v31  ;;  %615 = vmatprep.subr.bf16.mxu0 %v904_v32 }
  0x2b   : > { %658 = vmatprep.subr.bf16.mxu1 %v906_v33 }
  0x2d   : > { %616 = vmatpush2.bf16.msra.mxu0 %v908_v34 }
  0x2e   : > { %659 = vmatpush2.bf16.msra.mxu1 %v909_v35  ;;  %617 = vmatprep.subr.bf16.mxu0 %v910_v36 }
  0x2f   : > { %660 = vmatprep.subr.bf16.mxu1 %v912_v37 }
  0x31   : > { %618 = vmatpush2.bf16.msra.mxu0 %v914_v38 }
  0x32   : > { %661 = vmatpush2.bf16.msra.mxu1 %v915_v39  ;;  %619 = vmatprep.subr.bf16.mxu0 %v916_v40 }
  0x33   : > { %662 = vmatprep.subr.bf16.mxu1 %v918_v41 }
  0x35   : > { %620 = vmatpush2.bf16.msra.mxu0 %v920_v42 }
  0x36   : > { %663 = vmatpush2.bf16.msra.mxu1 %v921_v43  ;;  %621 = vmatprep.subr.bf16.mxu0 %v922_v44 }
  0x37   : > { %664 = vmatprep.subr.bf16.mxu1 %v924_v45 }
  0x39   : > { %622 = vmatpush2.bf16.msra.mxu0 %v926_v46 }
  0x3a   : > { %665 = vmatpush2.bf16.msra.mxu1 %v927_v48  ;;  %623 = vmatprep.subr.bf16.mxu0 %v928_v49 }
  0x3b   : > { %666 = vmatprep.subr.bf16.mxu1 %v930_v50 }
  0x3d   : > { %624 = vmatpush2.bf16.msra.mxu0 %v932_v52 }
  0x3e   : > { %667 = vmatpush2.bf16.msra.mxu1 %v933_v53  ;;  %625 = vmatprep.subr.bf16.mxu0 %v934_v54 }
  0x3f   : > { %668 = vmatprep.subr.bf16.mxu1 %v936_v55 }
  0x41   : > { %626 = vmatpush2.bf16.msra.mxu0 %v938_v56 }
  0x42   : > { %669 = vmatpush2.bf16.msra.mxu1 %v939_v57  ;;  %627 = vmatprep.subr.bf16.mxu0 %v940_v58 }
  0x43   : > { %670 = vmatprep.subr.bf16.mxu1 %v942_v59 }
  0x45   : > { %628 = vmatpush2.bf16.msra.mxu0 %v944_v60 }
  0x46   : > { %671 = vmatpush2.bf16.msra.mxu1 %v945_v61  ;;  %629 = vmatprep.subr.bf16.mxu0 %v946_v62 }
  0x47   : > { %672 = vmatprep.subr.bf16.mxu1 %v948_v63 }
  0x49   : > { %630 = vmatpush2.bf16.msra.mxu0 %v950_v0 }
  0x4a   : > { %673 = vmatpush2.bf16.msra.mxu1 %v951_v1 }
  0x4c   : > { %632 = vmatmul.mubr.bf16.vlgmr.msra.gmra.mxu0 %v952_v2 }
  0x4d   : > { %675 = vmatmul.mubr.bf16.vlgmr.msra.gmra.mxu1 %v955_v3 }
 0x10c   : > { %v633_v11 = vpop.f32.mrf.mxu0 }
 0x10d   : > { %v676_v12 = vpop.f32.mrf.mxu1  ;;  %v634_v13 = vadd.f32 %v633_v11, %v252_v9 }
 0x10e   : > { %v635_v14 = vpop.f32.mrf.mxu0 }
 0x10f   : > { %v678_v15 = vpop.f32.mrf.mxu1  ;;  %v677_v16 = vadd.f32 %v676_v12, %v634_v13  ;;  %v636_v17 = vadd.f32 %v635_v14, %v256_v10 }
 0x110   : > { %v637_v18 = vpop.f32.mrf.mxu0 }
 0x111   : > { %v680_v19 = vpop.f32.mrf.mxu1  ;;  %v679_v20 = vadd.f32 %v678_v15, %v636_v17  ;;  %v638_v21 = vadd.f32 %v637_v18, %v252_v9  ;;  %v685_v23 = vmax.f32 %v677_v16, 0.0 }
 0x112   : > { %v639_v22 = vpop.f32.mrf.mxu0 }
 0x113   : > { %v686_v24 = vmax.f32 %v679_v20, 0.0  ;;  %v681_v25 = vadd.f32 %v680_v19, %v638_v21  ;;  %v640_v26 = vadd.f32 %v639_v22, %v256_v10  ;;  %v682_v27 = vpop.f32.mrf.mxu1 }
 0x115   : > { %v846_v28 = vpack.c.bf16 %v686_v24, %v685_v23  ;;  %v683_v29 = vadd.f32 %v682_v27, %v640_v26  ;;  %v687_v30 = vmax.f32 %v681_v25, 0.0 }
 0x117   : > { %701 = vst [vmem:[%s177_s27] sm:$0xff] %v846_v28  ;;  %v688_v31 = vmax.f32 %v683_v29, 0.0 }
 0x119   : > { %v847_v32 = vpack.c.bf16 %v688_v31, %v687_v30 }
 0x11b   : > { %702 = vst [vmem:[%s177_s27 + $0x8] sm:$0xff] %v847_v32 }
 0x11c PF: > { %s13_s12 = sadd.s32 1, %s964_s12  }
 0x11d   : > { %p10_p4 = scmp.ge.s32.totalorder %s13_s12, 4  }
 0x11f   :  { %12 = sbr.rel (!%p10_p4) target bundleno = 1 (0x1), region = 62 }

// kernel: erfnet_forward.138
= control target key start
LH: loop header
LB: loop body
LE: loop exit
PB: predicated region body
PF: predicated region fallthrough
CT: control target
= control target key end

     0   :  { %s705_s12 = smov 0   ;;  %s805_s0 = inlined_call_operand.vmem [shape: bf16[128,256], index: 0, kind: input, shape index: {}]   ;;  %s806_s1 = inlined_call_operand.vmem [shape: bf16[256,64], index: 1, kind: input, shape index: {}]   ;;  %s807_s2 = inlined_call_operand.vmem [shape: f32[1,64], index: 2, kind: input, shape index: {}]   ;;  %s808_s3 = inlined_call_operand.vmem [shape: bf16[128,64], index: 3, kind: output, shape index: {}]  }
   0x1 LB: > { %s531_s13 = sadd.s32 4294967295, %s683_s12   ;;  %p535_p0 = scmp.ge.s32.totalorder %s683_s12, 1  ;;  %s683_s12 = sphi %s705_s12, %s13_s12  }
   0x2   : > { %p139_p1 = scmp.lt.s32.totalorder %s683_s12, 3 }
   0x4   : > { %p140_p2 = pnand %p535_p0, %p139_p1 }
   0x5   : > { %s536_s16 = sshll.u32 (!%p140_p2), %s531_s13, 3 }
   0x6   : > { %143 = sbr.rel (%p140_p2) target bundleno = 260 (0x104), region = 32  ;;  %p165_p3 = scmp.lt.s32.totalorder (!%p140_p2), %s536_s16, 15 }
   0xb   : > { %v649_v0 = vld [vmem:[%s806_s1 + $0x78] sm:$0xff]   ;;  %v651_v2 = vld [vmem:[%s806_s1 + $0x70] sm:$0xff]   ;;  %v653_v4 = vld [vmem:[%s806_s1 + $0x68] sm:$0xff]   ;;  %s810_s16 = smov (!%p165_p3, %s536_s16), 15  ;;  %vm466_vm0 = vcmask 519168  }
   0xc   : > { %v650_v1 = vld [vmem:[%s806_s1 + $0x38] sm:$0xff]   ;;  %585 = vmatprep.subr.bf16.mxu0 %v649_v0  ;;  %625 = vmatprep.subr.bf16.mxu1 %v649_v0  ;;  %v652_v3 = vld [vmem:[%s806_s1 + $0x30] sm:$0xff]   ;;  %v654_v5 = vld [vmem:[%s806_s1 + $0x28] sm:$0xff]   ;;  %s576_s4 = sshll.u32 %s810_s16, 3  ;;  %s540_s28 = sshll.u32 %s810_s16, 2 }
   0xd   : > { %586 = vmatpush3.bf16.msra.mxu0 %v650_v1  ;;  %633 = vmatpush3.bf16.msra.mxu1 %v650_v1  ;;  %v655_v6 = vld [vmem:[%s806_s1 + $0x60] sm:$0xff]   ;;  %v657_v8 = vld [vmem:[%s806_s1 + $0x58] sm:$0xff]   ;;  %s746_s9 = scalar_lea.vmem %s805_s0, %s576_s4  ;;  %v659_v10 = vld [vmem:[%s806_s1 + $0x50] sm:$0xff]   ;;  %s784_s4 = scalar_lea.vmem %s808_s3, %s540_s28 }
   0xe   : > { %587 = vmatprep.subr.bf16.mxu0 %v651_v2  ;;  %626 = vmatprep.subr.bf16.mxu1 %v651_v2  ;;  %v656_v7 = vld [vmem:[%s806_s1 + $0x20] sm:$0xff]   ;;  %v658_v9 = vld [vmem:[%s806_s1 + $0x18] sm:$0xff]   ;;  %v660_v13 = vld [vmem:[%s806_s1 + $0x10] sm:$0xff]  }
   0xf   : > { %v667_v11 = vld [vmem:[%s746_s9 + $0x4] ss:$8 sps:$4 sm:$0xff]   ;;  %v665_v18 = vld [vmem:[%s746_s9] ss:$8 sps:$4 sm:$0xff]   ;;  %v671_v20 = vld [vmem:[%s746_s9 + $0x14] ss:$8 sps:$4 sm:$0xff]  }
  0x10   : > { %v670_v12 = vld [vmem:[%s746_s9 + $0x24] ss:$8 sps:$4 sm:$0xff]   ;;  %393 = vmatprep.mubr.bf16.mxu0 %v667_v11  ;;  %v668_v19 = vld [vmem:[%s746_s9 + $0x20] ss:$8 sps:$4 sm:$0xff]   ;;  %v673_v21 = vld [vmem:[%s746_s9 + $0x34] ss:$8 sps:$4 sm:$0xff]  }
  0x11   : > { %588 = vmatpush3.bf16.msra.mxu0 %v652_v3  ;;  %634 = vmatpush3.bf16.msra.mxu1 %v652_v3  ;;  %v661_v14 = vld [vmem:[%s806_s1 + $0x48] sm:$0xff]   ;;  %v663_v16 = vld [vmem:[%s806_s1 + $0x40] sm:$0xff]   ;;  %v675_v22 = vld [vmem:[%s746_s9 + $0x10] ss:$8 sps:$4 sm:$0xff]  }
  0x12   : > { %589 = vmatprep.subr.bf16.mxu0 %v653_v4  ;;  %627 = vmatprep.subr.bf16.mxu1 %v653_v4  ;;  %v662_v15 = vld [vmem:[%s806_s1 + $0x8] sm:$0xff]   ;;  %v664_v17 = vld [vmem:[%s806_s1] sm:$0xff]   ;;  %v676_v23 = vld [vmem:[%s746_s9 + $0x30] ss:$8 sps:$4 sm:$0xff]  }
  0x13   : > { %409 = vmatprep.mubr.bf16.mxu1 %v670_v12  ;;  %v541_v26 = vld [vmem:[%s807_s2] ss:$0 sm:$0xff] }
  0x15   : > { %590 = vmatpush3.bf16.msra.mxu0 %v654_v5  ;;  %635 = vmatpush3.bf16.msra.mxu1 %v654_v5 }
  0x16   : > { %591 = vmatprep.subr.bf16.mxu0 %v655_v6  ;;  %628 = vmatprep.subr.bf16.mxu1 %v655_v6 }
  0x19   : > { %592 = vmatpush3.bf16.msra.mxu0 %v656_v7  ;;  %636 = vmatpush3.bf16.msra.mxu1 %v656_v7 }
  0x1a   : > { %593 = vmatprep.subr.bf16.mxu0 %v657_v8  ;;  %629 = vmatprep.subr.bf16.mxu1 %v657_v8 }
  0x1d   : > { %594 = vmatpush3.bf16.msra.mxu0 %v658_v9  ;;  %637 = vmatpush3.bf16.msra.mxu1 %v658_v9 }
  0x1e   : > { %595 = vmatprep.subr.bf16.mxu0 %v659_v10  ;;  %630 = vmatprep.subr.bf16.mxu1 %v659_v10 }
  0x21   : > { %596 = vmatpush3.bf16.msra.mxu0 %v660_v13  ;;  %638 = vmatpush3.bf16.msra.mxu1 %v660_v13 }
  0x22   : > { %597 = vmatprep.subr.bf16.mxu0 %v661_v14  ;;  %631 = vmatprep.subr.bf16.mxu1 %v661_v14 }
  0x25   : > { %598 = vmatpush3.bf16.msra.mxu0 %v662_v15  ;;  %639 = vmatpush3.bf16.msra.mxu1 %v662_v15 }
  0x26   : > { %599 = vmatprep.subr.bf16.mxu0 %v663_v16  ;;  %632 = vmatprep.subr.bf16.mxu1 %v663_v16 }
  0x29   : > { %600 = vmatpush3.bf16.msra.mxu0 %v664_v17  ;;  %640 = vmatpush3.bf16.msra.mxu1 %v664_v17 }
  0x2c   : > { %394 = vmatmul.mubr.bf16.vlgmr.msra.gmra.mxu0 %v665_v18  ;;  %410 = vmatmul.mubr.bf16.vlgmr.msra.gmra.mxu1 %v668_v19 }
  0x2d   : > { %401 = vmatprep.mubr.bf16.mxu0 %v671_v20  ;;  %417 = vmatprep.mubr.bf16.mxu1 %v673_v21 }
  0x34   : > { %402 = vmatmul.mubr.bf16.gmra.mxu0 %v675_v22  ;;  %418 = vmatmul.mubr.bf16.gmra.mxu1 %v676_v23 }
  0xec   : > { %v601_v24 = vpop.f32.mrf.mxu0  ;;  %v613_v25 = vpop.f32.mrf.mxu1 }
  0xee   : > { %v602_v27 = vpop.f32.mrf.mxu0  ;;  %v614_v28 = vpop.f32.mrf.mxu1 }
  0xef   : > { %v603_v29 = vadd.f32 %v602_v27, %v601_v24  ;;  %v615_v30 = vadd.f32 %v614_v28, %v613_v25 }
  0xf0   : > { %v604_v31 = vpop.f32.mrf.mxu0  ;;  %v616_v32 = vpop.f32.mrf.mxu1 }
  0xf1   : > { %v396_v33 = vadd.f32 %v603_v29, %v541_v26  ;;  %v412_v34 = vadd.f32 %v615_v30, %v541_v26 }
  0xf2   : > { %v605_v35 = vpop.f32.mrf.mxu0  ;;  %v617_v36 = vpop.f32.mrf.mxu1 }
  0xf3   : > { %v426_v37 = vmax.f32 %v396_v33, 0.0  ;;  %v430_v38 = vmax.f32 %v412_v34, 0.0  ;;  %v606_v39 = vadd.f32 %v605_v35, %v604_v31  ;;  %v618_v40 = vadd.f32 %v617_v36, %v616_v32 }
  0xf4   : > { %v607_v41 = vpop.f32.mrf.mxu0  ;;  %v619_v42 = vpop.f32.mrf.mxu1 }
  0xf5   : > { %v577_v43 = vpack.c.bf16 %v426_v37, %v426_v37  ;;  %v581_v44 = vpack.c.bf16 %v430_v38, %v430_v38  ;;  %v399_v45 = vadd.f32 %v606_v39, %v541_v26  ;;  %v415_v46 = vadd.f32 %v618_v40, %v541_v26 }
  0xf6   : > { %v608_v47 = vpop.f32.mrf.mxu0  ;;  %v620_v48 = vpop.f32.mrf.mxu1 }
  0xf7   : > { %467 = vst.msk [vmem:[%s784_s4] sm:$0xf] %vm466_vm0, %v577_v43  ;;  %471 = vst.msk [vmem:[%s784_s4 + $0x10] sm:$0xf] %vm466_vm0, %v581_v44  ;;  %v427_v49 = vmax.f32 %v399_v45, 0.0  ;;  %v431_v50 = vmax.f32 %v415_v46, 0.0  ;;  %v609_v51 = vadd.f32 %v608_v47, %v607_v41  ;;  %v621_v52 = vadd.f32 %v620_v48, %v619_v42 }
  0xf8   : > { %v610_v53 = vpop.f32.mrf.mxu0  ;;  %v622_v54 = vpop.f32.mrf.mxu1 }
  0xf9   : > { %v578_v55 = vpack.c.bf16 %v427_v49, %v427_v49  ;;  %v582_v56 = vpack.c.bf16 %v431_v50, %v431_v50  ;;  %v404_v57 = vadd.f32 %v609_v51, %v541_v26  ;;  %v420_v58 = vadd.f32 %v621_v52, %v541_v26 }
  0xfa   : > { %v611_v59 = vpop.f32.mrf.mxu0  ;;  %v623_v60 = vpop.f32.mrf.mxu1 }
  0xfb   : > { %468 = vst.msk [vmem:[%s784_s4 + $0x4] sm:$0xf] %vm466_vm0, %v578_v55  ;;  %472 = vst.msk [vmem:[%s784_s4 + $0x14] sm:$0xf] %vm466_vm0, %v582_v56  ;;  %v428_v61 = vmax.f32 %v404_v57, 0.0  ;;  %v432_v62 = vmax.f32 %v420_v58, 0.0  ;;  %v612_v63 = vadd.f32 %v611_v59, %v610_v53  ;;  %v624_v0 = vadd.f32 %v623_v60, %v622_v54 }
  0xfd   : > { %v579_v1 = vpack.c.bf16 %v428_v61, %v428_v61  ;;  %v583_v2 = vpack.c.bf16 %v432_v62, %v432_v62  ;;  %v407_v3 = vadd.f32 %v612_v63, %v541_v26  ;;  %v423_v4 = vadd.f32 %v624_v0, %v541_v26 }
  0xff   : > { %469 = vst.msk [vmem:[%s784_s4 + $0x8] sm:$0xf] %vm466_vm0, %v579_v1  ;;  %473 = vst.msk [vmem:[%s784_s4 + $0x18] sm:$0xf] %vm466_vm0, %v583_v2  ;;  %v429_v5 = vmax.f32 %v407_v3, 0.0  ;;  %v433_v6 = vmax.f32 %v423_v4, 0.0 }
 0x101   : > { %v580_v7 = vpack.c.bf16 %v429_v5, %v429_v5  ;;  %v584_v8 = vpack.c.bf16 %v433_v6, %v433_v6 }
 0x103   : > { %470 = vst.msk [vmem:[%s784_s4 + $0xc] sm:$0xf] %vm466_vm0, %v580_v7  ;;  %474 = vst.msk [vmem:[%s784_s4 + $0x1c] sm:$0xf] %vm466_vm0, %v584_v8 }
 0x104 PF: > { %s13_s12 = sadd.s32 1, %s683_s12  }
 0x105   : > { %p10_p4 = scmp.ge.s32.totalorder %s13_s12, 4  }
 0x107   :  { %12 = sbr.rel (!%p10_p4) target bundleno = 1 (0x1), region = 62 }

// kernel: erfnet_forward.139
= control target key start
LH: loop header
LB: loop body
LE: loop exit
PB: predicated region body
PF: predicated region fallthrough
CT: control target
= control target key end

     0   :  { %s1006_s12 = smov 0   ;;  %s1176_s0 = inlined_call_operand.vmem [shape: bf16[512,48], index: 0, kind: input, shape index: {}]   ;;  %s1177_s1 = inlined_call_operand.vmem [shape: bf16[48,16], index: 1, kind: input, shape index: {}]   ;;  %s1178_s2 = inlined_call_operand.vmem [shape: f32[1,16], index: 2, kind: input, shape index: {}]   ;;  %s1179_s3 = inlined_call_operand.vmem [shape: bf16[512,16], index: 3, kind: output, shape index: {}]  }
   0x1 LB: > { %s777_s13 = sadd.s32 4294967295, %s984_s12   ;;  %p781_p0 = scmp.ge.s32.totalorder %s984_s12, 1  ;;  %s984_s12 = sphi %s1006_s12, %s13_s12  }
   0x2   : > { %p138_p1 = scmp.lt.s32.totalorder %s984_s12, 3 }
   0x4   : > { %p139_p2 = pnand %p781_p0, %p138_p1 }
   0x5   : > { %s782_s16 = sshll.u32 (!%p139_p2), %s777_s13, 5 }
   0x6   : > { %142 = sbr.rel (%p139_p2) target bundleno = 255 (0xff), region = 32  ;;  %p163_p3 = scmp.lt.s32.totalorder (!%p139_p2), %s782_s16, 63 }
   0xb   : > { %v959_v0 = vld [vmem:[%s1177_s1 + $0x10] sm:$0xff]   ;;  %v960_v1 = vld [vmem:[%s1177_s1 + $0x8] sm:$0xff]   ;;  %s1181_s16 = smov (!%p163_p3, %s782_s16), 63  ;;  %v961_v2 = vld [vmem:[%s1177_s1] sm:$0xff]   ;;  %vm318_vm0 = vcmask 392192   ;;  %vm688_vm1 = vcmask 125952  }
   0xc   : > { %907 = vmatprep.subr.bf16.mxu0 %v959_v0  ;;  %945 = vmatprep.subr.bf16.mxu1 %v959_v0  ;;  %s783_s21 = sshll.u32 %s1181_s16, 2  ;;  %v1068_v19 = vld [vmem:[%s1178_s2] ss:$0 sm:$0xff] }
   0xd   : > { %908 = vmatpush3.bf16.msra.mxu0 %v959_v0  ;;  %948 = vmatpush3.bf16.msra.mxu1 %v959_v0  ;;  %s1031_s24 = scalar_lea.vmem %s1176_s0, %s783_s21  ;;  %s1079_s29 = scalar_lea.vmem %s1179_s3, %s783_s21 }
   0xe   : > { %909 = vmatprep.subr.bf16.mxu0 %v960_v1  ;;  %946 = vmatprep.subr.bf16.mxu1 %v960_v1  ;;  %v962_v3 = vld [vmem:[%s1031_s24] sm:$0xff]   ;;  %v964_v5 = vld [vmem:[%s1031_s24 + $0x8] sm:$0xff]   ;;  %v966_v7 = vld [vmem:[%s1031_s24 + $0x10] sm:$0xff]  }
   0xf   : > { %v963_v4 = vld [vmem:[%s1031_s24 + $0x40] sm:$0xff]   ;;  %913 = vmatprep.mubr.msk.bf16.mxu0 %vm318_vm0, %v962_v3  ;;  %v965_v6 = vld [vmem:[%s1031_s24 + $0x48] sm:$0xff]   ;;  %v967_v8 = vld [vmem:[%s1031_s24 + $0x50] sm:$0xff]  }
  0x10   : > { %929 = vmatprep.mubr.msk.bf16.mxu1 %vm318_vm0, %v963_v4  ;;  %v968_v9 = vld [vmem:[%s1031_s24 + $0x18] sm:$0xff]   ;;  %v970_v11 = vld [vmem:[%s1031_s24 + $0x20] sm:$0xff]   ;;  %v972_v13 = vld [vmem:[%s1031_s24 + $0x28] sm:$0xff]  }
  0x11   : > { %910 = vmatpush3.bf16.msra.mxu0 %v960_v1  ;;  %949 = vmatpush3.bf16.msra.mxu1 %v960_v1  ;;  %v969_v10 = vld [vmem:[%s1031_s24 + $0x58] sm:$0xff]   ;;  %v971_v12 = vld [vmem:[%s1031_s24 + $0x60] sm:$0xff]   ;;  %v973_v14 = vld [vmem:[%s1031_s24 + $0x68] sm:$0xff]  }
  0x12   : > { %911 = vmatprep.subr.bf16.mxu0 %v961_v2  ;;  %947 = vmatprep.subr.bf16.mxu1 %v961_v2  ;;  %v974_v15 = vld [vmem:[%s1031_s24 + $0x30] sm:$0xff]   ;;  %v976_v17 = vld [vmem:[%s1031_s24 + $0x38] sm:$0xff]  }
  0x13   : > { %v975_v16 = vld [vmem:[%s1031_s24 + $0x70] sm:$0xff]   ;;  %v977_v18 = vld [vmem:[%s1031_s24 + $0x78] sm:$0xff]  }
  0x15   : > { %912 = vmatpush3.bf16.msra.mxu0 %v961_v2  ;;  %950 = vmatpush3.bf16.msra.mxu1 %v961_v2 }
  0x18   : > { %914 = vmatmul.mubr.msk.bf16.vlgmr.msra.gmra.mxu0 %vm318_vm0, %v964_v5  ;;  %930 = vmatmul.mubr.msk.bf16.vlgmr.msra.gmra.mxu1 %vm318_vm0, %v965_v6 }
  0x19   : > { %917 = vmatprep.mubr.msk.bf16.mxu0 %vm318_vm0, %v966_v7  ;;  %933 = vmatprep.mubr.msk.bf16.mxu1 %vm318_vm0, %v967_v8 }
  0x20   : > { %918 = vmatmul.mubr.msk.bf16.gmra.mxu0 %vm318_vm0, %v968_v9  ;;  %934 = vmatmul.mubr.msk.bf16.gmra.mxu1 %vm318_vm0, %v969_v10 }
  0x21   : > { %921 = vmatprep.mubr.msk.bf16.mxu0 %vm318_vm0, %v970_v11  ;;  %937 = vmatprep.mubr.msk.bf16.mxu1 %vm318_vm0, %v971_v12 }
  0x28   : > { %922 = vmatmul.mubr.msk.bf16.gmra.mxu0 %vm318_vm0, %v972_v13  ;;  %938 = vmatmul.mubr.msk.bf16.gmra.mxu1 %vm318_vm0, %v973_v14 }
  0x29   : > { %925 = vmatprep.mubr.msk.bf16.mxu0 %vm318_vm0, %v974_v15  ;;  %941 = vmatprep.mubr.msk.bf16.mxu1 %vm318_vm0, %v975_v16 }
  0x30   : > { %926 = vmatmul.mubr.msk.bf16.gmra.mxu0 %vm318_vm0, %v976_v17  ;;  %942 = vmatmul.mubr.msk.bf16.gmra.mxu1 %vm318_vm0, %v977_v18 }
  0xd8   : > { %v915_v20 = vpop.f32.mrf.mxu0  ;;  %v931_v21 = vpop.f32.mrf.mxu1 }
  0xd9   : > { %v410_v22 = vadd.f32 %v915_v20, %v1068_v19  ;;  %v474_v23 = vadd.f32 %v931_v21, %v1068_v19 }
  0xda   : > { %v401_v24 = vpop.f32.mrf.mxu0  ;;  %v465_v25 = vpop.f32.mrf.mxu1 }
  0xdb   : > { %v530_v26 = vmax.f32 %v410_v22, 0.0  ;;  %v546_v27 = vmax.f32 %v474_v23, 0.0  ;;  %v402_v28 = vadd.f32 %v1068_v19, %v401_v24  ;;  %v466_v29 = vadd.f32 %v1068_v19, %v465_v25 }
  0xdc   : > { %v916_v30 = vpop.f32.mrf.mxu0  ;;  %v932_v31 = vpop.f32.mrf.mxu1 }
  0xdd   : > { %v858_v32 = vpack.c.bf16 %v530_v26, %v530_v26  ;;  %v874_v33 = vpack.c.bf16 %v546_v27, %v546_v27  ;;  %v528_v34 = vmax.f32 %v402_v28, 0.0  ;;  %v544_v35 = vmax.f32 %v466_v29, 0.0 }
  0xde   : > { %v413_v36 = vadd.f32 %v916_v30, %v1068_v19  ;;  %v477_v37 = vadd.f32 %v932_v31, %v1068_v19  ;;  %v404_v38 = vpop.f32.mrf.mxu0  ;;  %v468_v39 = vpop.f32.mrf.mxu1 }
  0xdf   : > { %691 = vst.msk [vmem:[%s1079_s29 + $0x8] sm:$0xf] %vm688_vm1, %v858_v32  ;;  %707 = vst.msk [vmem:[%s1079_s29 + $0x48] sm:$0xf] %vm688_vm1, %v874_v33  ;;  %v856_v40 = vpack.c.bf16 %v528_v34, %v528_v34  ;;  %v872_v41 = vpack.c.bf16 %v544_v35, %v544_v35  ;;  %v405_v42 = vadd.f32 %v1068_v19, %v404_v38 }
  0xe0   : > { %v469_v43 = vadd.f32 %v1068_v19, %v468_v39  ;;  %v531_v44 = vmax.f32 %v413_v36, 0.0  ;;  %v547_v45 = vmax.f32 %v477_v37, 0.0  ;;  %v919_v46 = vpop.f32.mrf.mxu0  ;;  %v935_v47 = vpop.f32.mrf.mxu1 }
  0xe1   : > { %689 = vst.msk [vmem:[%s1079_s29] sm:$0xf] %vm688_vm1, %v856_v40  ;;  %705 = vst.msk [vmem:[%s1079_s29 + $0x40] sm:$0xf] %vm688_vm1, %v872_v41  ;;  %v529_v48 = vmax.f32 %v405_v42, 0.0  ;;  %v426_v50 = vadd.f32 %v919_v46, %v1068_v19  ;;  %v490_v51 = vadd.f32 %v935_v47, %v1068_v19 }
  0xe2   : > { %v545_v49 = vmax.f32 %v469_v43, 0.0  ;;  %v859_v52 = vpack.c.bf16 %v531_v44, %v531_v44  ;;  %v875_v53 = vpack.c.bf16 %v547_v45, %v547_v45  ;;  %v417_v54 = vpop.f32.mrf.mxu0  ;;  %v481_v55 = vpop.f32.mrf.mxu1 }
  0xe3   : > { %v857_v56 = vpack.c.bf16 %v529_v48, %v529_v48  ;;  %v534_v58 = vmax.f32 %v426_v50, 0.0  ;;  %v550_v59 = vmax.f32 %v490_v51, 0.0  ;;  %v418_v60 = vadd.f32 %v1068_v19, %v417_v54 }
  0xe4   : > { %v873_v57 = vpack.c.bf16 %v545_v49, %v545_v49  ;;  %692 = vst.msk [vmem:[%s1079_s29 + $0xc] sm:$0xf] %vm688_vm1, %v859_v52  ;;  %708 = vst.msk [vmem:[%s1079_s29 + $0x4c] sm:$0xf] %vm688_vm1, %v875_v53  ;;  %v482_v61 = vadd.f32 %v1068_v19, %v481_v55  ;;  %v920_v62 = vpop.f32.mrf.mxu0  ;;  %v936_v63 = vpop.f32.mrf.mxu1 }
  0xe5   : > { %690 = vst.msk [vmem:[%s1079_s29 + $0x4] sm:$0xf] %vm688_vm1, %v857_v56  ;;  %v862_v0 = vpack.c.bf16 %v534_v58, %v534_v58  ;;  %v878_v1 = vpack.c.bf16 %v550_v59, %v550_v59  ;;  %v429_v2 = vadd.f32 %v920_v62, %v1068_v19  ;;  %v493_v3 = vadd.f32 %v936_v63, %v1068_v19 }
  0xe6   : > { %706 = vst.msk [vmem:[%s1079_s29 + $0x44] sm:$0xf] %vm688_vm1, %v873_v57  ;;  %v532_v4 = vmax.f32 %v418_v60, 0.0  ;;  %v548_v5 = vmax.f32 %v482_v61, 0.0  ;;  %v420_v6 = vpop.f32.mrf.mxu0  ;;  %v484_v7 = vpop.f32.mrf.mxu1 }
  0xe7   : > { %695 = vst.msk [vmem:[%s1079_s29 + $0x18] sm:$0xf] %vm688_vm1, %v862_v0  ;;  %711 = vst.msk [vmem:[%s1079_s29 + $0x58] sm:$0xf] %vm688_vm1, %v878_v1  ;;  %v535_v8 = vmax.f32 %v429_v2, 0.0  ;;  %v551_v9 = vmax.f32 %v493_v3, 0.0  ;;  %v421_v10 = vadd.f32 %v1068_v19, %v420_v6  ;;  %v485_v11 = vadd.f32 %v1068_v19, %v484_v7 }
  0xe8   : > { %v860_v12 = vpack.c.bf16 %v532_v4, %v532_v4  ;;  %v876_v13 = vpack.c.bf16 %v548_v5, %v548_v5  ;;  %v923_v14 = vpop.f32.mrf.mxu0  ;;  %v939_v15 = vpop.f32.mrf.mxu1 }
  0xe9   : > { %v863_v16 = vpack.c.bf16 %v535_v8, %v535_v8  ;;  %v879_v17 = vpack.c.bf16 %v551_v9, %v551_v9  ;;  %v533_v18 = vmax.f32 %v421_v10, 0.0  ;;  %v549_v20 = vmax.f32 %v485_v11, 0.0 }
  0xea   : > { %693 = vst.msk [vmem:[%s1079_s29 + $0x10] sm:$0xf] %vm688_vm1, %v860_v12  ;;  %709 = vst.msk [vmem:[%s1079_s29 + $0x50] sm:$0xf] %vm688_vm1, %v876_v13  ;;  %v442_v21 = vadd.f32 %v923_v14, %v1068_v19  ;;  %v506_v22 = vadd.f32 %v939_v15, %v1068_v19  ;;  %v433_v23 = vpop.f32.mrf.mxu0  ;;  %v497_v24 = vpop.f32.mrf.mxu1 }
  0xeb   : > { %696 = vst.msk [vmem:[%s1079_s29 + $0x1c] sm:$0xf] %vm688_vm1, %v863_v16  ;;  %712 = vst.msk [vmem:[%s1079_s29 + $0x5c] sm:$0xf] %vm688_vm1, %v879_v17  ;;  %v861_v25 = vpack.c.bf16 %v533_v18, %v533_v18  ;;  %v877_v26 = vpack.c.bf16 %v549_v20, %v549_v20  ;;  %v434_v27 = vadd.f32 %v1068_v19, %v433_v23 }
  0xec   : > { %v498_v28 = vadd.f32 %v1068_v19, %v497_v24  ;;  %v538_v29 = vmax.f32 %v442_v21, 0.0  ;;  %v554_v30 = vmax.f32 %v506_v22, 0.0  ;;  %v924_v31 = vpop.f32.mrf.mxu0  ;;  %v940_v32 = vpop.f32.mrf.mxu1 }
  0xed   : > { %694 = vst.msk [vmem:[%s1079_s29 + $0x14] sm:$0xf] %vm688_vm1, %v861_v25  ;;  %710 = vst.msk [vmem:[%s1079_s29 + $0x54] sm:$0xf] %vm688_vm1, %v877_v26  ;;  %v536_v33 = vmax.f32 %v434_v27, 0.0  ;;  %v445_v35 = vadd.f32 %v924_v31, %v1068_v19  ;;  %v509_v36 = vadd.f32 %v940_v32, %v1068_v19 }
  0xee   : > { %v552_v34 = vmax.f32 %v498_v28, 0.0  ;;  %v866_v37 = vpack.c.bf16 %v538_v29, %v538_v29  ;;  %v882_v38 = vpack.c.bf16 %v554_v30, %v554_v30  ;;  %v436_v39 = vpop.f32.mrf.mxu0  ;;  %v500_v40 = vpop.f32.mrf.mxu1 }
  0xef   : > { %v864_v41 = vpack.c.bf16 %v536_v33, %v536_v33  ;;  %v539_v43 = vmax.f32 %v445_v35, 0.0  ;;  %v555_v44 = vmax.f32 %v509_v36, 0.0  ;;  %v437_v45 = vadd.f32 %v1068_v19, %v436_v39 }
  0xf0   : > { %v880_v42 = vpack.c.bf16 %v552_v34, %v552_v34  ;;  %699 = vst.msk [vmem:[%s1079_s29 + $0x28] sm:$0xf] %vm688_vm1, %v866_v37  ;;  %715 = vst.msk [vmem:[%s1079_s29 + $0x68] sm:$0xf] %vm688_vm1, %v882_v38  ;;  %v501_v46 = vadd.f32 %v1068_v19, %v500_v40  ;;  %v927_v47 = vpop.f32.mrf.mxu0  ;;  %v943_v48 = vpop.f32.mrf.mxu1 }
  0xf1   : > { %697 = vst.msk [vmem:[%s1079_s29 + $0x20] sm:$0xf] %vm688_vm1, %v864_v41  ;;  %v867_v49 = vpack.c.bf16 %v539_v43, %v539_v43  ;;  %v883_v50 = vpack.c.bf16 %v555_v44, %v555_v44  ;;  %v458_v51 = vadd.f32 %v927_v47, %v1068_v19  ;;  %v522_v52 = vadd.f32 %v943_v48, %v1068_v19 }
  0xf2   : > { %713 = vst.msk [vmem:[%s1079_s29 + $0x60] sm:$0xf] %vm688_vm1, %v880_v42  ;;  %v537_v53 = vmax.f32 %v437_v45, 0.0  ;;  %v553_v54 = vmax.f32 %v501_v46, 0.0  ;;  %v449_v55 = vpop.f32.mrf.mxu0  ;;  %v513_v56 = vpop.f32.mrf.mxu1 }
  0xf3   : > { %700 = vst.msk [vmem:[%s1079_s29 + $0x2c] sm:$0xf] %vm688_vm1, %v867_v49  ;;  %716 = vst.msk [vmem:[%s1079_s29 + $0x6c] sm:$0xf] %vm688_vm1, %v883_v50  ;;  %v542_v57 = vmax.f32 %v458_v51, 0.0  ;;  %v558_v58 = vmax.f32 %v522_v52, 0.0  ;;  %v450_v59 = vadd.f32 %v1068_v19, %v449_v55  ;;  %v514_v60 = vadd.f32 %v1068_v19, %v513_v56 }
  0xf4   : > { %v865_v61 = vpack.c.bf16 %v537_v53, %v537_v53  ;;  %v881_v62 = vpack.c.bf16 %v553_v54, %v553_v54  ;;  %v928_v63 = vpop.f32.mrf.mxu0  ;;  %v944_v0 = vpop.f32.mrf.mxu1 }
  0xf5   : > { %v870_v1 = vpack.c.bf16 %v542_v57, %v542_v57  ;;  %v886_v2 = vpack.c.bf16 %v558_v58, %v558_v58  ;;  %v540_v3 = vmax.f32 %v450_v59, 0.0  ;;  %v556_v4 = vmax.f32 %v514_v60, 0.0 }
  0xf6   : > { %698 = vst.msk [vmem:[%s1079_s29 + $0x24] sm:$0xf] %vm688_vm1, %v865_v61  ;;  %714 = vst.msk [vmem:[%s1079_s29 + $0x64] sm:$0xf] %vm688_vm1, %v881_v62  ;;  %v461_v5 = vadd.f32 %v928_v63, %v1068_v19  ;;  %v525_v6 = vadd.f32 %v944_v0, %v1068_v19  ;;  %v452_v7 = vpop.f32.mrf.mxu0  ;;  %v516_v8 = vpop.f32.mrf.mxu1 }
  0xf7   : > { %703 = vst.msk [vmem:[%s1079_s29 + $0x38] sm:$0xf] %vm688_vm1, %v870_v1  ;;  %719 = vst.msk [vmem:[%s1079_s29 + $0x78] sm:$0xf] %vm688_vm1, %v886_v2  ;;  %v868_v9 = vpack.c.bf16 %v540_v3, %v540_v3  ;;  %v884_v10 = vpack.c.bf16 %v556_v4, %v556_v4  ;;  %v453_v11 = vadd.f32 %v1068_v19, %v452_v7 }
  0xf8   : > { %v517_v12 = vadd.f32 %v1068_v19, %v516_v8  ;;  %v543_v13 = vmax.f32 %v461_v5, 0.0  ;;  %v559_v14 = vmax.f32 %v525_v6, 0.0 }
  0xf9   : > { %701 = vst.msk [vmem:[%s1079_s29 + $0x30] sm:$0xf] %vm688_vm1, %v868_v9  ;;  %717 = vst.msk [vmem:[%s1079_s29 + $0x70] sm:$0xf] %vm688_vm1, %v884_v10  ;;  %v541_v15 = vmax.f32 %v453_v11, 0.0 }
  0xfa   : > { %v557_v16 = vmax.f32 %v517_v12, 0.0  ;;  %v871_v17 = vpack.c.bf16 %v543_v13, %v543_v13  ;;  %v887_v18 = vpack.c.bf16 %v559_v14, %v559_v14 }
  0xfb   : > { %v869_v20 = vpack.c.bf16 %v541_v15, %v541_v15 }
  0xfc   : > { %v885_v21 = vpack.c.bf16 %v557_v16, %v557_v16  ;;  %704 = vst.msk [vmem:[%s1079_s29 + $0x3c] sm:$0xf] %vm688_vm1, %v871_v17  ;;  %720 = vst.msk [vmem:[%s1079_s29 + $0x7c] sm:$0xf] %vm688_vm1, %v887_v18 }
  0xfd   : > { %702 = vst.msk [vmem:[%s1079_s29 + $0x34] sm:$0xf] %vm688_vm1, %v869_v20 }
  0xfe   : > { %718 = vst.msk [vmem:[%s1079_s29 + $0x74] sm:$0xf] %vm688_vm1, %v885_v21 }
  0xff PF: > { %s13_s12 = sadd.s32 1, %s984_s12  }
 0x100   : > { %p10_p4 = scmp.ge.s32.totalorder %s13_s12, 4  }
 0x102   :  { %12 = sbr.rel (!%p10_p4) target bundleno = 1 (0x1), region = 62 }

// kernel: erfnet_forward.142
= control target key start
LH: loop header
LB: loop body
LE: loop exit
PB: predicated region body
PF: predicated region fallthrough
CT: control target
= control target key end

     0   :  { %s1249_s15 = smov 0   ;;  %s1554_s0 = inlined_call_operand.vmem [shape: bf16[512,48], index: 0, kind: input, shape index: {}]   ;;  %s1555_s1 = inlined_call_operand.vmem [shape: bf16[48,16], index: 1, kind: input, shape index: {}]   ;;  %s1556_s2 = inlined_call_operand.vmem [shape: f32[1,16], index: 2, kind: input, shape index: {}]   ;;  %s1557_s3 = inlined_call_operand.vmem [shape: bf16[512,16], index: 3, kind: input, shape index: {}]   ;;  %s1558_s4 = inlined_call_operand.vmem [shape: bf16[512,16], index: 4, kind: output, shape index: {}]  }
   0x1 LB: > { %s934_s16 = sadd.s32 4294967295, %s1222_s15   ;;  %p938_p0 = scmp.ge.s32.totalorder %s1222_s15, 1  ;;  %s1222_s15 = sphi %s1249_s15, %s14_s15  }
   0x2   : > { %p174_p1 = scmp.lt.s32.totalorder %s1222_s15, 3 }
   0x4   : > { %p175_p2 = pnand %p938_p0, %p174_p1 }
   0x5   : > { %s939_s19 = sshll.u32 (!%p175_p2), %s934_s16, 5 }
   0x6   : > { %178 = sbr.rel (%p175_p2) target bundleno = 259 (0x103), region = 36  ;;  %p206_p3 = scmp.lt.s32.totalorder (!%p175_p2), %s939_s19, 63 }
   0xb   : > { %v1197_v0 = vld [vmem:[%s1555_s1 + $0x10] sm:$0xff]   ;;  %v1198_v1 = vld [vmem:[%s1555_s1 + $0x8] sm:$0xff]   ;;  %s1560_s19 = smov (!%p206_p3, %s939_s19), 63  ;;  %v1199_v2 = vld [vmem:[%s1555_s1] sm:$0xff]   ;;  %vm367_vm0 = vcmask 392192   ;;  %vm833_vm1 = vcmask 125952  }
   0xc   : > { %1145 = vmatprep.subr.bf16.mxu0 %v1197_v0  ;;  %1183 = vmatprep.subr.bf16.mxu1 %v1197_v0  ;;  %s1266_s24 = sshll.u32 %s1560_s19, 2  ;;  %v1359_v39 = vld [vmem:[%s1556_s2] ss:$0 sm:$0xff] }
   0xd   : > { %1146 = vmatpush3.bf16.msra.mxu0 %v1197_v0  ;;  %1186 = vmatpush3.bf16.msra.mxu1 %v1197_v0  ;;  %s1272_s27 = scalar_lea.vmem %s1554_s0, %s1266_s24  ;;  %s1310_s30 = scalar_lea.vmem %s1557_s3, %s1266_s24 }
   0xe   : > { %1147 = vmatprep.subr.bf16.mxu0 %v1198_v1  ;;  %1184 = vmatprep.subr.bf16.mxu1 %v1198_v1  ;;  %v1200_v3 = vld [vmem:[%s1272_s27] sm:$0xff]   ;;  %v1202_v5 = vld [vmem:[%s1272_s27 + $0x8] sm:$0xff]   ;;  %v1204_v7 = vld [vmem:[%s1272_s27 + $0x10] sm:$0xff]   ;;  %s1403_s9 = scalar_lea.vmem %s1558_s4, %s1266_s24 }
   0xf   : > { %v1201_v4 = vld [vmem:[%s1272_s27 + $0x40] sm:$0xff]   ;;  %1151 = vmatprep.mubr.msk.bf16.mxu0 %vm367_vm0, %v1200_v3  ;;  %v1203_v6 = vld [vmem:[%s1272_s27 + $0x48] sm:$0xff]   ;;  %v1205_v8 = vld [vmem:[%s1272_s27 + $0x50] sm:$0xff]  }
  0x10   : > { %1167 = vmatprep.mubr.msk.bf16.mxu1 %vm367_vm0, %v1201_v4  ;;  %v1206_v9 = vld [vmem:[%s1272_s27 + $0x18] sm:$0xff]   ;;  %v1208_v11 = vld [vmem:[%s1272_s27 + $0x20] sm:$0xff]   ;;  %v1210_v13 = vld [vmem:[%s1272_s27 + $0x28] sm:$0xff]  }
  0x11   : > { %1148 = vmatpush3.bf16.msra.mxu0 %v1198_v1  ;;  %1187 = vmatpush3.bf16.msra.mxu1 %v1198_v1  ;;  %v1207_v10 = vld [vmem:[%s1272_s27 + $0x58] sm:$0xff]   ;;  %v1209_v12 = vld [vmem:[%s1272_s27 + $0x60] sm:$0xff]   ;;  %v1211_v14 = vld [vmem:[%s1272_s27 + $0x68] sm:$0xff]  }
  0x12   : > { %1149 = vmatprep.subr.bf16.mxu0 %v1199_v2  ;;  %1185 = vmatprep.subr.bf16.mxu1 %v1199_v2  ;;  %v1212_v15 = vld [vmem:[%s1272_s27 + $0x30] sm:$0xff]   ;;  %v1214_v17 = vld [vmem:[%s1272_s27 + $0x38] sm:$0xff]   ;;  %v1313_v19 = vld [vmem:[%s1310_s30 + $0x8] sm:$0xff]  }
  0x13   : > { %v1213_v16 = vld [vmem:[%s1272_s27 + $0x70] sm:$0xff]   ;;  %v1215_v18 = vld [vmem:[%s1272_s27 + $0x78] sm:$0xff]   ;;  %v1316_v20 = vld [vmem:[%s1310_s30 + $0x48] sm:$0xff]   ;;  %v1053_v27 = vunpack.c.l.bf16 %v1313_v19  ;;  %v1054_v32 = vunpack.c.h.bf16 %v1313_v19 }
  0x14   : > { %v1319_v21 = vld [vmem:[%s1310_s30] sm:$0xff]   ;;  %v1325_v23 = vld [vmem:[%s1310_s30 + $0x18] sm:$0xff]   ;;  %v1331_v25 = vld [vmem:[%s1310_s30 + $0x10] sm:$0xff]   ;;  %v1085_v28 = vunpack.c.l.bf16 %v1316_v20  ;;  %v1086_v33 = vunpack.c.h.bf16 %v1316_v20 }
  0x15   : > { %1150 = vmatpush3.bf16.msra.mxu0 %v1199_v2  ;;  %1188 = vmatpush3.bf16.msra.mxu1 %v1199_v2  ;;  %v1322_v22 = vld [vmem:[%s1310_s30 + $0x40] sm:$0xff]   ;;  %v1328_v24 = vld [vmem:[%s1310_s30 + $0x58] sm:$0xff]   ;;  %v1334_v26 = vld [vmem:[%s1310_s30 + $0x50] sm:$0xff]   ;;  %v1049_v29 = vunpack.c.l.bf16 %v1319_v21  ;;  %v1050_v34 = vunpack.c.h.bf16 %v1319_v21  ;;  %v1061_v40 = vunpack.c.l.bf16 %v1325_v23  ;;  %v1057_v42 = vunpack.c.l.bf16 %v1331_v25 }
  0x16   : > { %v1081_v30 = vunpack.c.l.bf16 %v1322_v22  ;;  %v1341_v31 = vld [vmem:[%s1310_s30 + $0x28] sm:$0xff]   ;;  %v1082_v35 = vunpack.c.h.bf16 %v1322_v22  ;;  %v1351_v37 = vld [vmem:[%s1310_s30 + $0x20] sm:$0xff]   ;;  %v1093_v41 = vunpack.c.l.bf16 %v1328_v24  ;;  %v1089_v43 = vunpack.c.l.bf16 %v1334_v26  ;;  %v1370_v48 = vld [vmem:[%s1310_s30 + $0x38] sm:$0xff]  }
  0x17   : > { %v1348_v36 = vld [vmem:[%s1310_s30 + $0x68] sm:$0xff]   ;;  %v1354_v38 = vld [vmem:[%s1310_s30 + $0x60] sm:$0xff]   ;;  %v1062_v44 = vunpack.c.h.bf16 %v1325_v23  ;;  %v1094_v45 = vunpack.c.h.bf16 %v1328_v24  ;;  %v1058_v46 = vunpack.c.h.bf16 %v1331_v25  ;;  %v1090_v47 = vunpack.c.h.bf16 %v1334_v26  ;;  %v1373_v49 = vld [vmem:[%s1310_s30 + $0x78] sm:$0xff]  }
  0x18   : > { %1152 = vmatmul.mubr.msk.bf16.vlgmr.msra.gmra.mxu0 %vm367_vm0, %v1202_v5  ;;  %1168 = vmatmul.mubr.msk.bf16.vlgmr.msra.gmra.mxu1 %vm367_vm0, %v1203_v6  ;;  %v1069_v52 = vunpack.c.l.bf16 %v1341_v31  ;;  %v1101_v53 = vunpack.c.l.bf16 %v1348_v36  ;;  %v1065_v54 = vunpack.c.l.bf16 %v1351_v37  ;;  %v1097_v55 = vunpack.c.l.bf16 %v1354_v38  ;;  %v1384_v60 = vld [vmem:[%s1310_s30 + $0x30] sm:$0xff]  }
  0x19   : > { %1155 = vmatprep.mubr.msk.bf16.mxu0 %vm367_vm0, %v1204_v7  ;;  %1171 = vmatprep.mubr.msk.bf16.mxu1 %vm367_vm0, %v1205_v8  ;;  %v1070_v58 = vunpack.c.h.bf16 %v1341_v31  ;;  %v1102_v59 = vunpack.c.h.bf16 %v1348_v36  ;;  %v1387_v61 = vld [vmem:[%s1310_s30 + $0x70] sm:$0xff]   ;;  %v1066_v0 = vunpack.c.h.bf16 %v1351_v37  ;;  %v1098_v1 = vunpack.c.h.bf16 %v1354_v38 }
  0x1a   : > { %v1077_v2 = vunpack.c.l.bf16 %v1370_v48  ;;  %v1109_v3 = vunpack.c.l.bf16 %v1373_v49 }
  0x20   : > { %1156 = vmatmul.mubr.msk.bf16.gmra.mxu0 %vm367_vm0, %v1206_v9  ;;  %1172 = vmatmul.mubr.msk.bf16.gmra.mxu1 %vm367_vm0, %v1207_v10  ;;  %v1073_v10 = vunpack.c.l.bf16 %v1384_v60 }
  0x21   : > { %1159 = vmatprep.mubr.msk.bf16.mxu0 %vm367_vm0, %v1208_v11  ;;  %1175 = vmatprep.mubr.msk.bf16.mxu1 %vm367_vm0, %v1209_v12  ;;  %v1105_v11 = vunpack.c.l.bf16 %v1387_v61  ;;  %v1078_v12 = vunpack.c.h.bf16 %v1370_v48 }
  0x28   : > { %1160 = vmatmul.mubr.msk.bf16.gmra.mxu0 %vm367_vm0, %v1210_v13  ;;  %1176 = vmatmul.mubr.msk.bf16.gmra.mxu1 %vm367_vm0, %v1211_v14  ;;  %v1110_v13 = vunpack.c.h.bf16 %v1373_v49 }
  0x29   : > { %1163 = vmatprep.mubr.msk.bf16.mxu0 %vm367_vm0, %v1212_v15  ;;  %1179 = vmatprep.mubr.msk.bf16.mxu1 %vm367_vm0, %v1213_v16 }
  0x30   : > { %1164 = vmatmul.mubr.msk.bf16.gmra.mxu0 %vm367_vm0, %v1214_v17  ;;  %1180 = vmatmul.mubr.msk.bf16.gmra.mxu1 %vm367_vm0, %v1215_v18 }
  0xd8   : > { %v1153_v50 = vpop.f32.mrf.mxu0  ;;  %v1169_v51 = vpop.f32.mrf.mxu1 }
  0xd9   : > { %v459_v56 = vadd.f32 %v1153_v50, %v1359_v39  ;;  %v523_v57 = vadd.f32 %v1169_v51, %v1359_v39  ;;  %v1106_v50 = vunpack.c.h.bf16 %v1387_v61 }
  0xda   : > { %v450_v62 = vpop.f32.mrf.mxu0  ;;  %v514_v63 = vpop.f32.mrf.mxu1 }
  0xdb   : > { %v643_v4 = vadd.f32 %v1053_v27, %v459_v56  ;;  %v659_v5 = vadd.f32 %v1085_v28, %v523_v57  ;;  %v451_v6 = vadd.f32 %v1359_v39, %v450_v62  ;;  %v515_v7 = vadd.f32 %v1359_v39, %v514_v63 }
  0xdc   : > { %v1154_v8 = vpop.f32.mrf.mxu0  ;;  %v1170_v9 = vpop.f32.mrf.mxu1  ;;  %v1074_v28 = vunpack.c.h.bf16 %v1384_v60 }
  0xdd   : > { %v675_v14 = vmax.f32 %v643_v4, 0.0  ;;  %v691_v15 = vmax.f32 %v659_v5, 0.0  ;;  %v641_v16 = vadd.f32 %v1049_v29, %v451_v6  ;;  %v657_v17 = vadd.f32 %v1081_v30, %v515_v7 }
  0xde   : > { %v462_v18 = vadd.f32 %v1154_v8, %v1359_v39  ;;  %v526_v19 = vadd.f32 %v1170_v9, %v1359_v39  ;;  %v453_v20 = vpop.f32.mrf.mxu0  ;;  %v517_v27 = vpop.f32.mrf.mxu1 }
  0xdf   : > { %v1017_v51 = vpack.c.bf16 %v675_v14, %v675_v14  ;;  %v1033_v29 = vpack.c.bf16 %v691_v15, %v691_v15  ;;  %v673_v30 = vmax.f32 %v641_v16, 0.0  ;;  %v689_v56 = vmax.f32 %v657_v17, 0.0 }
  0xe0   : > { %v644_v57 = vadd.f32 %v1054_v32, %v462_v18  ;;  %v660_v62 = vadd.f32 %v1086_v33, %v526_v19  ;;  %v454_v63 = vadd.f32 %v1359_v39, %v453_v20  ;;  %v518_v4 = vadd.f32 %v1359_v39, %v517_v27  ;;  %v1157_v5 = vpop.f32.mrf.mxu0  ;;  %v1173_v6 = vpop.f32.mrf.mxu1 }
  0xe1   : > { %836 = vst.msk [vmem:[%s1403_s9 + $0x8] sm:$0xf] %vm833_vm1, %v1017_v51  ;;  %852 = vst.msk [vmem:[%s1403_s9 + $0x48] sm:$0xf] %vm833_vm1, %v1033_v29  ;;  %v1015_v7 = vpack.c.bf16 %v673_v30, %v673_v30  ;;  %v1031_v8 = vpack.c.bf16 %v689_v56, %v689_v56  ;;  %v475_v9 = vadd.f32 %v1157_v5, %v1359_v39 }
  0xe2   : > { %v539_v14 = vadd.f32 %v1173_v6, %v1359_v39  ;;  %v676_v32 = vmax.f32 %v644_v57, 0.0  ;;  %v692_v33 = vmax.f32 %v660_v62, 0.0  ;;  %v642_v15 = vadd.f32 %v1050_v34, %v454_v63  ;;  %v466_v17 = vpop.f32.mrf.mxu0  ;;  %v530_v18 = vpop.f32.mrf.mxu1 }
  0xe3   : > { %v658_v16 = vadd.f32 %v1082_v35, %v518_v4  ;;  %834 = vst.msk [vmem:[%s1403_s9] sm:$0xf] %vm833_vm1, %v1015_v7  ;;  %850 = vst.msk [vmem:[%s1403_s9 + $0x40] sm:$0xf] %vm833_vm1, %v1031_v8  ;;  %v647_v19 = vadd.f32 %v1061_v40, %v475_v9  ;;  %v467_v21 = vadd.f32 %v1359_v39, %v466_v17 }
  0xe4   : > { %v663_v20 = vadd.f32 %v1093_v41, %v539_v14  ;;  %v531_v34 = vadd.f32 %v1359_v39, %v530_v18  ;;  %v1018_v22 = vpack.c.bf16 %v676_v32, %v676_v32  ;;  %v1034_v35 = vpack.c.bf16 %v692_v33, %v692_v33  ;;  %v1158_v29 = vpop.f32.mrf.mxu0  ;;  %v1174_v30 = vpop.f32.mrf.mxu1 }
  0xe5   : > { %v674_v27 = vmax.f32 %v642_v15, 0.0  ;;  %v690_v51 = vmax.f32 %v658_v16, 0.0  ;;  %v679_v56 = vmax.f32 %v647_v19, 0.0  ;;  %v645_v40 = vadd.f32 %v1057_v42, %v467_v21 }
  0xe6   : > { %v695_v57 = vmax.f32 %v663_v20, 0.0  ;;  %v661_v41 = vadd.f32 %v1089_v43, %v531_v34  ;;  %837 = vst.msk [vmem:[%s1403_s9 + $0xc] sm:$0xf] %vm833_vm1, %v1018_v22  ;;  %853 = vst.msk [vmem:[%s1403_s9 + $0x4c] sm:$0xf] %vm833_vm1, %v1034_v35  ;;  %v478_v4 = vadd.f32 %v1158_v29, %v1359_v39  ;;  %v542_v5 = vadd.f32 %v1174_v30, %v1359_v39  ;;  %v469_v6 = vpop.f32.mrf.mxu0  ;;  %v533_v7 = vpop.f32.mrf.mxu1 }
  0xe7   : > { %v1016_v62 = vpack.c.bf16 %v674_v27, %v674_v27  ;;  %v1032_v63 = vpack.c.bf16 %v690_v51, %v690_v51  ;;  %v1021_v8 = vpack.c.bf16 %v679_v56, %v679_v56  ;;  %v677_v42 = vmax.f32 %v645_v40, 0.0 }
  0xe8   : > { %v1037_v9 = vpack.c.bf16 %v695_v57, %v695_v57  ;;  %v693_v14 = vmax.f32 %v661_v41, 0.0  ;;  %v648_v43 = vadd.f32 %v1062_v44, %v478_v4  ;;  %v664_v32 = vadd.f32 %v1094_v45, %v542_v5  ;;  %v1161_v16 = vpop.f32.mrf.mxu0  ;;  %v1177_v17 = vpop.f32.mrf.mxu1 }
  0xe9   : > { %835 = vst.msk [vmem:[%s1403_s9 + $0x4] sm:$0xf] %vm833_vm1, %v1016_v62  ;;  %851 = vst.msk [vmem:[%s1403_s9 + $0x44] sm:$0xf] %vm833_vm1, %v1032_v63  ;;  %v470_v33 = vadd.f32 %v1359_v39, %v469_v6  ;;  %v534_v15 = vadd.f32 %v1359_v39, %v533_v7  ;;  %v1019_v18 = vpack.c.bf16 %v677_v42, %v677_v42 }
  0xea   : > { %840 = vst.msk [vmem:[%s1403_s9 + $0x18] sm:$0xf] %vm833_vm1, %v1021_v8  ;;  %856 = vst.msk [vmem:[%s1403_s9 + $0x58] sm:$0xf] %vm833_vm1, %v1037_v9  ;;  %v1035_v19 = vpack.c.bf16 %v693_v14, %v693_v14  ;;  %v491_v23 = vadd.f32 %v1161_v16, %v1359_v39  ;;  %v555_v44 = vadd.f32 %v1177_v17, %v1359_v39  ;;  %v680_v24 = vmax.f32 %v648_v43, 0.0  ;;  %v482_v34 = vpop.f32.mrf.mxu0  ;;  %v546_v22 = vpop.f32.mrf.mxu1 }
  0xeb   : > { %v696_v45 = vmax.f32 %v664_v32, 0.0  ;;  %v646_v20 = vadd.f32 %v1058_v46, %v470_v33  ;;  %v662_v21 = vadd.f32 %v1090_v47, %v534_v15  ;;  %838 = vst.msk [vmem:[%s1403_s9 + $0x10] sm:$0xf] %vm833_vm1, %v1019_v18  ;;  %v483_v25 = vadd.f32 %v1359_v39, %v482_v34 }
  0xec   : > { %854 = vst.msk [vmem:[%s1403_s9 + $0x50] sm:$0xf] %vm833_vm1, %v1035_v19  ;;  %v651_v35 = vadd.f32 %v1069_v52, %v491_v23  ;;  %v667_v27 = vadd.f32 %v1101_v53, %v555_v44  ;;  %v547_v46 = vadd.f32 %v1359_v39, %v546_v22  ;;  %v1022_v26 = vpack.c.bf16 %v680_v24, %v680_v24  ;;  %v1162_v30 = vpop.f32.mrf.mxu0  ;;  %v1178_v56 = vpop.f32.mrf.mxu1 }
  0xed   : > { %v1038_v47 = vpack.c.bf16 %v696_v45, %v696_v45  ;;  %v678_v51 = vmax.f32 %v646_v20, 0.0  ;;  %v694_v29 = vmax.f32 %v662_v21, 0.0  ;;  %v649_v52 = vadd.f32 %v1065_v54, %v483_v25 }
  0xee   : > { %v683_v57 = vmax.f32 %v651_v35, 0.0  ;;  %v699_v40 = vmax.f32 %v667_v27, 0.0  ;;  %v665_v53 = vadd.f32 %v1097_v55, %v547_v46  ;;  %841 = vst.msk [vmem:[%s1403_s9 + $0x1c] sm:$0xf] %vm833_vm1, %v1022_v26  ;;  %v494_v63 = vadd.f32 %v1162_v30, %v1359_v39  ;;  %v485_v5 = vpop.f32.mrf.mxu0  ;;  %v549_v6 = vpop.f32.mrf.mxu1 }
  0xef   : > { %857 = vst.msk [vmem:[%s1403_s9 + $0x5c] sm:$0xf] %vm833_vm1, %v1038_v47  ;;  %v1020_v41 = vpack.c.bf16 %v678_v51, %v678_v51  ;;  %v1036_v62 = vpack.c.bf16 %v694_v29, %v694_v29  ;;  %v558_v4 = vadd.f32 %v1178_v56, %v1359_v39  ;;  %v681_v54 = vmax.f32 %v649_v52, 0.0 }
  0xf0   : > { %v1025_v7 = vpack.c.bf16 %v683_v57, %v683_v57  ;;  %v1041_v8 = vpack.c.bf16 %v699_v40, %v699_v40  ;;  %v697_v9 = vmax.f32 %v665_v53, 0.0  ;;  %v652_v55 = vadd.f32 %v1070_v58, %v494_v63  ;;  %v1165_v32 = vpop.f32.mrf.mxu0  ;;  %v1181_v33 = vpop.f32.mrf.mxu1 }
  0xf1   : > { %839 = vst.msk [vmem:[%s1403_s9 + $0x14] sm:$0xf] %vm833_vm1, %v1020_v41  ;;  %855 = vst.msk [vmem:[%s1403_s9 + $0x54] sm:$0xf] %vm833_vm1, %v1036_v62  ;;  %v668_v42 = vadd.f32 %v1102_v59, %v558_v4  ;;  %v486_v14 = vadd.f32 %v1359_v39, %v485_v5  ;;  %v550_v43 = vadd.f32 %v1359_v39, %v549_v6 }
  0xf2   : > { %844 = vst.msk [vmem:[%s1403_s9 + $0x28] sm:$0xf] %vm833_vm1, %v1025_v7  ;;  %860 = vst.msk [vmem:[%s1403_s9 + $0x68] sm:$0xf] %vm833_vm1, %v1041_v8  ;;  %v1023_v15 = vpack.c.bf16 %v681_v54, %v681_v54  ;;  %v1039_v16 = vpack.c.bf16 %v697_v9, %v697_v9  ;;  %v507_v31 = vadd.f32 %v1165_v32, %v1359_v39  ;;  %v684_v36 = vmax.f32 %v652_v55, 0.0  ;;  %v498_v19 = vpop.f32.mrf.mxu0  ;;  %v562_v23 = vpop.f32.mrf.mxu1 }
  0xf3   : > { %v571_v58 = vadd.f32 %v1181_v33, %v1359_v39  ;;  %v700_v59 = vmax.f32 %v668_v42, 0.0  ;;  %v650_v17 = vadd.f32 %v1066_v0, %v486_v14  ;;  %v666_v18 = vadd.f32 %v1098_v1, %v550_v43 }
  0xf4   : > { %842 = vst.msk [vmem:[%s1403_s9 + $0x20] sm:$0xf] %vm833_vm1, %v1023_v15  ;;  %858 = vst.msk [vmem:[%s1403_s9 + $0x60] sm:$0xf] %vm833_vm1, %v1039_v16  ;;  %v655_v44 = vadd.f32 %v1077_v2, %v507_v31  ;;  %v499_v37 = vadd.f32 %v1359_v39, %v498_v19  ;;  %v563_v0 = vadd.f32 %v1359_v39, %v562_v23  ;;  %v1166_v21 = vpop.f32.mrf.mxu0  ;;  %v1182_v34 = vpop.f32.mrf.mxu1 }
  0xf5   : > { %v671_v24 = vadd.f32 %v1109_v3, %v571_v58  ;;  %v1026_v38 = vpack.c.bf16 %v684_v36, %v684_v36  ;;  %v1042_v1 = vpack.c.bf16 %v700_v59, %v700_v59  ;;  %v682_v45 = vmax.f32 %v650_v17, 0.0 }
  0xf6   : > { %v698_v20 = vmax.f32 %v666_v18, 0.0  ;;  %v687_v22 = vmax.f32 %v655_v44, 0.0  ;;  %v653_v2 = vadd.f32 %v1073_v10, %v499_v37  ;;  %v669_v3 = vadd.f32 %v1105_v11, %v563_v0  ;;  %v501_v47 = vpop.f32.mrf.mxu0  ;;  %v565_v51 = vpop.f32.mrf.mxu1 }
  0xf7   : > { %v703_v35 = vmax.f32 %v671_v24, 0.0  ;;  %845 = vst.msk [vmem:[%s1403_s9 + $0x2c] sm:$0xf] %vm833_vm1, %v1026_v38  ;;  %861 = vst.msk [vmem:[%s1403_s9 + $0x6c] sm:$0xf] %vm833_vm1, %v1042_v1  ;;  %v1024_v27 = vpack.c.bf16 %v682_v45, %v682_v45  ;;  %v510_v46 = vadd.f32 %v1166_v21, %v1359_v39  ;;  %v574_v26 = vadd.f32 %v1182_v34, %v1359_v39 }
  0xf8   : > { %v1040_v25 = vpack.c.bf16 %v698_v20, %v698_v20  ;;  %v1029_v29 = vpack.c.bf16 %v687_v22, %v687_v22  ;;  %v685_v10 = vmax.f32 %v653_v2, 0.0  ;;  %v701_v56 = vmax.f32 %v669_v3, 0.0 }
  0xf9   : > { %v1045_v30 = vpack.c.bf16 %v703_v35, %v703_v35  ;;  %843 = vst.msk [vmem:[%s1403_s9 + $0x24] sm:$0xf] %vm833_vm1, %v1024_v27  ;;  %v656_v11 = vadd.f32 %v1078_v12, %v510_v46  ;;  %v672_v57 = vadd.f32 %v1110_v13, %v574_v26  ;;  %v502_v40 = vadd.f32 %v1359_v39, %v501_v47 }
  0xfa   : > { %859 = vst.msk [vmem:[%s1403_s9 + $0x64] sm:$0xf] %vm833_vm1, %v1040_v25  ;;  %v566_v52 = vadd.f32 %v1359_v39, %v565_v51  ;;  %848 = vst.msk [vmem:[%s1403_s9 + $0x38] sm:$0xf] %vm833_vm1, %v1029_v29  ;;  %v1027_v53 = vpack.c.bf16 %v685_v10, %v685_v10  ;;  %v1043_v41 = vpack.c.bf16 %v701_v56, %v701_v56 }
  0xfb   : > { %864 = vst.msk [vmem:[%s1403_s9 + $0x78] sm:$0xf] %vm833_vm1, %v1045_v30  ;;  %v688_v62 = vmax.f32 %v656_v11, 0.0  ;;  %v704_v48 = vmax.f32 %v672_v57, 0.0  ;;  %v654_v49 = vadd.f32 %v1074_v28, %v502_v40 }
  0xfc   : > { %v670_v12 = vadd.f32 %v1106_v50, %v566_v52  ;;  %846 = vst.msk [vmem:[%s1403_s9 + $0x30] sm:$0xf] %vm833_vm1, %v1027_v53  ;;  %862 = vst.msk [vmem:[%s1403_s9 + $0x70] sm:$0xf] %vm833_vm1, %v1043_v41 }
  0xfd   : > { %v1030_v39 = vpack.c.bf16 %v688_v62, %v688_v62  ;;  %v1046_v13 = vpack.c.bf16 %v704_v48, %v704_v48  ;;  %v686_v63 = vmax.f32 %v654_v49, 0.0 }
  0xfe   : > { %v702_v4 = vmax.f32 %v670_v12, 0.0 }
  0xff   : > { %849 = vst.msk [vmem:[%s1403_s9 + $0x3c] sm:$0xf] %vm833_vm1, %v1030_v39  ;;  %865 = vst.msk [vmem:[%s1403_s9 + $0x7c] sm:$0xf] %vm833_vm1, %v1046_v13  ;;  %v1028_v5 = vpack.c.bf16 %v686_v63, %v686_v63 }
 0x100   : > { %v1044_v6 = vpack.c.bf16 %v702_v4, %v702_v4 }
 0x101   : > { %847 = vst.msk [vmem:[%s1403_s9 + $0x34] sm:$0xf] %vm833_vm1, %v1028_v5 }
 0x102   : > { %863 = vst.msk [vmem:[%s1403_s9 + $0x74] sm:$0xf] %vm833_vm1, %v1044_v6 }
 0x103 PF: > { %s14_s15 = sadd.s32 1, %s1222_s15  }
 0x104   : > { %p11_p4 = scmp.ge.s32.totalorder %s14_s15, 4  }
 0x106   :  { %13 = sbr.rel (!%p11_p4) target bundleno = 1 (0x1), region = 69 }

// kernel: erfnet_forward.147
= control target key start
LH: loop header
LB: loop body
LE: loop exit
PB: predicated region body
PF: predicated region fallthrough
CT: control target
= control target key end

     0   :  { %s752_s12 = smov 0   ;;  %s913_s0 = inlined_call_operand.vmem [shape: bf16[512,16], index: 0, kind: input, shape index: {}]   ;;  %s914_s1 = inlined_call_operand.vmem [shape: bf16[16,12], index: 1, kind: input, shape index: {}]   ;;  %s915_s2 = inlined_call_operand.vmem [shape: f32[1,12], index: 2, kind: input, shape index: {}]   ;;  %s916_s3 = inlined_call_operand.vmem [shape: f32[512,12], index: 3, kind: output, shape index: {}]  }
   0x1 LB: > { %s601_s13 = sadd.s32 4294967295, %s730_s12   ;;  %p605_p0 = scmp.ge.s32.totalorder %s730_s12, 1  ;;  %s730_s12 = sphi %s752_s12, %s13_s12  }
   0x2   : > { %p138_p1 = scmp.lt.s32.totalorder %s730_s12, 3 }
   0x4   : > { %p139_p2 = pnand %p605_p0, %p138_p1 }
   0x5   : > { %s606_s16 = sshll.u32 (!%p139_p2), %s601_s13, 5 }
   0x6   : > { %142 = sbr.rel (%p139_p2) target bundleno = 243 (0xf3), region = 32  ;;  %p163_p3 = scmp.lt.s32.totalorder (!%p139_p2), %s606_s16, 63 }
   0xb   : > { %v707_v0 = vld [vmem:[%s914_s1] sm:$0xff]   ;;  %s918_s16 = smov (!%p163_p3, %s606_s16), 63  ;;  %vm302_vm0 = vcmask 130048   ;;  %vm512_vm1 = vcmask 97280  }
   0xc   : > { %663 = vmatprep.subr.bf16.mxu0 %v707_v0  ;;  %697 = vmatprep.subr.bf16.mxu1 %v707_v0  ;;  %s607_s17 = sshll.u32 %s918_s16, 2  ;;  %s609_s21 = sshll.u32 %s918_s16, 3  ;;  %v807_v17 = vld [vmem:[%s915_s2] ss:$0 sm:$0xff] }
   0xd   : > { %664 = vmatpush3.bf16.msra.mxu0 %v707_v0  ;;  %698 = vmatpush3.bf16.msra.mxu1 %v707_v0  ;;  %s769_s20 = scalar_lea.vmem %s913_s0, %s607_s17  ;;  %s812_s26 = scalar_lea.vmem %s916_s3, %s609_s21 }
   0xe   : > { %v708_v1 = vld [vmem:[%s769_s20] sm:$0xff]   ;;  %v710_v3 = vld [vmem:[%s769_s20 + $0x8] sm:$0xff]   ;;  %v712_v5 = vld [vmem:[%s769_s20 + $0x10] sm:$0xff]  }
   0xf   : > { %v709_v2 = vld [vmem:[%s769_s20 + $0x40] sm:$0xff]   ;;  %665 = vmatprep.mubr.msk.bf16.mxu0 %vm302_vm0, %v708_v1  ;;  %v711_v4 = vld [vmem:[%s769_s20 + $0x48] sm:$0xff]   ;;  %v713_v6 = vld [vmem:[%s769_s20 + $0x50] sm:$0xff]  }
  0x10   : > { %681 = vmatprep.mubr.msk.bf16.mxu1 %vm302_vm0, %v709_v2  ;;  %666 = vmatmul.mubr.msk.bf16.vlgmr.msra.gmra.mxu0 %vm302_vm0, %v710_v3  ;;  %v714_v7 = vld [vmem:[%s769_s20 + $0x18] sm:$0xff]   ;;  %v716_v9 = vld [vmem:[%s769_s20 + $0x20] sm:$0xff]   ;;  %v718_v11 = vld [vmem:[%s769_s20 + $0x28] sm:$0xff]  }
  0x11   : > { %682 = vmatmul.mubr.msk.bf16.vlgmr.msra.gmra.mxu1 %vm302_vm0, %v711_v4  ;;  %669 = vmatprep.mubr.msk.bf16.mxu0 %vm302_vm0, %v712_v5  ;;  %v715_v8 = vld [vmem:[%s769_s20 + $0x58] sm:$0xff]   ;;  %v717_v10 = vld [vmem:[%s769_s20 + $0x60] sm:$0xff]   ;;  %v719_v12 = vld [vmem:[%s769_s20 + $0x68] sm:$0xff]  }
  0x12   : > { %685 = vmatprep.mubr.msk.bf16.mxu1 %vm302_vm0, %v713_v6  ;;  %v720_v13 = vld [vmem:[%s769_s20 + $0x30] sm:$0xff]   ;;  %v722_v15 = vld [vmem:[%s769_s20 + $0x38] sm:$0xff]  }
  0x13   : > { %v721_v14 = vld [vmem:[%s769_s20 + $0x70] sm:$0xff]   ;;  %v723_v16 = vld [vmem:[%s769_s20 + $0x78] sm:$0xff]  }
  0x18   : > { %670 = vmatmul.mubr.msk.bf16.gmra.mxu0 %vm302_vm0, %v714_v7 }
  0x19   : > { %686 = vmatmul.mubr.msk.bf16.gmra.mxu1 %vm302_vm0, %v715_v8  ;;  %673 = vmatprep.mubr.msk.bf16.mxu0 %vm302_vm0, %v716_v9 }
  0x1a   : > { %689 = vmatprep.mubr.msk.bf16.mxu1 %vm302_vm0, %v717_v10 }
  0x20   : > { %674 = vmatmul.mubr.msk.bf16.gmra.mxu0 %vm302_vm0, %v718_v11 }
  0x21   : > { %690 = vmatmul.mubr.msk.bf16.gmra.mxu1 %vm302_vm0, %v719_v12  ;;  %677 = vmatprep.mubr.msk.bf16.mxu0 %vm302_vm0, %v720_v13 }
  0x22   : > { %693 = vmatprep.mubr.msk.bf16.mxu1 %vm302_vm0, %v721_v14 }
  0x28   : > { %678 = vmatmul.mubr.msk.bf16.gmra.mxu0 %vm302_vm0, %v722_v15 }
  0x29   : > { %694 = vmatmul.mubr.msk.bf16.gmra.mxu1 %vm302_vm0, %v723_v16 }
  0xd0   : > { %v667_v18 = vpop.f32.mrf.mxu0 }
  0xd1   : > { %v394_v19 = vadd.f32 %v667_v18, %v807_v17  ;;  %v683_v20 = vpop.f32.mrf.mxu1 }
  0xd2   : > { %v458_v21 = vadd.f32 %v683_v20, %v807_v17  ;;  %v385_v22 = vpop.f32.mrf.mxu0 }
  0xd3   : > { %515 = vst.msk [vmem:[%s812_s26 + $0x10] sm:$0xff] %vm512_vm1, %v394_v19  ;;  %v386_v23 = vadd.f32 %v807_v17, %v385_v22  ;;  %v449_v24 = vpop.f32.mrf.mxu1 }
  0xd4   : > { %531 = vst.msk [vmem:[%s812_s26 + $0x90] sm:$0xff] %vm512_vm1, %v458_v21  ;;  %v450_v25 = vadd.f32 %v807_v17, %v449_v24  ;;  %v668_v26 = vpop.f32.mrf.mxu0 }
  0xd5   : > { %513 = vst.msk [vmem:[%s812_s26] sm:$0xff] %vm512_vm1, %v386_v23  ;;  %v397_v27 = vadd.f32 %v668_v26, %v807_v17  ;;  %v684_v28 = vpop.f32.mrf.mxu1 }
  0xd6   : > { %529 = vst.msk [vmem:[%s812_s26 + $0x80] sm:$0xff] %vm512_vm1, %v450_v25  ;;  %v461_v29 = vadd.f32 %v684_v28, %v807_v17  ;;  %v388_v30 = vpop.f32.mrf.mxu0 }
  0xd7   : > { %516 = vst.msk [vmem:[%s812_s26 + $0x18] sm:$0xff] %vm512_vm1, %v397_v27  ;;  %v389_v31 = vadd.f32 %v807_v17, %v388_v30  ;;  %v452_v32 = vpop.f32.mrf.mxu1 }
  0xd8   : > { %532 = vst.msk [vmem:[%s812_s26 + $0x98] sm:$0xff] %vm512_vm1, %v461_v29  ;;  %v453_v33 = vadd.f32 %v807_v17, %v452_v32  ;;  %v671_v34 = vpop.f32.mrf.mxu0 }
  0xd9   : > { %514 = vst.msk [vmem:[%s812_s26 + $0x8] sm:$0xff] %vm512_vm1, %v389_v31  ;;  %v410_v35 = vadd.f32 %v671_v34, %v807_v17  ;;  %v687_v36 = vpop.f32.mrf.mxu1 }
  0xda   : > { %530 = vst.msk [vmem:[%s812_s26 + $0x88] sm:$0xff] %vm512_vm1, %v453_v33  ;;  %v474_v37 = vadd.f32 %v687_v36, %v807_v17  ;;  %v401_v38 = vpop.f32.mrf.mxu0 }
  0xdb   : > { %519 = vst.msk [vmem:[%s812_s26 + $0x30] sm:$0xff] %vm512_vm1, %v410_v35  ;;  %v402_v39 = vadd.f32 %v807_v17, %v401_v38  ;;  %v465_v40 = vpop.f32.mrf.mxu1 }
  0xdc   : > { %535 = vst.msk [vmem:[%s812_s26 + $0xb0] sm:$0xff] %vm512_vm1, %v474_v37  ;;  %v466_v41 = vadd.f32 %v807_v17, %v465_v40  ;;  %v672_v42 = vpop.f32.mrf.mxu0 }
  0xdd   : > { %517 = vst.msk [vmem:[%s812_s26 + $0x20] sm:$0xff] %vm512_vm1, %v402_v39  ;;  %v413_v43 = vadd.f32 %v672_v42, %v807_v17  ;;  %v688_v44 = vpop.f32.mrf.mxu1 }
  0xde   : > { %533 = vst.msk [vmem:[%s812_s26 + $0xa0] sm:$0xff] %vm512_vm1, %v466_v41  ;;  %v477_v45 = vadd.f32 %v688_v44, %v807_v17  ;;  %v404_v46 = vpop.f32.mrf.mxu0 }
  0xdf   : > { %520 = vst.msk [vmem:[%s812_s26 + $0x38] sm:$0xff] %vm512_vm1, %v413_v43  ;;  %v405_v47 = vadd.f32 %v807_v17, %v404_v46  ;;  %v468_v48 = vpop.f32.mrf.mxu1 }
  0xe0   : > { %536 = vst.msk [vmem:[%s812_s26 + $0xb8] sm:$0xff] %vm512_vm1, %v477_v45  ;;  %v469_v49 = vadd.f32 %v807_v17, %v468_v48  ;;  %v675_v50 = vpop.f32.mrf.mxu0 }
  0xe1   : > { %518 = vst.msk [vmem:[%s812_s26 + $0x28] sm:$0xff] %vm512_vm1, %v405_v47  ;;  %v426_v51 = vadd.f32 %v675_v50, %v807_v17  ;;  %v691_v52 = vpop.f32.mrf.mxu1 }
  0xe2   : > { %534 = vst.msk [vmem:[%s812_s26 + $0xa8] sm:$0xff] %vm512_vm1, %v469_v49  ;;  %v490_v53 = vadd.f32 %v691_v52, %v807_v17  ;;  %v417_v54 = vpop.f32.mrf.mxu0 }
  0xe3   : > { %523 = vst.msk [vmem:[%s812_s26 + $0x50] sm:$0xff] %vm512_vm1, %v426_v51  ;;  %v418_v55 = vadd.f32 %v807_v17, %v417_v54  ;;  %v481_v56 = vpop.f32.mrf.mxu1 }
  0xe4   : > { %539 = vst.msk [vmem:[%s812_s26 + $0xd0] sm:$0xff] %vm512_vm1, %v490_v53  ;;  %v482_v57 = vadd.f32 %v807_v17, %v481_v56  ;;  %v676_v58 = vpop.f32.mrf.mxu0 }
  0xe5   : > { %521 = vst.msk [vmem:[%s812_s26 + $0x40] sm:$0xff] %vm512_vm1, %v418_v55  ;;  %v429_v59 = vadd.f32 %v676_v58, %v807_v17  ;;  %v692_v60 = vpop.f32.mrf.mxu1 }
  0xe6   : > { %537 = vst.msk [vmem:[%s812_s26 + $0xc0] sm:$0xff] %vm512_vm1, %v482_v57  ;;  %v493_v61 = vadd.f32 %v692_v60, %v807_v17  ;;  %v420_v62 = vpop.f32.mrf.mxu0 }
  0xe7   : > { %524 = vst.msk [vmem:[%s812_s26 + $0x58] sm:$0xff] %vm512_vm1, %v429_v59  ;;  %v421_v63 = vadd.f32 %v807_v17, %v420_v62  ;;  %v484_v0 = vpop.f32.mrf.mxu1 }
  0xe8   : > { %540 = vst.msk [vmem:[%s812_s26 + $0xd8] sm:$0xff] %vm512_vm1, %v493_v61  ;;  %v485_v1 = vadd.f32 %v807_v17, %v484_v0  ;;  %v679_v2 = vpop.f32.mrf.mxu0 }
  0xe9   : > { %522 = vst.msk [vmem:[%s812_s26 + $0x48] sm:$0xff] %vm512_vm1, %v421_v63  ;;  %v442_v3 = vadd.f32 %v679_v2, %v807_v17  ;;  %v695_v4 = vpop.f32.mrf.mxu1 }
  0xea   : > { %538 = vst.msk [vmem:[%s812_s26 + $0xc8] sm:$0xff] %vm512_vm1, %v485_v1  ;;  %v506_v5 = vadd.f32 %v695_v4, %v807_v17  ;;  %v433_v6 = vpop.f32.mrf.mxu0 }
  0xeb   : > { %527 = vst.msk [vmem:[%s812_s26 + $0x70] sm:$0xff] %vm512_vm1, %v442_v3  ;;  %v434_v7 = vadd.f32 %v807_v17, %v433_v6  ;;  %v497_v8 = vpop.f32.mrf.mxu1 }
  0xec   : > { %543 = vst.msk [vmem:[%s812_s26 + $0xf0] sm:$0xff] %vm512_vm1, %v506_v5  ;;  %v498_v9 = vadd.f32 %v807_v17, %v497_v8  ;;  %v680_v10 = vpop.f32.mrf.mxu0 }
  0xed   : > { %525 = vst.msk [vmem:[%s812_s26 + $0x60] sm:$0xff] %vm512_vm1, %v434_v7  ;;  %v445_v11 = vadd.f32 %v680_v10, %v807_v17  ;;  %v696_v12 = vpop.f32.mrf.mxu1 }
  0xee   : > { %541 = vst.msk [vmem:[%s812_s26 + $0xe0] sm:$0xff] %vm512_vm1, %v498_v9  ;;  %v509_v13 = vadd.f32 %v696_v12, %v807_v17  ;;  %v436_v14 = vpop.f32.mrf.mxu0 }
  0xef   : > { %528 = vst.msk [vmem:[%s812_s26 + $0x78] sm:$0xff] %vm512_vm1, %v445_v11  ;;  %v437_v15 = vadd.f32 %v807_v17, %v436_v14  ;;  %v500_v16 = vpop.f32.mrf.mxu1 }
  0xf0   : > { %544 = vst.msk [vmem:[%s812_s26 + $0xf8] sm:$0xff] %vm512_vm1, %v509_v13  ;;  %v501_v18 = vadd.f32 %v807_v17, %v500_v16 }
  0xf1   : > { %526 = vst.msk [vmem:[%s812_s26 + $0x68] sm:$0xff] %vm512_vm1, %v437_v15 }
  0xf2   : > { %542 = vst.msk [vmem:[%s812_s26 + $0xe8] sm:$0xff] %vm512_vm1, %v501_v18 }
  0xf3 PF: > { %s13_s12 = sadd.s32 1, %s730_s12  }
  0xf4   : > { %p10_p4 = scmp.ge.s32.totalorder %s13_s12, 4  }
  0xf6   :  { %12 = sbr.rel (!%p10_p4) target bundleno = 1 (0x1), region = 62 }

</bundles_post_ra>
